<compile_context>
chip_gen: v6e
topology: v6e:2x2x1
jax: 0.10.0
libtpu: 0.0.40
codegen_flags: <defaults>
</compile_context>

<pallas_src>
import functools

import numpy as np

import jax
import jax.numpy as jnp
from jax.experimental import pallas as pl
from jax.experimental.pallas import tpu as pltpu


# --------------------- host-side banded weight construction -----------------

def _band_base_conv(w0, b0, W, Cin, Cout):
    """Conv0 (3x3, pad 1) as 3 banded matrices over the lane-flattened W axis.

    Output columns come in 3 groups of Wo*Cout lanes each:
      group 0: w = 2*wo       (pool centre tap)
      group 1: w = 2*wo + 1   (pool right tap)
      group 2: w = 2*wo - 1   (pool left tap; the wo=0 block is zero here and
                               masked to -inf inside the kernel)
    so the W direction of MaxPool2d(3,2,1) becomes full-lane maxes.
    """
    Wo = W // 2
    L = Wo * Cout
    w9 = np.asarray(w0, np.float32).reshape(3, 3, Cin, Cout)   # (dy, dx, ci, co)
    bn = np.asarray(b0, np.float32).reshape(Cout)
    Wb = np.zeros((3, W * Cin, 3 * L), np.float32)
    bt = np.zeros((1, 3 * L), np.float32)
    for grp, shift in enumerate((0, 1, -1)):                   # w = 2*wo + shift
        for wo in range(Wo):
            w = 2 * wo + shift
            if not (0 <= w < W):
                continue                                       # group 2, wo=0
            col = grp * L + wo * Cout
            bt[0, col:col + Cout] = bn
            for dy in range(3):
                for dx in range(3):
                    wi = w + dx - 1                            # input column
                    if 0 <= wi < W:
                        Wb[dy, wi * Cin:(wi + 1) * Cin, col:col + Cout] = w9[dy, dx]
    return Wb, bt


def _band_res_conv(w, b, Wo, C):
    """Residual 3x3 conv as 3 banded (Wo*C, Wo*C) matrices (W zero-pad built in)."""
    L = Wo * C
    w9 = np.asarray(w, np.float32).reshape(3, 3, C, C)
    Wb = np.zeros((3, L, L), np.float32)
    bt = np.tile(np.asarray(b, np.float32).reshape(C), Wo).reshape(1, L)
    for dy in range(3):
        for wo in range(Wo):
            for dx in range(3):
                wi = wo + dx - 1
                if 0 <= wi < Wo:
                    Wb[dy, wi * C:(wi + 1) * C, wo * C:(wo + 1) * C] = w9[dy, dx]
    return Wb, bt


# ----------------------------- fused kernel ---------------------------------

def _impala_block_kernel(x_ref, w0_ref, b0_ref, rw_ref, rb_ref, o_ref,
                         apad, tpad, hprev,
                         *, B, H, W, Cin, Cout, Ho, Wo, mxu_dtype):
    f32 = jnp.float32
    neg = jnp.float32(-jnp.inf)
    L = Wo * Cout                               # 128: lane-dense pool / residual width
    rows0, rows = B * H, B * Ho

    # ---- base Conv2d(Cin, Cout, 3, 1, 1): three banded lane-matmuls ---------
    # x_ref is already zero-padded along H by the wrapper (rows 0 and H+1);
    # W padding lives inside the banded weight matrices.
    acc0 = jnp.zeros((rows0, 3 * L), f32)
    for dy in range(3):
        xin = x_ref[:, dy:dy + H, :].reshape(rows0, W * Cin).astype(mxu_dtype)
        acc0 = acc0 + jnp.dot(xin, w0_ref[dy], preferred_element_type=f32)
    y0 = acc0 + b0_ref[...].astype(f32)         # (B*H, 3L): groups w=2wo, 2wo+1, 2wo-1

    # ---- MaxPool2d(3, stride=2, pad=1) ---------------------------------------
    # W direction: the three conv0 column groups ARE the three pool taps.
    ev = y0[:, 0:L]                             # w = 2wo
    od = y0[:, L:2 * L]                         # w = 2wo + 1
    odp = y0[:, 2 * L:3 * L]                    # w = 2wo - 1 (wo=0 block is junk)
    lane = jax.lax.broadcasted_iota(jnp.int32, (rows0, L), 1)
    odp = jnp.where(lane < Cout, neg, odp)      # -inf at the w = -1 border
    wmax = jnp.maximum(jnp.maximum(ev, od), odp).reshape(B, H, L)
    # H direction (stride 2): even/odd row split + one shifted-odd-row copy.
    eo = wmax.reshape(B, Ho, 2, L)
    r_e = eo[:, :, 0, :]                        # conv rows 2ho
    r_o = eo[:, :, 1, :]                        # conv rows 2ho + 1
    hprev[:, 0:1, :] = jnp.full((B, 1, L), neg, f32)
    hprev[:, 1:Ho, :] = r_o[:, 0:Ho - 1, :]     # conv rows 2ho - 1
    pooled = jnp.maximum(jnp.maximum(r_e, r_o), hprev[...])     # (B, Ho, L)

    # ---- 2 x IMPALAResidualBlock ---------------------------------------------
    # Residual stream kept H-zero-padded in VMEM; border rows filled once.
    zrow = jnp.zeros((B, 1, L), f32)
    apad[:, 0:1, :] = zrow
    apad[:, Ho + 1:Ho + 2, :] = zrow
    tpad[:, 0:1, :] = zrow
    tpad[:, Ho + 1:Ho + 2, :] = zrow
    apad[:, 1:Ho + 1, :] = pooled

    def band_conv(src, widx):                   # ReLU -> 3x3 conv (banded matmuls)
        acc = jnp.zeros((rows, L), f32)
        for dy in range(3):
            tap = jnp.maximum(src[:, dy:dy + Ho, :], 0.0)       # ReLU (borders stay 0)
            acc = acc + jnp.dot(tap.reshape(rows, L).astype(mxu_dtype),
                                rw_ref[widx, dy], preferred_element_type=f32)
        return (acc + rb_ref[widx].astype(f32)).reshape(B, Ho, L)

    for blk in range(2):
        tpad[:, 1:Ho + 1, :] = band_conv(apad, 2 * blk)
        apad[:, 1:Ho + 1, :] = apad[:, 1:Ho + 1, :] + band_conv(tpad, 2 * blk + 1)

    o_ref[...] = apad[:, 1:Ho + 1, :].astype(o_ref.dtype)       # full-lane store


# ----------------------------- wrapper ---------------------------------------

def _pick_fold(n, cap=16):
    """Images per grid step: amortize fixed step cost and widen matmul M, while
    keeping >= 2 grid steps (both v7x TCs busy) and VMEM use tiny."""
    divs = [b for b in range(1, min(n, cap) + 1) if n % b == 0]
    multi = [b for b in divs if n // b >= 2]
    return max(multi) if multi else max(divs)


def impala_base_block(x, params, *, compute_dtype=jnp.bfloat16, batch_fold=None):
    """x: (N, H, W, Cin) NHWC float32.
    params = ((w0, b0), [(w1, b1, w2, b2)] * 2) with conv weights shaped
    (9, Cin, Cout) (3x3 taps flattened, tap index = dy*3 + dx)."""
    (w0, b0), res_params = params
    N, H, W, Cin = x.shape
    Cout = w0.shape[-1]
    assert H % 2 == 0 and W % 2 == 0, "pool decimation written for even H, W"
    Ho, Wo = H // 2, W // 2                     # valid for kernel=3 / stride=2 / pad=1
    L = Wo * Cout

    B = _pick_fold(N) if batch_fold is None else batch_fold
    assert N % B == 0

    cdt = jnp.dtype(compute_dtype)

    # Banded lane-matmul weights (host-built once, VMEM-resident across the grid).
    w0b, b0t = _band_base_conv(w0, b0, W, Cin, Cout)
    rwl, rbl = [], []
    for (w1, b1, w2, b2) in res_params:
        for wq, bq in ((w1, b1), (w2, b2)):
            Wb, bt = _band_res_conv(wq, bq, Wo, Cout)
            rwl.append(Wb)
            rbl.append(bt)
    w0b = jnp.asarray(w0b, cdt)
    rwb = jnp.asarray(np.stack(rwl), cdt)       # (4, 3, L, L)
    b0t = jnp.asarray(b0t, jnp.float32)
    rbt = jnp.asarray(np.stack(rbl), jnp.float32)   # (4, 1, L)

    # Pre-pad the input along H (zero rows) and flatten (W, Cin) into lanes so
    # the kernel never fills / copies an input padding buffer.
    xf = jnp.pad(x.astype(jnp.float32).reshape(N, H, W * Cin),
                 ((0, 0), (1, 1), (0, 0)))

    kernel = functools.partial(_impala_block_kernel, B=B, H=H, W=W, Cin=Cin,
                               Cout=Cout, Ho=Ho, Wo=Wo, mxu_dtype=cdt)
    out_flat = pl.pallas_call(
        kernel,
        out_shape=jax.ShapeDtypeStruct((N, Ho, L), x.dtype),
        grid=(N // B,),
        in_specs=[
            pl.BlockSpec((B, H + 2, W * Cin), lambda n: (n, 0, 0)),
            pl.BlockSpec((3, W * Cin, 3 * L), lambda n: (0, 0, 0)),   # resident
            pl.BlockSpec((1, 3 * L), lambda n: (0, 0)),               # resident
            pl.BlockSpec((4, 3, L, L), lambda n: (0, 0, 0, 0)),       # resident
            pl.BlockSpec((4, 1, L), lambda n: (0, 0, 0)),             # resident
        ],
        out_specs=pl.BlockSpec((B, Ho, L), lambda n: (n, 0, 0)),
        scratch_shapes=[
            pltpu.VMEM((B, Ho + 2, L), jnp.float32),   # residual stream (H-padded)
            pltpu.VMEM((B, Ho + 2, L), jnp.float32),   # inner conv act (H-padded)
            pltpu.VMEM((B, Ho, L), jnp.float32),       # pool: shifted-odd rows
        ],
        compiler_params=pltpu.CompilerParams(
            dimension_semantics=("parallel",)),        # batch blocks split across TCs
    )(xf, w0b, b0t, rwb, rbt)
    return out_flat.reshape(N, Ho, Wo, Cout)


# ----------------------------- pure-JAX reference ----------------------------

def _conv_ref(xi, w9, b, pre_relu):
    w = w9.reshape(3, 3, w9.shape[1], w9.shape[2])  # HWIO
    if pre_relu:
        xi = jnp.maximum(xi, 0.0)
    y = jax.lax.conv_general_dilated(
        xi, w, window_strides=(1, 1), padding=((1, 1), (1, 1)),
        dimension_numbers=('NHWC', 'HWIO', 'NHWC'))
    return y + b.reshape(1, 1, 1, -1)


def ref_forward(x, params):
    (w0, b0), res_params = params
    h = _conv_ref(x, w0, b0, False)
    h = jax.lax.reduce_window(h, -jnp.inf, jax.lax.max, (1, 3, 3, 1),
                              (1, 2, 2, 1),
                              padding=((0, 0), (1, 1), (1, 1), (0, 0)))
    for (w1, b1, w2, b2) in res_params:
        t = _conv_ref(h, w1, b1, True)
        h = _conv_ref(t, w2, b2, True) + h
    return h


# ----------------------------- main -------------------------------------------

if __name__ == "__main__":
    key = jax.random.PRNGKey(0)
    ks = jax.random.split(key, 11)

    N, Cin, H, W = 16, 3, 16, 16     # IMPALABaseBlock defaults: in_channels=3
    Cout = 16                        # out_channels=16, kernel=3, maxstride=2

    def conv_params(kw, kb, cin, cout):
        w = jax.random.normal(kw, (9, cin, cout), jnp.float32) * 0.1
        b = jax.random.normal(kb, (1, cout), jnp.float32) * 0.1
        return w, b

    w0, b0 = conv_params(ks[0], ks[1], Cin, Cout)
    res_params = []
    for i in range(2):  # two residual blocks, each with two convs
        w1, b1 = conv_params(ks[2 + 4 * i], ks[3 + 4 * i], Cout, Cout)
        w2, b2 = conv_params(ks[4 + 4 * i], ks[5 + 4 * i], Cout, Cout)
        res_params.append((w1, b1, w2, b2))
    params = ((w0, b0), res_params)

    x_nchw = jax.random.normal(ks[10], (N, Cin, H, W), jnp.float32)
    x = jnp.transpose(x_nchw, (0, 2, 3, 1))  # NCHW (PyTorch) -> NHWC (kernel)

    ref = jax.block_until_ready(ref_forward(x, params))

    # 1) f32 MXU operands: strict semantic check against the XLA reference.
    out_f32 = jax.block_until_ready(
        impala_base_block(x, params, compute_dtype=jnp.float32))
    assert out_f32.shape == (N, H // 2, W // 2, Cout), out_f32.shape
    assert jnp.allclose(out_f32, ref, atol=1e-4, rtol=1e-4), \
        float(jnp.max(jnp.abs(out_f32 - ref)))

    # 2) bf16 MXU operands (production path, ~2x MXU throughput): checked at a
    #    bf16-operand error envelope (outputs are O(1); 5 stacked convs).
    out_bf16 = jax.block_until_ready(
        impala_base_block(x, params, compute_dtype=jnp.bfloat16))
    err = float(jnp.max(jnp.abs(out_bf16 - ref)))
    assert err < 1e-1, err

    print("KERNEL_OK")
</pallas_src>

<mosaic_0001>
module attributes {stable_mosaic.version = 11 : i64} {
  func.func @_impala_block_kernel(%arg0: i32, %arg1: memref<8x18x48xf32, #tpu.memory_space<vmem>>, %arg2: memref<3x48x384xf32, #tpu.memory_space<vmem>>, %arg3: memref<1x384xf32, #tpu.memory_space<vmem>>, %arg4: memref<4x3x128x128xf32, #tpu.memory_space<vmem>>, %arg5: memref<4x1x128xf32, #tpu.memory_space<vmem>>, %arg6: memref<8x8x128xf32, #tpu.memory_space<vmem>>, %arg7: memref<8x10x128xf32, #tpu.memory_space<vmem>>, %arg8: memref<8x10x128xf32, #tpu.memory_space<vmem>>, %arg9: memref<8x8x128xf32, #tpu.memory_space<vmem>>) attributes {dimension_semantics = [#tpu.dimension_semantics<parallel>], iteration_bounds = array<i64: 2>, scalar_prefetch = 0 : i64, scratch_operands = 3 : i64, tpu.core_type = #tpu.core_type<tc>, window_params = [{transform_indices = @transform_0, window_bounds = array<i64: 8, 18, 48>}, {pipeline_mode = #tpu.pipeline_mode<synchronous>, transform_indices = @transform_1, window_bounds = array<i64: 3, 48, 384>}, {pipeline_mode = #tpu.pipeline_mode<synchronous>, transform_indices = @transform_2, window_bounds = array<i64: 1, 384>}, {pipeline_mode = #tpu.pipeline_mode<synchronous>, transform_indices = @transform_3, window_bounds = array<i64: 4, 3, 128, 128>}, {pipeline_mode = #tpu.pipeline_mode<synchronous>, transform_indices = @transform_4, window_bounds = array<i64: 4, 1, 128>}, {transform_indices = @transform_5, window_bounds = array<i64: 8, 8, 128>}]} {
    %cst = arith.constant 0.000000e+00 : f32
    %0 = vector.broadcast %cst : f32 to vector<128x384xf32>
    %c0 = arith.constant 0 : index
    %c0_0 = arith.constant 0 : index
    %c0_1 = arith.constant 0 : index
    %1 = vector.load %arg1[%c0, %c0_0, %c0_1] : memref<8x18x48xf32, #tpu.memory_space<vmem>>, vector<8x16x48xf32>
    %2 = vector.shape_cast %1 : vector<8x16x48xf32> to vector<128x48xf32>
    %c0_2 = arith.constant 0 : index
    %c0_3 = arith.constant 0 : index
    %c0_4 = arith.constant 0 : index
    %3 = vector.load %arg2[%c0_2, %c0_3, %c0_4] : memref<3x48x384xf32, #tpu.memory_space<vmem>>, vector<1x48x384xf32>
    %4 = vector.shape_cast %3 : vector<1x48x384xf32> to vector<48x384xf32>
    %cst_5 = arith.constant dense<0.000000e+00> : vector<128x384xf32>
    %5 = tpu.matmul %2, %4, %cst_5 {dimension_numbers = #tpu.dot_dimension_numbers<[1], [0], [0], [1], [0, 0, 1, 1], [], []>} : vector<128x48xf32>, vector<48x384xf32>, vector<128x384xf32> -> vector<128x384xf32>
    %6 = arith.addf %0, %5 : vector<128x384xf32>
    %c0_6 = arith.constant 0 : index
    %c1 = arith.constant 1 : index
    %c0_7 = arith.constant 0 : index
    %7 = vector.load %arg1[%c0_6, %c1, %c0_7] : memref<8x18x48xf32, #tpu.memory_space<vmem>>, vector<8x16x48xf32>
    %8 = vector.shape_cast %7 : vector<8x16x48xf32> to vector<128x48xf32>
    %c1_8 = arith.constant 1 : index
    %c0_9 = arith.constant 0 : index
    %c0_10 = arith.constant 0 : index
    %9 = vector.load %arg2[%c1_8, %c0_9, %c0_10] : memref<3x48x384xf32, #tpu.memory_space<vmem>>, vector<1x48x384xf32>
    %10 = vector.shape_cast %9 : vector<1x48x384xf32> to vector<48x384xf32>
    %cst_11 = arith.constant dense<0.000000e+00> : vector<128x384xf32>
    %11 = tpu.matmul %8, %10, %cst_11 {dimension_numbers = #tpu.dot_dimension_numbers<[1], [0], [0], [1], [0, 0, 1, 1], [], []>} : vector<128x48xf32>, vector<48x384xf32>, vector<128x384xf32> -> vector<128x384xf32>
    %12 = arith.addf %6, %11 : vector<128x384xf32>
    %c0_12 = arith.constant 0 : index
    %c2 = arith.constant 2 : index
    %c0_13 = arith.constant 0 : index
    %13 = vector.load %arg1[%c0_12, %c2, %c0_13] : memref<8x18x48xf32, #tpu.memory_space<vmem>>, vector<8x16x48xf32>
    %14 = vector.shape_cast %13 : vector<8x16x48xf32> to vector<128x48xf32>
    %c2_14 = arith.constant 2 : index
    %c0_15 = arith.constant 0 : index
    %c0_16 = arith.constant 0 : index
    %15 = vector.load %arg2[%c2_14, %c0_15, %c0_16] : memref<3x48x384xf32, #tpu.memory_space<vmem>>, vector<1x48x384xf32>
    %16 = vector.shape_cast %15 : vector<1x48x384xf32> to vector<48x384xf32>
    %cst_17 = arith.constant dense<0.000000e+00> : vector<128x384xf32>
    %17 = tpu.matmul %14, %16, %cst_17 {dimension_numbers = #tpu.dot_dimension_numbers<[1], [0], [0], [1], [0, 0, 1, 1], [], []>} : vector<128x48xf32>, vector<48x384xf32>, vector<128x384xf32> -> vector<128x384xf32>
    %18 = arith.addf %12, %17 : vector<128x384xf32>
    %c0_18 = arith.constant 0 : index
    %c0_19 = arith.constant 0 : index
    %19 = vector.load %arg3[%c0_18, %c0_19] : memref<1x384xf32, #tpu.memory_space<vmem>>, vector<1x384xf32>
    %20 = vector.broadcast %19 : vector<1x384xf32> to vector<128x384xf32>
    %21 = arith.addf %18, %20 : vector<128x384xf32>
    %22 = vector.extract_strided_slice %21 {offsets = [0, 0], sizes = [128, 128], strides = [1, 1]} : vector<128x384xf32> to vector<128x128xf32>
    %23 = vector.extract_strided_slice %21 {offsets = [0, 128], sizes = [128, 128], strides = [1, 1]} : vector<128x384xf32> to vector<128x128xf32>
    %24 = vector.extract_strided_slice %21 {offsets = [0, 256], sizes = [128, 128], strides = [1, 1]} : vector<128x384xf32> to vector<128x128xf32>
    %25 = tpu.iota {dimensions = array<i32: 1>} : vector<128x128xi32>
    %c16_i32 = arith.constant 16 : i32
    %26 = vector.broadcast %c16_i32 : i32 to vector<128x128xi32>
    %27 = arith.cmpi slt, %25, %26 : vector<128x128xi32>
    %cst_20 = arith.constant 0xFF800000 : f32
    %28 = vector.broadcast %cst_20 : f32 to vector<128x128xf32>
    %29 = arith.select %27, %28, %24 : vector<128x128xi1>, vector<128x128xf32>
    %30 = arith.maximumf %22, %23 : vector<128x128xf32>
    %31 = arith.maximumf %30, %29 : vector<128x128xf32>
    %32 = vector.shape_cast %31 : vector<128x128xf32> to vector<8x16x128xf32>
    %33 = vector.shape_cast %32 : vector<8x16x128xf32> to vector<8x8x2x128xf32>
    %34 = vector.extract_strided_slice %33 {offsets = [0, 0, 0, 0], sizes = [8, 8, 1, 128], strides = [1, 1, 1, 1]} : vector<8x8x2x128xf32> to vector<8x8x1x128xf32>
    %35 = vector.shape_cast %34 : vector<8x8x1x128xf32> to vector<8x8x128xf32>
    %36 = vector.extract_strided_slice %33 {offsets = [0, 0, 1, 0], sizes = [8, 8, 1, 128], strides = [1, 1, 1, 1]} : vector<8x8x2x128xf32> to vector<8x8x1x128xf32>
    %37 = vector.shape_cast %36 : vector<8x8x1x128xf32> to vector<8x8x128xf32>
    %cst_21 = arith.constant 0xFF800000 : f32
    %38 = vector.broadcast %cst_21 : f32 to vector<8x1x128xf32>
    %c0_22 = arith.constant 0 : index
    %c0_23 = arith.constant 0 : index
    %c0_24 = arith.constant 0 : index
    %39 = vector.load %arg9[%c0_22, %c0_23, %c0_24] : memref<8x8x128xf32, #tpu.memory_space<vmem>>, vector<8x1x128xf32>
    tpu.vector_store %arg9[%c0_22, %c0_23, %c0_24], %38 {strides = array<i32>} : memref<8x8x128xf32, #tpu.memory_space<vmem>>, vector<8x1x128xf32>,
    %40 = vector.extract_strided_slice %37 {offsets = [0, 0, 0], sizes = [8, 7, 128], strides = [1, 1, 1]} : vector<8x8x128xf32> to vector<8x7x128xf32>
    %c0_25 = arith.constant 0 : index
    %c1_26 = arith.constant 1 : index
    %c0_27 = arith.constant 0 : index
    %41 = vector.load %arg9[%c0_25, %c1_26, %c0_27] : memref<8x8x128xf32, #tpu.memory_space<vmem>>, vector<8x7x128xf32>
    tpu.vector_store %arg9[%c0_25, %c1_26, %c0_27], %40 {strides = array<i32>} : memref<8x8x128xf32, #tpu.memory_space<vmem>>, vector<8x7x128xf32>,
    %42 = arith.maximumf %35, %37 : vector<8x8x128xf32>
    %c0_28 = arith.constant 0 : index
    %c0_29 = arith.constant 0 : index
    %c0_30 = arith.constant 0 : index
    %43 = vector.load %arg9[%c0_28, %c0_29, %c0_30] : memref<8x8x128xf32, #tpu.memory_space<vmem>>, vector<8x8x128xf32>
    %44 = arith.maximumf %42, %43 : vector<8x8x128xf32>
    %cst_31 = arith.constant 0.000000e+00 : f32
    %45 = vector.broadcast %cst_31 : f32 to vector<8x1x128xf32>
    %c0_32 = arith.constant 0 : index
    %c0_33 = arith.constant 0 : index
    %c0_34 = arith.constant 0 : index
    %46 = vector.load %arg7[%c0_32, %c0_33, %c0_34] : memref<8x10x128xf32, #tpu.memory_space<vmem>>, vector<8x1x128xf32>
    tpu.vector_store %arg7[%c0_32, %c0_33, %c0_34], %45 {strides = array<i32>} : memref<8x10x128xf32, #tpu.memory_space<vmem>>, vector<8x1x128xf32>,
    %c0_35 = arith.constant 0 : index
    %c9 = arith.constant 9 : index
    %c0_36 = arith.constant 0 : index
    %47 = vector.load %arg7[%c0_35, %c9, %c0_36] : memref<8x10x128xf32, #tpu.memory_space<vmem>>, vector<8x1x128xf32>
    tpu.vector_store %arg7[%c0_35, %c9, %c0_36], %45 {strides = array<i32>} : memref<8x10x128xf32, #tpu.memory_space<vmem>>, vector<8x1x128xf32>,
    %c0_37 = arith.constant 0 : index
    %c0_38 = arith.constant 0 : index
    %c0_39 = arith.constant 0 : index
    %48 = vector.load %arg8[%c0_37, %c0_38, %c0_39] : memref<8x10x128xf32, #tpu.memory_space<vmem>>, vector<8x1x128xf32>
    tpu.vector_store %arg8[%c0_37, %c0_38, %c0_39], %45 {strides = array<i32>} : memref<8x10x128xf32, #tpu.memory_space<vmem>>, vector<8x1x128xf32>,
    %c0_40 = arith.constant 0 : index
    %c9_41 = arith.constant 9 : index
    %c0_42 = arith.constant 0 : index
    %49 = vector.load %arg8[%c0_40, %c9_41, %c0_42] : memref<8x10x128xf32, #tpu.memory_space<vmem>>, vector<8x1x128xf32>
    tpu.vector_store %arg8[%c0_40, %c9_41, %c0_42], %45 {strides = array<i32>} : memref<8x10x128xf32, #tpu.memory_space<vmem>>, vector<8x1x128xf32>,
    %c0_43 = arith.constant 0 : index
    %c1_44 = arith.constant 1 : index
    %c0_45 = arith.constant 0 : index
    %50 = vector.load %arg7[%c0_43, %c1_44, %c0_45] : memref<8x10x128xf32, #tpu.memory_space<vmem>>, vector<8x8x128xf32>
    tpu.vector_store %arg7[%c0_43, %c1_44, %c0_45], %44 {strides = array<i32>} : memref<8x10x128xf32, #tpu.memory_space<vmem>>, vector<8x8x128xf32>,
    %cst_46 = arith.constant 0.000000e+00 : f32
    %51 = vector.broadcast %cst_46 : f32 to vector<64x128xf32>
    %c0_47 = arith.constant 0 : index
    %c0_48 = arith.constant 0 : index
    %c0_49 = arith.constant 0 : index
    %52 = vector.load %arg7[%c0_47, %c0_48, %c0_49] : memref<8x10x128xf32, #tpu.memory_space<vmem>>, vector<8x8x128xf32>
    %cst_50 = arith.constant 0.000000e+00 : f32
    %53 = vector.broadcast %cst_50 : f32 to vector<8x8x128xf32>
    %54 = arith.maximumf %52, %53 : vector<8x8x128xf32>
    %55 = vector.shape_cast %54 : vector<8x8x128xf32> to vector<64x128xf32>
    %c0_51 = arith.constant 0 : index
    %c0_52 = arith.constant 0 : index
    %c0_53 = arith.constant 0 : index
    %c0_54 = arith.constant 0 : index
    %56 = vector.load %arg4[%c0_51, %c0_52, %c0_53, %c0_54] : memref<4x3x128x128xf32, #tpu.memory_space<vmem>>, vector<1x1x128x128xf32>
    %57 = vector.shape_cast %56 : vector<1x1x128x128xf32> to vector<128x128xf32>
    %cst_55 = arith.constant dense<0.000000e+00> : vector<64x128xf32>
    %58 = tpu.matmul %55, %57, %cst_55 {dimension_numbers = #tpu.dot_dimension_numbers<[1], [0], [0], [1], [0, 0, 1, 1], [], []>} : vector<64x128xf32>, vector<128x128xf32>, vector<64x128xf32> -> vector<64x128xf32>
    %59 = arith.addf %51, %58 : vector<64x128xf32>
    %c0_56 = arith.constant 0 : index
    %c1_57 = arith.constant 1 : index
    %c0_58 = arith.constant 0 : index
    %60 = vector.load %arg7[%c0_56, %c1_57, %c0_58] : memref<8x10x128xf32, #tpu.memory_space<vmem>>, vector<8x8x128xf32>
    %cst_59 = arith.constant 0.000000e+00 : f32
    %61 = vector.broadcast %cst_59 : f32 to vector<8x8x128xf32>
    %62 = arith.maximumf %60, %61 : vector<8x8x128xf32>
    %63 = vector.shape_cast %62 : vector<8x8x128xf32> to vector<64x128xf32>
    %c0_60 = arith.constant 0 : index
    %c1_61 = arith.constant 1 : index
    %c0_62 = arith.constant 0 : index
    %c0_63 = arith.constant 0 : index
    %64 = vector.load %arg4[%c0_60, %c1_61, %c0_62, %c0_63] : memref<4x3x128x128xf32, #tpu.memory_space<vmem>>, vector<1x1x128x128xf32>
    %65 = vector.shape_cast %64 : vector<1x1x128x128xf32> to vector<128x128xf32>
    %cst_64 = arith.constant dense<0.000000e+00> : vector<64x128xf32>
    %66 = tpu.matmul %63, %65, %cst_64 {dimension_numbers = #tpu.dot_dimension_numbers<[1], [0], [0], [1], [0, 0, 1, 1], [], []>} : vector<64x128xf32>, vector<128x128xf32>, vector<64x128xf32> -> vector<64x128xf32>
    %67 = arith.addf %59, %66 : vector<64x128xf32>
    %c0_65 = arith.constant 0 : index
    %c2_66 = arith.constant 2 : index
    %c0_67 = arith.constant 0 : index
    %68 = vector.load %arg7[%c0_65, %c2_66, %c0_67] : memref<8x10x128xf32, #tpu.memory_space<vmem>>, vector<8x8x128xf32>
    %cst_68 = arith.constant 0.000000e+00 : f32
    %69 = vector.broadcast %cst_68 : f32 to vector<8x8x128xf32>
    %70 = arith.maximumf %68, %69 : vector<8x8x128xf32>
    %71 = vector.shape_cast %70 : vector<8x8x128xf32> to vector<64x128xf32>
    %c0_69 = arith.constant 0 : index
    %c2_70 = arith.constant 2 : index
    %c0_71 = arith.constant 0 : index
    %c0_72 = arith.constant 0 : index
    %72 = vector.load %arg4[%c0_69, %c2_70, %c0_71, %c0_72] : memref<4x3x128x128xf32, #tpu.memory_space<vmem>>, vector<1x1x128x128xf32>
    %73 = vector.shape_cast %72 : vector<1x1x128x128xf32> to vector<128x128xf32>
    %cst_73 = arith.constant dense<0.000000e+00> : vector<64x128xf32>
    %74 = tpu.matmul %71, %73, %cst_73 {dimension_numbers = #tpu.dot_dimension_numbers<[1], [0], [0], [1], [0, 0, 1, 1], [], []>} : vector<64x128xf32>, vector<128x128xf32>, vector<64x128xf32> -> vector<64x128xf32>
    %75 = arith.addf %67, %74 : vector<64x128xf32>
    %c0_74 = arith.constant 0 : index
    %c0_75 = arith.constant 0 : index
    %c0_76 = arith.constant 0 : index
    %76 = vector.load %arg5[%c0_74, %c0_75, %c0_76] : memref<4x1x128xf32, #tpu.memory_space<vmem>>, vector<1x1x128xf32>
    %77 = vector.shape_cast %76 : vector<1x1x128xf32> to vector<1x128xf32>
    %78 = vector.broadcast %77 : vector<1x128xf32> to vector<64x128xf32>
    %79 = arith.addf %75, %78 : vector<64x128xf32>
    %80 = vector.shape_cast %79 : vector<64x128xf32> to vector<8x8x128xf32>
    %c0_77 = arith.constant 0 : index
    %c1_78 = arith.constant 1 : index
    %c0_79 = arith.constant 0 : index
    %81 = vector.load %arg8[%c0_77, %c1_78, %c0_79] : memref<8x10x128xf32, #tpu.memory_space<vmem>>, vector<8x8x128xf32>
    tpu.vector_store %arg8[%c0_77, %c1_78, %c0_79], %80 {strides = array<i32>} : memref<8x10x128xf32, #tpu.memory_space<vmem>>, vector<8x8x128xf32>,
    %c0_80 = arith.constant 0 : index
    %c1_81 = arith.constant 1 : index
    %c0_82 = arith.constant 0 : index
    %82 = vector.load %arg7[%c0_80, %c1_81, %c0_82] : memref<8x10x128xf32, #tpu.memory_space<vmem>>, vector<8x8x128xf32>
    %cst_83 = arith.constant 0.000000e+00 : f32
    %83 = vector.broadcast %cst_83 : f32 to vector<64x128xf32>
    %c0_84 = arith.constant 0 : index
    %c0_85 = arith.constant 0 : index
    %c0_86 = arith.constant 0 : index
    %84 = vector.load %arg8[%c0_84, %c0_85, %c0_86] : memref<8x10x128xf32, #tpu.memory_space<vmem>>, vector<8x8x128xf32>
    %cst_87 = arith.constant 0.000000e+00 : f32
    %85 = vector.broadcast %cst_87 : f32 to vector<8x8x128xf32>
    %86 = arith.maximumf %84, %85 : vector<8x8x128xf32>
    %87 = vector.shape_cast %86 : vector<8x8x128xf32> to vector<64x128xf32>
    %c1_88 = arith.constant 1 : index
    %c0_89 = arith.constant 0 : index
    %c0_90 = arith.constant 0 : index
    %c0_91 = arith.constant 0 : index
    %88 = vector.load %arg4[%c1_88, %c0_89, %c0_90, %c0_91] : memref<4x3x128x128xf32, #tpu.memory_space<vmem>>, vector<1x1x128x128xf32>
    %89 = vector.shape_cast %88 : vector<1x1x128x128xf32> to vector<128x128xf32>
    %cst_92 = arith.constant dense<0.000000e+00> : vector<64x128xf32>
    %90 = tpu.matmul %87, %89, %cst_92 {dimension_numbers = #tpu.dot_dimension_numbers<[1], [0], [0], [1], [0, 0, 1, 1], [], []>} : vector<64x128xf32>, vector<128x128xf32>, vector<64x128xf32> -> vector<64x128xf32>
    %91 = arith.addf %83, %90 : vector<64x128xf32>
    %c0_93 = arith.constant 0 : index
    %c1_94 = arith.constant 1 : index
    %c0_95 = arith.constant 0 : index
    %92 = vector.load %arg8[%c0_93, %c1_94, %c0_95] : memref<8x10x128xf32, #tpu.memory_space<vmem>>, vector<8x8x128xf32>
    %cst_96 = arith.constant 0.000000e+00 : f32
    %93 = vector.broadcast %cst_96 : f32 to vector<8x8x128xf32>
    %94 = arith.maximumf %92, %93 : vector<8x8x128xf32>
    %95 = vector.shape_cast %94 : vector<8x8x128xf32> to vector<64x128xf32>
    %c1_97 = arith.constant 1 : index
    %c1_98 = arith.constant 1 : index
    %c0_99 = arith.constant 0 : index
    %c0_100 = arith.constant 0 : index
    %96 = vector.load %arg4[%c1_97, %c1_98, %c0_99, %c0_100] : memref<4x3x128x128xf32, #tpu.memory_space<vmem>>, vector<1x1x128x128xf32>
    %97 = vector.shape_cast %96 : vector<1x1x128x128xf32> to vector<128x128xf32>
    %cst_101 = arith.constant dense<0.000000e+00> : vector<64x128xf32>
    %98 = tpu.matmul %95, %97, %cst_101 {dimension_numbers = #tpu.dot_dimension_numbers<[1], [0], [0], [1], [0, 0, 1, 1], [], []>} : vector<64x128xf32>, vector<128x128xf32>, vector<64x128xf32> -> vector<64x128xf32>
    %99 = arith.addf %91, %98 : vector<64x128xf32>
    %c0_102 = arith.constant 0 : index
    %c2_103 = arith.constant 2 : index
    %c0_104 = arith.constant 0 : index
    %100 = vector.load %arg8[%c0_102, %c2_103, %c0_104] : memref<8x10x128xf32, #tpu.memory_space<vmem>>, vector<8x8x128xf32>
    %cst_105 = arith.constant 0.000000e+00 : f32
    %101 = vector.broadcast %cst_105 : f32 to vector<8x8x128xf32>
    %102 = arith.maximumf %100, %101 : vector<8x8x128xf32>
    %103 = vector.shape_cast %102 : vector<8x8x128xf32> to vector<64x128xf32>
    %c1_106 = arith.constant 1 : index
    %c2_107 = arith.constant 2 : index
    %c0_108 = arith.constant 0 : index
    %c0_109 = arith.constant 0 : index
    %104 = vector.load %arg4[%c1_106, %c2_107, %c0_108, %c0_109] : memref<4x3x128x128xf32, #tpu.memory_space<vmem>>, vector<1x1x128x128xf32>
    %105 = vector.shape_cast %104 : vector<1x1x128x128xf32> to vector<128x128xf32>
    %cst_110 = arith.constant dense<0.000000e+00> : vector<64x128xf32>
    %106 = tpu.matmul %103, %105, %cst_110 {dimension_numbers = #tpu.dot_dimension_numbers<[1], [0], [0], [1], [0, 0, 1, 1], [], []>} : vector<64x128xf32>, vector<128x128xf32>, vector<64x128xf32> -> vector<64x128xf32>
    %107 = arith.addf %99, %106 : vector<64x128xf32>
    %c1_111 = arith.constant 1 : index
    %c0_112 = arith.constant 0 : index
    %c0_113 = arith.constant 0 : index
    %108 = vector.load %arg5[%c1_111, %c0_112, %c0_113] : memref<4x1x128xf32, #tpu.memory_space<vmem>>, vector<1x1x128xf32>
    %109 = vector.shape_cast %108 : vector<1x1x128xf32> to vector<1x128xf32>
    %110 = vector.broadcast %109 : vector<1x128xf32> to vector<64x128xf32>
    %111 = arith.addf %107, %110 : vector<64x128xf32>
    %112 = vector.shape_cast %111 : vector<64x128xf32> to vector<8x8x128xf32>
    %113 = arith.addf %82, %112 : vector<8x8x128xf32>
    %c0_114 = arith.constant 0 : index
    %c1_115 = arith.constant 1 : index
    %c0_116 = arith.constant 0 : index
    %114 = vector.load %arg7[%c0_114, %c1_115, %c0_116] : memref<8x10x128xf32, #tpu.memory_space<vmem>>, vector<8x8x128xf32>
    tpu.vector_store %arg7[%c0_114, %c1_115, %c0_116], %113 {strides = array<i32>} : memref<8x10x128xf32, #tpu.memory_space<vmem>>, vector<8x8x128xf32>,
    %cst_117 = arith.constant 0.000000e+00 : f32
    %115 = vector.broadcast %cst_117 : f32 to vector<64x128xf32>
    %c0_118 = arith.constant 0 : index
    %c0_119 = arith.constant 0 : index
    %c0_120 = arith.constant 0 : index
    %116 = vector.load %arg7[%c0_118, %c0_119, %c0_120] : memref<8x10x128xf32, #tpu.memory_space<vmem>>, vector<8x8x128xf32>
    %cst_121 = arith.constant 0.000000e+00 : f32
    %117 = vector.broadcast %cst_121 : f32 to vector<8x8x128xf32>
    %118 = arith.maximumf %116, %117 : vector<8x8x128xf32>
    %119 = vector.shape_cast %118 : vector<8x8x128xf32> to vector<64x128xf32>
    %c2_122 = arith.constant 2 : index
    %c0_123 = arith.constant 0 : index
    %c0_124 = arith.constant 0 : index
    %c0_125 = arith.constant 0 : index
    %120 = vector.load %arg4[%c2_122, %c0_123, %c0_124, %c0_125] : memref<4x3x128x128xf32, #tpu.memory_space<vmem>>, vector<1x1x128x128xf32>
    %121 = vector.shape_cast %120 : vector<1x1x128x128xf32> to vector<128x128xf32>
    %cst_126 = arith.constant dense<0.000000e+00> : vector<64x128xf32>
    %122 = tpu.matmul %119, %121, %cst_126 {dimension_numbers = #tpu.dot_dimension_numbers<[1], [0], [0], [1], [0, 0, 1, 1], [], []>} : vector<64x128xf32>, vector<128x128xf32>, vector<64x128xf32> -> vector<64x128xf32>
    %123 = arith.addf %115, %122 : vector<64x128xf32>
    %c0_127 = arith.constant 0 : index
    %c1_128 = arith.constant 1 : index
    %c0_129 = arith.constant 0 : index
    %124 = vector.load %arg7[%c0_127, %c1_128, %c0_129] : memref<8x10x128xf32, #tpu.memory_space<vmem>>, vector<8x8x128xf32>
    %cst_130 = arith.constant 0.000000e+00 : f32
    %125 = vector.broadcast %cst_130 : f32 to vector<8x8x128xf32>
    %126 = arith.maximumf %124, %125 : vector<8x8x128xf32>
    %127 = vector.shape_cast %126 : vector<8x8x128xf32> to vector<64x128xf32>
    %c2_131 = arith.constant 2 : index
    %c1_132 = arith.constant 1 : index
    %c0_133 = arith.constant 0 : index
    %c0_134 = arith.constant 0 : index
    %128 = vector.load %arg4[%c2_131, %c1_132, %c0_133, %c0_134] : memref<4x3x128x128xf32, #tpu.memory_space<vmem>>, vector<1x1x128x128xf32>
    %129 = vector.shape_cast %128 : vector<1x1x128x128xf32> to vector<128x128xf32>
    %cst_135 = arith.constant dense<0.000000e+00> : vector<64x128xf32>
    %130 = tpu.matmul %127, %129, %cst_135 {dimension_numbers = #tpu.dot_dimension_numbers<[1], [0], [0], [1], [0, 0, 1, 1], [], []>} : vector<64x128xf32>, vector<128x128xf32>, vector<64x128xf32> -> vector<64x128xf32>
    %131 = arith.addf %123, %130 : vector<64x128xf32>
    %c0_136 = arith.constant 0 : index
    %c2_137 = arith.constant 2 : index
    %c0_138 = arith.constant 0 : index
    %132 = vector.load %arg7[%c0_136, %c2_137, %c0_138] : memref<8x10x128xf32, #tpu.memory_space<vmem>>, vector<8x8x128xf32>
    %cst_139 = arith.constant 0.000000e+00 : f32
    %133 = vector.broadcast %cst_139 : f32 to vector<8x8x128xf32>
    %134 = arith.maximumf %132, %133 : vector<8x8x128xf32>
    %135 = vector.shape_cast %134 : vector<8x8x128xf32> to vector<64x128xf32>
    %c2_140 = arith.constant 2 : index
    %c2_141 = arith.constant 2 : index
    %c0_142 = arith.constant 0 : index
    %c0_143 = arith.constant 0 : index
    %136 = vector.load %arg4[%c2_140, %c2_141, %c0_142, %c0_143] : memref<4x3x128x128xf32, #tpu.memory_space<vmem>>, vector<1x1x128x128xf32>
    %137 = vector.shape_cast %136 : vector<1x1x128x128xf32> to vector<128x128xf32>
    %cst_144 = arith.constant dense<0.000000e+00> : vector<64x128xf32>
    %138 = tpu.matmul %135, %137, %cst_144 {dimension_numbers = #tpu.dot_dimension_numbers<[1], [0], [0], [1], [0, 0, 1, 1], [], []>} : vector<64x128xf32>, vector<128x128xf32>, vector<64x128xf32> -> vector<64x128xf32>
    %139 = arith.addf %131, %138 : vector<64x128xf32>
    %c2_145 = arith.constant 2 : index
    %c0_146 = arith.constant 0 : index
    %c0_147 = arith.constant 0 : index
    %140 = vector.load %arg5[%c2_145, %c0_146, %c0_147] : memref<4x1x128xf32, #tpu.memory_space<vmem>>, vector<1x1x128xf32>
    %141 = vector.shape_cast %140 : vector<1x1x128xf32> to vector<1x128xf32>
    %142 = vector.broadcast %141 : vector<1x128xf32> to vector<64x128xf32>
    %143 = arith.addf %139, %142 : vector<64x128xf32>
    %144 = vector.shape_cast %143 : vector<64x128xf32> to vector<8x8x128xf32>
    %c0_148 = arith.constant 0 : index
    %c1_149 = arith.constant 1 : index
    %c0_150 = arith.constant 0 : index
    %145 = vector.load %arg8[%c0_148, %c1_149, %c0_150] : memref<8x10x128xf32, #tpu.memory_space<vmem>>, vector<8x8x128xf32>
    tpu.vector_store %arg8[%c0_148, %c1_149, %c0_150], %144 {strides = array<i32>} : memref<8x10x128xf32, #tpu.memory_space<vmem>>, vector<8x8x128xf32>,
    %c0_151 = arith.constant 0 : index
    %c1_152 = arith.constant 1 : index
    %c0_153 = arith.constant 0 : index
    %146 = vector.load %arg7[%c0_151, %c1_152, %c0_153] : memref<8x10x128xf32, #tpu.memory_space<vmem>>, vector<8x8x128xf32>
    %cst_154 = arith.constant 0.000000e+00 : f32
    %147 = vector.broadcast %cst_154 : f32 to vector<64x128xf32>
    %c0_155 = arith.constant 0 : index
    %c0_156 = arith.constant 0 : index
    %c0_157 = arith.constant 0 : index
    %148 = vector.load %arg8[%c0_155, %c0_156, %c0_157] : memref<8x10x128xf32, #tpu.memory_space<vmem>>, vector<8x8x128xf32>
    %cst_158 = arith.constant 0.000000e+00 : f32
    %149 = vector.broadcast %cst_158 : f32 to vector<8x8x128xf32>
    %150 = arith.maximumf %148, %149 : vector<8x8x128xf32>
    %151 = vector.shape_cast %150 : vector<8x8x128xf32> to vector<64x128xf32>
    %c3 = arith.constant 3 : index
    %c0_159 = arith.constant 0 : index
    %c0_160 = arith.constant 0 : index
    %c0_161 = arith.constant 0 : index
    %152 = vector.load %arg4[%c3, %c0_159, %c0_160, %c0_161] : memref<4x3x128x128xf32, #tpu.memory_space<vmem>>, vector<1x1x128x128xf32>
    %153 = vector.shape_cast %152 : vector<1x1x128x128xf32> to vector<128x128xf32>
    %cst_162 = arith.constant dense<0.000000e+00> : vector<64x128xf32>
    %154 = tpu.matmul %151, %153, %cst_162 {dimension_numbers = #tpu.dot_dimension_numbers<[1], [0], [0], [1], [0, 0, 1, 1], [], []>} : vector<64x128xf32>, vector<128x128xf32>, vector<64x128xf32> -> vector<64x128xf32>
    %155 = arith.addf %147, %154 : vector<64x128xf32>
    %c0_163 = arith.constant 0 : index
    %c1_164 = arith.constant 1 : index
    %c0_165 = arith.constant 0 : index
    %156 = vector.load %arg8[%c0_163, %c1_164, %c0_165] : memref<8x10x128xf32, #tpu.memory_space<vmem>>, vector<8x8x128xf32>
    %cst_166 = arith.constant 0.000000e+00 : f32
    %157 = vector.broadcast %cst_166 : f32 to vector<8x8x128xf32>
    %158 = arith.maximumf %156, %157 : vector<8x8x128xf32>
    %159 = vector.shape_cast %158 : vector<8x8x128xf32> to vector<64x128xf32>
    %c3_167 = arith.constant 3 : index
    %c1_168 = arith.constant 1 : index
    %c0_169 = arith.constant 0 : index
    %c0_170 = arith.constant 0 : index
    %160 = vector.load %arg4[%c3_167, %c1_168, %c0_169, %c0_170] : memref<4x3x128x128xf32, #tpu.memory_space<vmem>>, vector<1x1x128x128xf32>
    %161 = vector.shape_cast %160 : vector<1x1x128x128xf32> to vector<128x128xf32>
    %cst_171 = arith.constant dense<0.000000e+00> : vector<64x128xf32>
    %162 = tpu.matmul %159, %161, %cst_171 {dimension_numbers = #tpu.dot_dimension_numbers<[1], [0], [0], [1], [0, 0, 1, 1], [], []>} : vector<64x128xf32>, vector<128x128xf32>, vector<64x128xf32> -> vector<64x128xf32>
    %163 = arith.addf %155, %162 : vector<64x128xf32>
    %c0_172 = arith.constant 0 : index
    %c2_173 = arith.constant 2 : index
    %c0_174 = arith.constant 0 : index
    %164 = vector.load %arg8[%c0_172, %c2_173, %c0_174] : memref<8x10x128xf32, #tpu.memory_space<vmem>>, vector<8x8x128xf32>
    %cst_175 = arith.constant 0.000000e+00 : f32
    %165 = vector.broadcast %cst_175 : f32 to vector<8x8x128xf32>
    %166 = arith.maximumf %164, %165 : vector<8x8x128xf32>
    %167 = vector.shape_cast %166 : vector<8x8x128xf32> to vector<64x128xf32>
    %c3_176 = arith.constant 3 : index
    %c2_177 = arith.constant 2 : index
    %c0_178 = arith.constant 0 : index
    %c0_179 = arith.constant 0 : index
    %168 = vector.load %arg4[%c3_176, %c2_177, %c0_178, %c0_179] : memref<4x3x128x128xf32, #tpu.memory_space<vmem>>, vector<1x1x128x128xf32>
    %169 = vector.shape_cast %168 : vector<1x1x128x128xf32> to vector<128x128xf32>
    %cst_180 = arith.constant dense<0.000000e+00> : vector<64x128xf32>
    %170 = tpu.matmul %167, %169, %cst_180 {dimension_numbers = #tpu.dot_dimension_numbers<[1], [0], [0], [1], [0, 0, 1, 1], [], []>} : vector<64x128xf32>, vector<128x128xf32>, vector<64x128xf32> -> vector<64x128xf32>
    %171 = arith.addf %163, %170 : vector<64x128xf32>
    %c3_181 = arith.constant 3 : index
    %c0_182 = arith.constant 0 : index
    %c0_183 = arith.constant 0 : index
    %172 = vector.load %arg5[%c3_181, %c0_182, %c0_183] : memref<4x1x128xf32, #tpu.memory_space<vmem>>, vector<1x1x128xf32>
    %173 = vector.shape_cast %172 : vector<1x1x128xf32> to vector<1x128xf32>
    %174 = vector.broadcast %173 : vector<1x128xf32> to vector<64x128xf32>
    %175 = arith.addf %171, %174 : vector<64x128xf32>
    %176 = vector.shape_cast %175 : vector<64x128xf32> to vector<8x8x128xf32>
    %177 = arith.addf %146, %176 : vector<8x8x128xf32>
    %c0_184 = arith.constant 0 : index
    %c1_185 = arith.constant 1 : index
    %c0_186 = arith.constant 0 : index
    %178 = vector.load %arg7[%c0_184, %c1_185, %c0_186] : memref<8x10x128xf32, #tpu.memory_space<vmem>>, vector<8x8x128xf32>
    tpu.vector_store %arg7[%c0_184, %c1_185, %c0_186], %177 {strides = array<i32>} : memref<8x10x128xf32, #tpu.memory_space<vmem>>, vector<8x8x128xf32>,
    %c0_187 = arith.constant 0 : index
    %c1_188 = arith.constant 1 : index
    %c0_189 = arith.constant 0 : index
    %179 = vector.load %arg7[%c0_187, %c1_188, %c0_189] : memref<8x10x128xf32, #tpu.memory_space<vmem>>, vector<8x8x128xf32>
    %c0_190 = arith.constant 0 : index
    %c0_191 = arith.constant 0 : index
    %c0_192 = arith.constant 0 : index
    %180 = vector.load %arg6[%c0_190, %c0_191, %c0_192] : memref<8x8x128xf32, #tpu.memory_space<vmem>>, vector<8x8x128xf32>
    tpu.vector_store %arg6[%c0_190, %c0_191, %c0_192], %179 {strides = array<i32>} : memref<8x8x128xf32, #tpu.memory_space<vmem>>, vector<8x8x128xf32>,
    return
  }
  func.func @transform_0(%arg0: i32) -> (i32, i32, i32) {
    %c0_i32 = arith.constant 0 : i32
    %c0_i32_0 = arith.constant 0 : i32
    %c0_i32_1 = arith.constant 0 : i32
    return %arg0, %c0_i32, %c0_i32_0 : i32, i32, i32
  }
  func.func @transform_1(%arg0: i32) -> (i32, i32, i32) {
    %c0_i32 = arith.constant 0 : i32
    %c0_i32_0 = arith.constant 0 : i32
    %c0_i32_1 = arith.constant 0 : i32
    %c0_i32_2 = arith.constant 0 : i32
    return %c0_i32, %c0_i32_0, %c0_i32_1 : i32, i32, i32
  }
  func.func @transform_2(%arg0: i32) -> (i32, i32) {
    %c0_i32 = arith.constant 0 : i32
    %c0_i32_0 = arith.constant 0 : i32
    %c0_i32_1 = arith.constant 0 : i32
    return %c0_i32, %c0_i32_0 : i32, i32
  }
  func.func @transform_3(%arg0: i32) -> (i32, i32, i32, i32) {
    %c0_i32 = arith.constant 0 : i32
    %c0_i32_0 = arith.constant 0 : i32
    %c0_i32_1 = arith.constant 0 : i32
    %c0_i32_2 = arith.constant 0 : i32
    %c0_i32_3 = arith.constant 0 : i32
    return %c0_i32, %c0_i32_0, %c0_i32_1, %c0_i32_2 : i32, i32, i32, i32
  }
  func.func @transform_4(%arg0: i32) -> (i32, i32, i32) {
    %c0_i32 = arith.constant 0 : i32
    %c0_i32_0 = arith.constant 0 : i32
    %c0_i32_1 = arith.constant 0 : i32
    %c0_i32_2 = arith.constant 0 : i32
    return %c0_i32, %c0_i32_0, %c0_i32_1 : i32, i32, i32
  }
  func.func @transform_5(%arg0: i32) -> (i32, i32, i32) {
    %c0_i32 = arith.constant 0 : i32
    %c0_i32_0 = arith.constant 0 : i32
    %c0_i32_1 = arith.constant 0 : i32
    return %arg0, %c0_i32, %c0_i32_0 : i32, i32, i32
  }
}

</mosaic_0001>

<bundles_post_ra>
// kernel: tpu_custom_call.1
= control target key start
LH: loop header
LB: loop body
LE: loop exit
PB: predicated region body
PF: predicated region fallthrough
CT: control target
= control target key end

     0   :  { %10 = vsyncpa [#allocation6], 0  ;;  %s8422_s0 = inlined_call_operand.vmem [shape: f32[16,18,48], index: 0, kind: input, shape index: {}]   ;;  %s8423_s1 = inlined_call_operand.vmem [shape: f32[3,48,384], index: 1, kind: input, shape index: {}]   ;;  %s8424_s2 = inlined_call_operand.vmem [shape: f32[1,384], index: 2, kind: input, shape index: {}]   ;;  %s8425_s3 = inlined_call_operand.hbm [shape: f32[4,3,128,128], index: 3, kind: input, shape index: {}]   ;;  %s8426_s4 = inlined_call_operand.vmem [shape: f32[4,1,128], index: 4, kind: input, shape index: {}]   ;;  %s8427_s5 = inlined_call_operand.hbm [shape: f32[16,8,128], index: 5, kind: output, shape index: {}]  }
   0x1   :  { %11 = vsyncpa [#allocation7], 0 }
   0x2   :  { %13 = vsyncpa [#allocation7 + $0x1], 0  ;;  %s6560_s18 = smov 0   ;;  %s6562_s19 = smov 0  }
   0x3   :  { %s6564_s20 = smov 0   ;;  %s6566_s21 = smov 0  }
   0x4 LB: > { %s6581_s22 = sadd.s32 4294967295, %s6519_s21   ;;  %s5140_s23 = sadd.s32 4294967294, %s6519_s21   ;;  %s6519_s21 = sphi %s6566_s21, %s8511_s21   ;;  %s6515_s20 = sphi %s6564_s20, %s8510_s20   ;;  %s6511_s19 = sphi %s6562_s19, %s8509_s19   ;;  %s6507_s18 = sphi %s6560_s18, %s8508_s18  }
   0x5   : > { %s6585_s24 = sadd.s32 1, %s6519_s21   ;;  %s136_s25 = sadd.s32 1, %s6515_s20 }
   0x6   : > { %s133_s26 = ssub.s32 %s6519_s21, %s6585_s24  ;;  %p146_p0 = scmp.ne.s32.totalorder %s6515_s20, %s6511_s19 }
   0x7   : > { %p134_p1 = scmp.eq.s32.totalorder %s133_s26, 0  ;;  %p147_p2 = scmp.eq.s32.totalorder %s6581_s22, 1 }
   0x8   : > { %p152_p3 = scmp.ne.s32.totalorder %s6511_s19, %s6507_s18  ;;  %p153_p4 = scmp.eq.s32.totalorder %s5140_s23, 1 }
   0x9   : > { %s6596_s27 = scalar_select %p134_p1, %s6515_s20, %s136_s25  }
   0xa   : > { %p6598_p5 = por %p147_p2, %p146_p0  ;;  %p6602_p6 = por %p153_p4, %p152_p3 }
   0xb   : > { %p5141_p7 = scmp.ge.s32.totalorder %s6519_s21, 1  ;;  %p160_p8 = scmp.lt.s32.totalorder %s6519_s21, 3 }
   0xc   : > { %s8436_s29 = scalar_select %p6602_p6, 1, 0 }
   0xd   : > { %p6375_p9 = scmp.eq.s32.totalorder %s6581_s22, 0  ;;  %p6609_p10 = pnand %p5141_p7, %p160_p8 }
   0xe   : > { %s6521_s6 = smov [#allocation5]  }
   0xf   : > { %s178_s7 = sshll.u32 %s6521_s6, 4  ;;  %p6367_p11 = pneg %p6609_p10  ;;  %s179_s7 = int_to_ptr.vmem [resolvable:$true] %s178_s7 }
  0x10   : > { %s6440_s8 = scalar_lea.vmem %s179_s7, 24576  ;;  %p6448_p3 = scmp.lt.s32.totalorder %s179_s7, %s179_s7 }
  0x11   : > { %p6368_p12 = pnand %p6375_p9, %p6367_p11  ;;  %p6441_p0 = scmp.ne.s32.totalorder %s179_s7, %s6440_s8 }
  0x12   : > { %p6449_p4 = scmp.lt.s32.totalorder %s6440_s8, %s6440_s8 }
  0x13   : > { %p6431_p13 = pneg %p6368_p12 }
  0x14   : > { %p6450_p6 = por %p6449_p4, %p6448_p3 }
  0x15   : > { %p6443_p1 = pnand %p6441_p0, %p6431_p13 }
  0x17   : > { %p6444_p2 = pneg %p6443_p1 }
  0x19   : > { %p6451_p7 = pnand %p6450_p6, %p6444_p2 }
  0x1b   : > { %6454 = shalt.err (!%p6451_p7)
}
  0x1c   : > { %s6522_s9 = smov 128   ;;  %s6523_s10 = smov 8  }
  0x1d   : > { %6370 = dma.hbm_to_vmem [thread:$0]  (!%p6368_p12), %s8425_s3, 24576, %s179_s7, [#allocation6], %s6522_s9, %s6522_s9, %s6523_s10  }
  0x1e   : > { %207 = sbr.rel (%p6609_p10) target bundleno = 1486 (0x5ce), region = 40 }
  0x23   : > { %6498 = dma.done.wait (%p6375_p9), [#allocation6], 24576  }
  0x24   : > { %6500 = vsyncadd (%p6375_p9), [#allocation6], 4294942720  ;;  %s5147_s13 = sshll.u32 %s6581_s22, 3  ;;  %v6524_v0 = vmov 0.0   ;;  %v5165_v1 = vld [vmem:[%s8423_s1 + $0x110] sm:$0xff]  ;;  %v5164_v2 = vld [vmem:[%s8423_s1 + $0x108] sm:$0xff] }
  0x25   : > { %426 = vmatprep.mubr.f32.mxu0 %v6524_v0  ;;  %2797 = vst [vmem:[#allocation2] sm:$0x1] %v6524_v0  ;;  %2798 = vst [vmem:[#allocation2 + $0x10] sm:$0x1] %v6524_v0  ;;  %498 = vmatprep.mubr.f32.mxu1 %v6524_v0  ;;  %p237_p6 = scmp.lt.s32.totalorder %s5147_s13, 15  ;;  %v5162_v3 = vld [vmem:[%s8423_s1 + $0xf8] sm:$0xff] }
  0x26   : > { %2799 = vst [vmem:[#allocation2 + $0x20] sm:$0x1] %v6524_v0  ;;  %2800 = vst [vmem:[#allocation2 + $0x30] sm:$0x1] %v6524_v0  ;;  %382 = vmatprep.subr.mxu0 %v5165_v1  ;;  %6348 = vmatprep.subr.mxu1 %v5165_v1  ;;  %v5161_v4 = vld [vmem:[%s8423_s1 + $0xf0] sm:$0xff]  ;;  %v5159_v5 = vld [vmem:[%s8423_s1 + $0xe0] sm:$0xff] }
  0x27   : > { %2801 = vst [vmem:[#allocation2 + $0x40] sm:$0x1] %v6524_v0  ;;  %2802 = vst [vmem:[#allocation2 + $0x50] sm:$0x1] %v6524_v0  ;;  %s8513_s13 = smov (!%p237_p6, %s5147_s13), 15  ;;  %383 = vmatpush1.msra.mxu0 %v5164_v2  ;;  %6354 = vmatpush1.msra.mxu1 %v5164_v2  ;;  %v5158_v6 = vld [vmem:[%s8423_s1 + $0xd8] sm:$0xff] }
  0x28   : > { %2803 = vst [vmem:[#allocation2 + $0x60] sm:$0x1] %v6524_v0  ;;  %2804 = vst [vmem:[#allocation2 + $0x70] sm:$0x1] %v6524_v0  ;;  %384 = vmatprep.subr.mxu0 %v5162_v3  ;;  %6349 = vmatprep.subr.mxu1 %v5162_v3  ;;  %s6360_s10 = smul.u32 24, %s8513_s13  ;;  %v5156_v7 = vld [vmem:[%s8423_s1 + $0xc8] sm:$0xff] }
  0x29   : > { %2805 = vst [vmem:[#allocation2 + $0x9] sm:$0x1] %v6524_v0  ;;  %2806 = vst [vmem:[#allocation2 + $0x19] sm:$0x1] %v6524_v0  ;;  %385 = vmatpush1.msra.mxu0 %v5161_v4  ;;  %6355 = vmatpush1.msra.mxu1 %v5161_v4  ;;  %v5155_v8 = vld [vmem:[%s8423_s1 + $0xc0] sm:$0xff]  ;;  %v5153_v9 = vld [vmem:[%s8423_s1 + $0xb0] sm:$0xff] }
  0x2a   : > { %2807 = vst [vmem:[#allocation2 + $0x29] sm:$0x1] %v6524_v0  ;;  %2808 = vst [vmem:[#allocation2 + $0x39] sm:$0x1] %v6524_v0  ;;  %386 = vmatprep.subr.mxu0 %v5159_v5  ;;  %6350 = vmatprep.subr.mxu1 %v5159_v5  ;;  %v5152_v10 = vld [vmem:[%s8423_s1 + $0xa8] sm:$0xff]  ;;  %s6698_s30 = scalar_lea.vmem %s8422_s0, %s6360_s10  ;;  %v5150_v11 = vld [vmem:[%s8423_s1 + $0x98] sm:$0xff] }
  0x2b   : > { %2809 = vst [vmem:[#allocation2 + $0x49] sm:$0x1] %v6524_v0  ;;  %2810 = vst [vmem:[#allocation2 + $0x59] sm:$0x1] %v6524_v0  ;;  %387 = vmatpush1.msra.mxu0 %v5158_v6  ;;  %6356 = vmatpush1.msra.mxu1 %v5158_v6  ;;  %v5149_v12 = vld [vmem:[%s8423_s1 + $0x90] sm:$0xff]  ;;  %v278_v13 = vld [vmem:[%s6698_s30 + $0x1] sm:$0xff] }
  0x2c   : > { %2811 = vst [vmem:[#allocation2 + $0x69] sm:$0x1] %v6524_v0  ;;  %2812 = vst [vmem:[#allocation2 + $0x79] sm:$0x1] %v6524_v0  ;;  %388 = vmatprep.subr.mxu0 %v5156_v7  ;;  %6351 = vmatprep.subr.mxu1 %v5156_v7  ;;  %vm313_vm0 = vcmask 392192   ;;  %v6708_v14 = vld [vmem:[%s6698_s30 + $0x91] sm:$0xff] }
  0x2d   : > { %2813 = vst [vmem:[#allocation3] sm:$0x1] %v6524_v0  ;;  %2814 = vst [vmem:[#allocation3 + $0x10] sm:$0x1] %v6524_v0  ;;  %389 = vmatpush1.msra.mxu0 %v5155_v8  ;;  %6357 = vmatpush1.msra.mxu1 %v5155_v8  ;;  %v5166_v15 = vld [vmem:[%s8423_s1 + $0x118] sm:$0xff]  ;;  %v5163_v16 = vld [vmem:[%s8423_s1 + $0x100] sm:$0xff] }
  0x2e   : > { %2815 = vst [vmem:[#allocation3 + $0x20] sm:$0x1] %v6524_v0  ;;  %2816 = vst [vmem:[#allocation3 + $0x30] sm:$0x1] %v6524_v0  ;;  %390 = vmatprep.subr.mxu0 %v5153_v9  ;;  %6352 = vmatprep.subr.mxu1 %v5153_v9  ;;  %v277_v17 = vld [vmem:[%s8423_s1 + $0x88] sm:$0xff]  ;;  %v6725_v19 = vld [vmem:[%s6698_s30 + $0x99] sm:$0xff] }
  0x2f   : > { %2817 = vst [vmem:[#allocation3 + $0x40] sm:$0x1] %v6524_v0  ;;  %2818 = vst [vmem:[#allocation3 + $0x50] sm:$0x1] %v6524_v0  ;;  %391 = vmatpush1.msra.mxu0 %v5152_v10  ;;  %6358 = vmatpush1.msra.mxu1 %v5152_v10  ;;  %v279_v18 = vld [vmem:[%s6698_s30 + $0x9] sm:$0xff]  ;;  %v280_v21 = vld [vmem:[%s6698_s30 + $0x19] sm:$0xff] }
  0x30   : > { %2819 = vst [vmem:[#allocation3 + $0x60] sm:$0x1] %v6524_v0  ;;  %2820 = vst [vmem:[#allocation3 + $0x70] sm:$0x1] %v6524_v0  ;;  %392 = vmatprep.subr.mxu0 %v5150_v11  ;;  %6353 = vmatprep.subr.mxu1 %v5150_v11  ;;  %v5160_v20 = vld [vmem:[%s8423_s1 + $0xe8] sm:$0xff]  ;;  %v5157_v23 = vld [vmem:[%s8423_s1 + $0xd0] sm:$0xff] }
  0x31   : > { %2821 = vst [vmem:[#allocation3 + $0x9] sm:$0x1] %v6524_v0  ;;  %2822 = vst [vmem:[#allocation3 + $0x19] sm:$0x1] %v6524_v0  ;;  %393 = vmatpush1.msra.mxu0 %v5149_v12  ;;  %6359 = vmatpush1.msra.mxu1 %v5149_v12  ;;  %v6737_v22 = vld [vmem:[%s6698_s30 + $0xa9] sm:$0xff]  ;;  %v5154_v24 = vld [vmem:[%s8423_s1 + $0xb8] sm:$0xff] }
  0x32   : > { %2823 = vst [vmem:[#allocation3 + $0x29] sm:$0x1] %v6524_v0  ;;  %2824 = vst [vmem:[#allocation3 + $0x39] sm:$0x1] %v6524_v0  ;;  %5167 = vmatmul.mubr.msk.f32.vlgmr.msra.gmra.mxu0 %vm313_vm0, %v278_v13  ;;  %5179 = vmatmul.mubr.msk.f32.vlgmr.msra.gmra.mxu1 %vm313_vm0, %v6708_v14  ;;  %v274_v25 = vld [vmem:[%s8423_s1 + $0x70] sm:$0xff]  ;;  %v281_v26 = vld [vmem:[%s6698_s30 + $0x21] sm:$0xff] }
  0x33   : > { %2825 = vst [vmem:[#allocation3 + $0x49] sm:$0x1] %v6524_v0  ;;  %2826 = vst [vmem:[#allocation3 + $0x59] sm:$0x1] %v6524_v0  ;;  %5712 = vmatprep.subr.mxu1 %v5166_v15  ;;  %432 = vmatprep.mubr.f32.mxu0 %v6524_v0  ;;  %v6755_v27 = vld [vmem:[%s6698_s30 + $0xb1] sm:$0xff]  ;;  %v5151_v28 = vld [vmem:[%s8423_s1 + $0xa0] sm:$0xff] }
  0x34   : > { %2827 = vst [vmem:[#allocation3 + $0x69] sm:$0x1] %v6524_v0  ;;  %2828 = vst [vmem:[#allocation3 + $0x79] sm:$0x1] %v6524_v0  ;;  %5713 = vmatpush3.msra.mxu1 %v5166_v15  ;;  %504 = vmatprep.mubr.f32.mxu1 %v6524_v0  ;;  %v282_v29 = vld [vmem:[%s6698_s30 + $0x31] sm:$0xff]  ;;  %v276_v30 = vld [vmem:[%s8423_s1 + $0x80] sm:$0xff] }
  0x35   : > { %5714 = vmatprep.subr.mxu1 %v5163_v16  ;;  %5748 = vmatprep.subr.mxu0 %v277_v17  ;;  %v275_v31 = vld [vmem:[%s8423_s1 + $0x78] sm:$0xff]  ;;  %v273_v32 = vld [vmem:[%s8423_s1 + $0x68] sm:$0xff]  ;;  %v272_v35 = vld [vmem:[%s8423_s1 + $0x60] sm:$0xff]  ;;  %vm2159_vm2 = vcmask 1042434   ;;  %vm2161_vm3 = vcmask 1043459   ;;  %vm2163_vm4 = vcmask 1044484  }
  0x36   : > { %5168 = vmatmul.mubr.msk.f32.gmra.mxu0 %vm313_vm0, %v279_v18  ;;  %5180 = vmatmul.mubr.msk.f32.gmra.mxu1 %vm313_vm0, %v6725_v19  ;;  %v271_v33 = vld [vmem:[%s8423_s1 + $0x58] sm:$0xff]  ;;  %v270_v36 = vld [vmem:[%s8423_s1 + $0x50] sm:$0xff]  ;;  %v268_v37 = vld [vmem:[%s8423_s1 + $0x40] sm:$0xff]  ;;  %vm2165_vm5 = vcmask 1045509   ;;  %vm2167_vm6 = vcmask 1046534   ;;  %vm2169_vm7 = vcmask 1047559  }
  0x37   : > { %5715 = vmatpush3.msra.mxu1 %v5163_v16  ;;  %438 = vmatprep.mubr.f32.mxu0 %v6524_v0  ;;  %v283_v34 = vld [vmem:[%s6698_s30 + $0x39] sm:$0xff]  ;;  %v284_v38 = vld [vmem:[%s6698_s30 + $0x49] sm:$0xff]  ;;  %v285_v42 = vld [vmem:[%s6698_s30 + $0x51] sm:$0xff]  ;;  %vm3149_vm8 = vcmask 1041409   ;;  %s233_s11 = sand.u32 1, %s6511_s19   ;;  %s5357_s17 = sshll.u32 %s6581_s22, 10 }
  0x38   : > { %5716 = vmatprep.subr.mxu1 %v5160_v20  ;;  %510 = vmatprep.mubr.f32.mxu1 %v6524_v0  ;;  %v269_v39 = vld [vmem:[%s8423_s1 + $0x48] sm:$0xff]  ;;  %v267_v40 = vld [vmem:[%s8423_s1 + $0x38] sm:$0xff]  ;;  %v266_v44 = vld [vmem:[%s8423_s1 + $0x30] sm:$0xff]  ;;  %s5146_s15 = sshll.u32 %s233_s11, 6  ;;  %s8373_s25 = scalar_lea.hbm %s8427_s5, %s5357_s17 }
  0x39   : > { %5717 = vmatpush3.msra.mxu1 %v5160_v20  ;;  %5749 = vmatpush3.msra.mxu0 %v277_v17  ;;  %v265_v41 = vld [vmem:[%s8423_s1 + $0x28] sm:$0xff]  ;;  %v264_v45 = vld [vmem:[%s8423_s1 + $0x20] sm:$0xff]  ;;  %v262_v46 = vld [vmem:[%s8423_s1 + $0x10] sm:$0xff]  ;;  %s8355_s16 = scalar_lea.vmem [#allocation8], %s5146_s15  ;;  %s8382_s22 = scalar_lea.sflag [#allocation7], %s233_s11 }
  0x3a   : > { %5169 = vmatmul.mubr.msk.f32.gmra.mxu0 %vm313_vm0, %v280_v21  ;;  %5181 = vmatmul.mubr.msk.f32.gmra.mxu1 %vm313_vm0, %v6737_v22  ;;  %v286_v43 = vld [vmem:[%s6698_s30 + $0x61] sm:$0xff]  ;;  %v287_v47 = vld [vmem:[%s6698_s30 + $0x69] sm:$0xff]  ;;  %v288_v48 = vld [vmem:[%s6698_s30 + $0x79] sm:$0xff]  ;;  %s5066_s13 = sshll.u32 %s8355_s16, 4  ;;  %s6527_s6 = smov [#allocation8]   ;;  %s8375_s13 = int_to_ptr.vmem [resolvable:$true] %s5066_s13 }
  0x3b   : > { %5718 = vmatprep.subr.mxu1 %v5157_v23  ;;  %444 = vmatprep.mubr.f32.mxu0 %v6524_v0  ;;  %v263_v49 = vld [vmem:[%s8423_s1 + $0x18] sm:$0xff]  ;;  %v261_v50 = vld [vmem:[%s8423_s1 + $0x8] sm:$0xff]  ;;  %v5247_v51 = vld [vmem:[%s8423_s1 + $0x1a0] sm:$0xff]  ;;  %s6455_s26 = scalar_lea.vmem %s8375_s13, 1024  ;;  %s6459_s7 = sshll.u32 %s6527_s6, 4  ;;  %s6460_s7 = int_to_ptr.vmem [resolvable:$false] %s6459_s7 }
  0x3c   : > { %5719 = vmatpush3.msra.mxu1 %v5157_v23  ;;  %516 = vmatprep.mubr.f32.mxu1 %v6524_v0  ;;  %v289_v52 = vld [vmem:[%s6698_s30 + $0x81] sm:$0xff]  ;;  %v246_v57 = vld [vmem:[%s6698_s30 + $0x18] sm:$0xff]  ;;  %v5245_v59 = vld [vmem:[%s8423_s1 + $0x190] sm:$0xff]  ;;  %p6456_p8 = scmp.ne.s32.totalorder %s8375_s13, %s6455_s26  ;;  %s6461_s8 = scalar_lea.vmem %s6460_s7, 2048 }
  0x3d   : > { %5720 = vmatprep.subr.mxu1 %v5154_v24  ;;  %5750 = vmatprep.subr.mxu0 %v274_v25  ;;  %v260_v53 = vld [vmem:[%s8423_s1] sm:$0xff]  ;;  %v5248_v54 = vld [vmem:[%s8423_s1 + $0x1a8] sm:$0xff]  ;;  %v5246_v58 = vld [vmem:[%s8423_s1 + $0x198] sm:$0xff]  ;;  %p6462_p11 = scmp.lt.s32.totalorder %s8375_s13, %s6460_s7  ;;  %p6463_p12 = scmp.lt.s32.totalorder %s6461_s8, %s6455_s26 }
  0x3e   : > { %5170 = vmatmul.mubr.msk.f32.gmra.mxu0 %vm313_vm0, %v281_v26  ;;  %5182 = vmatmul.mubr.msk.f32.gmra.mxu1 %vm313_vm0, %v6755_v27  ;;  %v244_v55 = vld [vmem:[%s6698_s30] sm:$0xff]  ;;  %v245_v56 = vld [vmem:[%s6698_s30 + $0x8] sm:$0xff]  ;;  %v248_v62 = vld [vmem:[%s6698_s30 + $0x30] sm:$0xff]  ;;  %p6457_p9 = pnand %p6456_p8, %p6598_p5 }
  0x3f   : > { %5721 = vmatpush3.msra.mxu1 %v5154_v24  ;;  %450 = vmatprep.mubr.f32.mxu0 %v6524_v0  ;;  %v5244_v60 = vld [vmem:[%s8423_s1 + $0x188] sm:$0xff]  ;;  %v247_v61 = vld [vmem:[%s6698_s30 + $0x20] sm:$0xff]  ;;  %v5241_v1 = vld [vmem:[%s8423_s1 + $0x170] sm:$0xff]  ;;  %p6464_p13 = por %p6463_p12, %p6462_p11 }
  0x40   : > { %5722 = vmatprep.subr.mxu1 %v5151_v28  ;;  %5724 = vmatprep.mubr.msk.f32.mxu1 %vm313_vm0, %v278_v13  ;;  %v5243_v63 = vld [vmem:[%s8423_s1 + $0x180] sm:$0xff]  ;;  %v5242_v2 = vld [vmem:[%s8423_s1 + $0x178] sm:$0xff]  ;;  %v250_v4 = vld [vmem:[%s6698_s30 + $0x48] sm:$0xff]  ;;  %p6458_p10 = pneg %p6457_p9 }
  0x41   : > { %5723 = vmatpush3.msra.mxu1 %v5151_v28  ;;  %5751 = vmatpush3.msra.mxu0 %v274_v25  ;;  %v249_v3 = vld [vmem:[%s6698_s30 + $0x38] sm:$0xff]  ;;  %v5240_v5 = vld [vmem:[%s8423_s1 + $0x168] sm:$0xff]  ;;  %v5239_v7 = vld [vmem:[%s8423_s1 + $0x160] sm:$0xff] }
  0x42   : > { %5171 = vmatmul.mubr.msk.f32.gmra.mxu0 %vm313_vm0, %v282_v29  ;;  %5725 = vmatmul.mubr.msk.f32.vlgmr.msra.gmra.mxu1 %vm313_vm0, %v279_v18  ;;  %v5238_v6 = vld [vmem:[%s8423_s1 + $0x158] sm:$0xff]  ;;  %v251_v8 = vld [vmem:[%s6698_s30 + $0x50] sm:$0xff]  ;;  %v252_v9 = vld [vmem:[%s6698_s30 + $0x60] sm:$0xff]  ;;  %p6465_p0 = pnand %p6464_p13, %p6458_p10 }
  0x43   : > { %736 = vmatprep.subr.mxu1 %v276_v30  ;;  %456 = vmatprep.mubr.f32.mxu0 %v6524_v0  ;;  %v5237_v10 = vld [vmem:[%s8423_s1 + $0x150] sm:$0xff]  ;;  %v5235_v11 = vld [vmem:[%s8423_s1 + $0x140] sm:$0xff]  ;;  %v5236_v12 = vld [vmem:[%s8423_s1 + $0x148] sm:$0xff] }
  0x44   : > { %737 = vmatpush1.msra.mxu1 %v275_v31  ;;  %5727 = vmatprep.mubr.msk.f32.mxu1 %vm313_vm0, %v280_v21  ;;  %v253_v13 = vld [vmem:[%s6698_s30 + $0x68] sm:$0xff]  ;;  %v5234_v15 = vld [vmem:[%s8423_s1 + $0x138] sm:$0xff]  ;;  %v5233_v17 = vld [vmem:[%s8423_s1 + $0x130] sm:$0xff] }
  0x45   : > { %738 = vmatprep.subr.mxu1 %v273_v32  ;;  %5752 = vmatprep.subr.mxu0 %v271_v33  ;;  %v5232_v16 = vld [vmem:[%s8423_s1 + $0x128] sm:$0xff]  ;;  %v255_v18 = vld [vmem:[%s6698_s30 + $0x80] sm:$0xff]  ;;  %v257_v21 = vld [vmem:[%s6698_s30 + $0x98] sm:$0xff] }
  0x46   : > { %5172 = vmatmul.mubr.msk.f32.gmra.mxu0 %vm313_vm0, %v283_v34  ;;  %5728 = vmatmul.mubr.msk.f32.gmra.mxu1 %vm313_vm0, %v281_v26  ;;  %v5231_v20 = vld [vmem:[%s8423_s1 + $0x120] sm:$0xff]  ;;  %v259_v23 = vld [vmem:[%s6698_s30 + $0xb0] sm:$0xff] }
  0x47   : > { %462 = vmatprep.mubr.f32.mxu0 %v6524_v0  ;;  %5730 = vmatprep.mubr.msk.f32.mxu1 %vm313_vm0, %v282_v29  ;;  %v1022_v24 = vld [vmem:[%s6698_s30 + $0x2] sm:$0xff]  ;;  %v1023_v25 = vld [vmem:[%s6698_s30 + $0xa] sm:$0xff]  ;;  %v1024_v26 = vld [vmem:[%s6698_s30 + $0x1a] sm:$0xff] }
  0x48   : > { %739 = vmatpush1.msra.mxu1 %v272_v35  ;;  %5753 = vmatpush3.msra.mxu0 %v271_v33  ;;  %v1026_v28 = vld [vmem:[%s6698_s30 + $0x32] sm:$0xff]  ;;  %v1027_v29 = vld [vmem:[%s6698_s30 + $0x3a] sm:$0xff]  ;;  %v1028_v30 = vld [vmem:[%s6698_s30 + $0x4a] sm:$0xff] }
  0x49   : > { %740 = vmatprep.subr.mxu1 %v270_v36  ;;  %5754 = vmatprep.subr.mxu0 %v268_v37  ;;  %v1029_v31 = vld [vmem:[%s6698_s30 + $0x52] sm:$0xff]  ;;  %v1030_v32 = vld [vmem:[%s6698_s30 + $0x62] sm:$0xff]  ;;  %v1031_v33 = vld [vmem:[%s6698_s30 + $0x6a] sm:$0xff] }
  0x4a   : > { %5173 = vmatmul.mubr.msk.f32.gmra.mxu0 %vm313_vm0, %v284_v38  ;;  %5731 = vmatmul.mubr.msk.f32.gmra.mxu1 %vm313_vm0, %v283_v34  ;;  %v1032_v34 = vld [vmem:[%s6698_s30 + $0x7a] sm:$0xff]  ;;  %v1033_v35 = vld [vmem:[%s6698_s30 + $0x82] sm:$0xff]  ;;  %v1034_v36 = vld [vmem:[%s6698_s30 + $0x92] sm:$0xff] }
  0x4b   : > { %468 = vmatprep.mubr.f32.mxu0 %v6524_v0  ;;  %5733 = vmatprep.mubr.msk.f32.mxu1 %vm313_vm0, %v284_v38  ;;  %v1036_v38 = vld [vmem:[%s6698_s30 + $0xaa] sm:$0xff] }
  0x4c   : > { %741 = vmatpush1.msra.mxu1 %v269_v39  ;;  %5755 = vmatpush3.msra.mxu0 %v268_v37  ;;  %v1035_v37 = vld [vmem:[%s6698_s30 + $0x9a] sm:$0xff]  ;;  %v1037_v39 = vld [vmem:[%s6698_s30 + $0xb2] sm:$0xff] }
  0x4d   : > { %742 = vmatprep.subr.mxu1 %v267_v40  ;;  %5756 = vmatprep.subr.mxu0 %v265_v41 }
  0x4e   : > { %5174 = vmatmul.mubr.msk.f32.gmra.mxu0 %vm313_vm0, %v285_v42  ;;  %5734 = vmatmul.mubr.msk.f32.gmra.mxu1 %vm313_vm0, %v285_v42  ;;  %v6525_v42 = vmov -inf  }
  0x4f   : > { %474 = vmatprep.mubr.f32.mxu0 %v6524_v0  ;;  %5736 = vmatprep.mubr.msk.f32.mxu1 %vm313_vm0, %v286_v43  ;;  %1927 = vst [vmem:[#allocation4 + $0x30] sm:$0x1] %v6525_v42  ;;  %1928 = vst [vmem:[#allocation4] sm:$0x1] %v6525_v42 }
  0x50   : > { %743 = vmatpush1.msra.mxu1 %v266_v44  ;;  %5757 = vmatpush3.msra.mxu0 %v265_v41  ;;  %1929 = vst [vmem:[#allocation4 + $0x18] sm:$0x1] %v6525_v42  ;;  %1930 = vst [vmem:[#allocation4 + $0x10] sm:$0x1] %v6525_v42 }
  0x51   : > { %744 = vmatprep.subr.mxu1 %v264_v45  ;;  %5758 = vmatprep.subr.mxu0 %v262_v46  ;;  %1931 = vst [vmem:[#allocation4 + $0x8] sm:$0x1] %v6525_v42  ;;  %1932 = vst [vmem:[#allocation4 + $0x20] sm:$0x1] %v6525_v42 }
  0x52   : > { %5175 = vmatmul.mubr.msk.f32.gmra.mxu0 %vm313_vm0, %v286_v43  ;;  %5737 = vmatmul.mubr.msk.f32.gmra.mxu1 %vm313_vm0, %v287_v47  ;;  %1933 = vst [vmem:[#allocation4 + $0x28] sm:$0x1] %v6525_v42  ;;  %1934 = vst [vmem:[#allocation4 + $0x38] sm:$0x1] %v6525_v42 }
  0x53   : > { %480 = vmatprep.mubr.f32.mxu0 %v6524_v0  ;;  %5739 = vmatprep.mubr.msk.f32.mxu1 %vm313_vm0, %v288_v48 }
  0x54   : > { %745 = vmatpush1.msra.mxu1 %v263_v49  ;;  %5759 = vmatpush3.msra.mxu0 %v262_v46 }
  0x55   : > { %746 = vmatprep.subr.mxu1 %v261_v50  ;;  %1125 = vmatprep.subr.mxu0 %v5247_v51 }
  0x56   : > { %5176 = vmatmul.mubr.msk.f32.gmra.mxu0 %vm313_vm0, %v287_v47  ;;  %5740 = vmatmul.mubr.msk.f32.gmra.mxu1 %vm313_vm0, %v289_v52 }
  0x57   : > { %486 = vmatprep.mubr.f32.mxu0 %v6524_v0  ;;  %5742 = vmatprep.mubr.msk.f32.mxu1 %vm313_vm0, %v6708_v14  ;;  %v254_v14 = vld [vmem:[%s6698_s30 + $0x78] sm:$0xff] }
  0x58   : > { %747 = vmatpush1.msra.mxu1 %v260_v53 }
  0x59   : > { %5784 = vmatprep.subr.mxu1 %v5248_v54 }
  0x5a   : > { %5177 = vmatmul.mubr.msk.f32.gmra.mxu0 %vm313_vm0, %v288_v48  ;;  %5743 = vmatmul.mubr.msk.f32.gmra.mxu1 %vm313_vm0, %v6725_v19  ;;  %v256_v19 = vld [vmem:[%s6698_s30 + $0x90] sm:$0xff] }
  0x5b   : > { %492 = vmatprep.mubr.f32.mxu0 %v6524_v0  ;;  %5745 = vmatprep.mubr.msk.f32.mxu1 %vm313_vm0, %v6737_v22  ;;  %v258_v22 = vld [vmem:[%s6698_s30 + $0xa8] sm:$0xff] }
  0x5e   : > { %5178 = vmatmul.mubr.msk.f32.gmra.mxu0 %vm313_vm0, %v289_v52  ;;  %5746 = vmatmul.mubr.msk.f32.gmra.mxu1 %vm313_vm0, %v6755_v27  ;;  %v1025_v27 = vld [vmem:[%s6698_s30 + $0x22] sm:$0xff] }
  0x5f   : > { %780 = vmatprep.mubr.f32.mxu1 %v6524_v0  ;;  %5760 = vmatprep.mubr.msk.f32.mxu0 %vm313_vm0, %v244_v55 }
  0x62   : > { %5199 = vmatmul.mubr.msk.f32.vlgmr.msra.gmra.mxu1 %vm313_vm0, %v244_v55  ;;  %5761 = vmatmul.mubr.msk.f32.vlgmr.msra.gmra.mxu0 %vm313_vm0, %v245_v56 }
  0x63   : > { %5785 = vmatpush3.msra.mxu1 %v5248_v54  ;;  %786 = vmatprep.mubr.f32.mxu1 %v6524_v0 }
  0x64   : > { %5763 = vmatprep.mubr.msk.f32.mxu0 %vm313_vm0, %v246_v57  ;;  %1126 = vmatpush1.msra.mxu0 %v5246_v58 }
  0x65   : > { %5786 = vmatprep.subr.mxu1 %v5245_v59  ;;  %1127 = vmatprep.subr.mxu0 %v5244_v60 }
  0x66   : > { %5200 = vmatmul.mubr.msk.f32.gmra.mxu1 %vm313_vm0, %v245_v56  ;;  %5764 = vmatmul.mubr.msk.f32.gmra.mxu0 %vm313_vm0, %v247_v61 }
  0x67   : > { %792 = vmatprep.mubr.f32.mxu1 %v6524_v0  ;;  %5766 = vmatprep.mubr.msk.f32.mxu0 %vm313_vm0, %v248_v62 }
  0x68   : > { %5787 = vmatpush3.msra.mxu1 %v5245_v59  ;;  %1128 = vmatpush1.msra.mxu0 %v5243_v63 }
  0x69   : > { %1129 = vmatprep.subr.mxu0 %v5241_v1  ;;  %5788 = vmatprep.subr.mxu1 %v5242_v2 }
  0x6a   : > { %5201 = vmatmul.mubr.msk.f32.gmra.mxu1 %vm313_vm0, %v246_v57  ;;  %5767 = vmatmul.mubr.msk.f32.gmra.mxu0 %vm313_vm0, %v249_v3 }
  0x6b   : > { %798 = vmatprep.mubr.f32.mxu1 %v6524_v0  ;;  %5769 = vmatprep.mubr.msk.f32.mxu0 %vm313_vm0, %v250_v4 }
  0x6c   : > { %1130 = vmatpush1.msra.mxu0 %v5240_v5  ;;  %5789 = vmatpush3.msra.mxu1 %v5242_v2 }
  0x6d   : > { %1131 = vmatprep.subr.mxu0 %v5238_v6  ;;  %5790 = vmatprep.subr.mxu1 %v5239_v7 }
  0x6e   : > { %5202 = vmatmul.mubr.msk.f32.gmra.mxu1 %vm313_vm0, %v247_v61  ;;  %5770 = vmatmul.mubr.msk.f32.gmra.mxu0 %vm313_vm0, %v251_v8 }
  0x6f   : > { %804 = vmatprep.mubr.f32.mxu1 %v6524_v0  ;;  %5772 = vmatprep.mubr.msk.f32.mxu0 %vm313_vm0, %v252_v9 }
  0x70   : > { %1132 = vmatpush1.msra.mxu0 %v5237_v10  ;;  %5791 = vmatpush3.msra.mxu1 %v5239_v7 }
  0x71   : > { %1133 = vmatprep.subr.mxu0 %v5235_v11  ;;  %5792 = vmatprep.subr.mxu1 %v5236_v12 }
  0x72   : > { %5203 = vmatmul.mubr.msk.f32.gmra.mxu1 %vm313_vm0, %v248_v62  ;;  %5773 = vmatmul.mubr.msk.f32.gmra.mxu0 %vm313_vm0, %v253_v13 }
  0x73   : > { %810 = vmatprep.mubr.f32.mxu1 %v6524_v0  ;;  %5775 = vmatprep.mubr.msk.f32.mxu0 %vm313_vm0, %v254_v14 }
  0x74   : > { %1134 = vmatpush1.msra.mxu0 %v5234_v15  ;;  %5793 = vmatpush3.msra.mxu1 %v5236_v12 }
  0x75   : > { %1135 = vmatprep.subr.mxu0 %v5232_v16  ;;  %5794 = vmatprep.subr.mxu1 %v5233_v17 }
  0x76   : > { %5204 = vmatmul.mubr.msk.f32.gmra.mxu1 %vm313_vm0, %v249_v3  ;;  %5776 = vmatmul.mubr.msk.f32.gmra.mxu0 %vm313_vm0, %v255_v18 }
  0x77   : > { %816 = vmatprep.mubr.f32.mxu1 %v6524_v0  ;;  %5778 = vmatprep.mubr.msk.f32.mxu0 %vm313_vm0, %v256_v19 }
  0x78   : > { %1136 = vmatpush1.msra.mxu0 %v5231_v20  ;;  %5795 = vmatpush3.msra.mxu1 %v5233_v17 }
  0x7a   : > { %5205 = vmatmul.mubr.msk.f32.gmra.mxu1 %vm313_vm0, %v250_v4  ;;  %5779 = vmatmul.mubr.msk.f32.gmra.mxu0 %vm313_vm0, %v257_v21 }
  0x7b   : > { %822 = vmatprep.mubr.f32.mxu1 %v6524_v0  ;;  %5781 = vmatprep.mubr.msk.f32.mxu0 %vm313_vm0, %v258_v22 }
  0x7e   : > { %5206 = vmatmul.mubr.msk.f32.gmra.mxu1 %vm313_vm0, %v251_v8  ;;  %5782 = vmatmul.mubr.msk.f32.gmra.mxu0 %vm313_vm0, %v259_v23 }
  0x7f   : > { %828 = vmatprep.mubr.f32.mxu1 %v6524_v0  ;;  %1169 = vmatprep.mubr.f32.mxu0 %v6524_v0 }
  0x82   : > { %5207 = vmatmul.mubr.msk.f32.gmra.mxu1 %vm313_vm0, %v252_v9  ;;  %5249 = vmatmul.mubr.msk.f32.vlgmr.msra.gmra.mxu0 %vm313_vm0, %v1022_v24 }
  0x83   : > { %834 = vmatprep.mubr.f32.mxu1 %v6524_v0  ;;  %1175 = vmatprep.mubr.f32.mxu0 %v6524_v0 }
  0x86   : > { %5208 = vmatmul.mubr.msk.f32.gmra.mxu1 %vm313_vm0, %v253_v13  ;;  %5250 = vmatmul.mubr.msk.f32.gmra.mxu0 %vm313_vm0, %v1023_v25 }
  0x87   : > { %840 = vmatprep.mubr.f32.mxu1 %v6524_v0  ;;  %1181 = vmatprep.mubr.f32.mxu0 %v6524_v0 }
  0x8a   : > { %5209 = vmatmul.mubr.msk.f32.gmra.mxu1 %vm313_vm0, %v254_v14  ;;  %5251 = vmatmul.mubr.msk.f32.gmra.mxu0 %vm313_vm0, %v1024_v26 }
  0x8b   : > { %846 = vmatprep.mubr.f32.mxu1 %v6524_v0  ;;  %1187 = vmatprep.mubr.f32.mxu0 %v6524_v0 }
  0x8e   : > { %5210 = vmatmul.mubr.msk.f32.gmra.mxu1 %vm313_vm0, %v255_v18  ;;  %5252 = vmatmul.mubr.msk.f32.gmra.mxu0 %vm313_vm0, %v1025_v27 }
  0x8f   : > { %852 = vmatprep.mubr.f32.mxu1 %v6524_v0  ;;  %1193 = vmatprep.mubr.f32.mxu0 %v6524_v0 }
  0x92   : > { %5211 = vmatmul.mubr.msk.f32.gmra.mxu1 %vm313_vm0, %v256_v19  ;;  %5253 = vmatmul.mubr.msk.f32.gmra.mxu0 %vm313_vm0, %v1026_v28 }
  0x93   : > { %858 = vmatprep.mubr.f32.mxu1 %v6524_v0  ;;  %1199 = vmatprep.mubr.f32.mxu0 %v6524_v0 }
  0x96   : > { %5212 = vmatmul.mubr.msk.f32.gmra.mxu1 %vm313_vm0, %v257_v21  ;;  %5254 = vmatmul.mubr.msk.f32.gmra.mxu0 %vm313_vm0, %v1027_v29 }
  0x97   : > { %864 = vmatprep.mubr.f32.mxu1 %v6524_v0  ;;  %1205 = vmatprep.mubr.f32.mxu0 %v6524_v0 }
  0x9a   : > { %5213 = vmatmul.mubr.msk.f32.gmra.mxu1 %vm313_vm0, %v258_v22  ;;  %5255 = vmatmul.mubr.msk.f32.gmra.mxu0 %vm313_vm0, %v1028_v30 }
  0x9b   : > { %870 = vmatprep.mubr.f32.mxu1 %v6524_v0  ;;  %1211 = vmatprep.mubr.f32.mxu0 %v6524_v0 }
  0x9e   : > { %5214 = vmatmul.mubr.msk.f32.gmra.mxu1 %vm313_vm0, %v259_v23  ;;  %5256 = vmatmul.mubr.msk.f32.gmra.mxu0 %vm313_vm0, %v1029_v31 }
  0x9f   : > { %1217 = vmatprep.mubr.f32.mxu0 %v6524_v0  ;;  %5796 = vmatprep.mubr.msk.f32.mxu1 %vm313_vm0, %v1022_v24 }
  0xa2   : > { %5257 = vmatmul.mubr.msk.f32.gmra.mxu0 %vm313_vm0, %v1030_v32  ;;  %5797 = vmatmul.mubr.msk.f32.vlgmr.msra.gmra.mxu1 %vm313_vm0, %v1023_v25 }
  0xa3   : > { %1223 = vmatprep.mubr.f32.mxu0 %v6524_v0  ;;  %5799 = vmatprep.mubr.msk.f32.mxu1 %vm313_vm0, %v1024_v26 }
  0xa6   : > { %5258 = vmatmul.mubr.msk.f32.gmra.mxu0 %vm313_vm0, %v1031_v33  ;;  %5800 = vmatmul.mubr.msk.f32.gmra.mxu1 %vm313_vm0, %v1025_v27 }
  0xa7   : > { %1229 = vmatprep.mubr.f32.mxu0 %v6524_v0  ;;  %5802 = vmatprep.mubr.msk.f32.mxu1 %vm313_vm0, %v1026_v28 }
  0xaa   : > { %5259 = vmatmul.mubr.msk.f32.gmra.mxu0 %vm313_vm0, %v1032_v34  ;;  %5803 = vmatmul.mubr.msk.f32.gmra.mxu1 %vm313_vm0, %v1027_v29 }
  0xab   : > { %1235 = vmatprep.mubr.f32.mxu0 %v6524_v0  ;;  %5805 = vmatprep.mubr.msk.f32.mxu1 %vm313_vm0, %v1028_v30 }
  0xae   : > { %5260 = vmatmul.mubr.msk.f32.gmra.mxu0 %vm313_vm0, %v1033_v35  ;;  %5806 = vmatmul.mubr.msk.f32.gmra.mxu1 %vm313_vm0, %v1029_v31 }
  0xaf   : > { %1241 = vmatprep.mubr.f32.mxu0 %v6524_v0  ;;  %5808 = vmatprep.mubr.msk.f32.mxu1 %vm313_vm0, %v1030_v32 }
  0xb2   : > { %5261 = vmatmul.mubr.msk.f32.gmra.mxu0 %vm313_vm0, %v1034_v36  ;;  %5809 = vmatmul.mubr.msk.f32.gmra.mxu1 %vm313_vm0, %v1031_v33 }
  0xb3   : > { %1247 = vmatprep.mubr.f32.mxu0 %v6524_v0  ;;  %5811 = vmatprep.mubr.msk.f32.mxu1 %vm313_vm0, %v1032_v34 }
  0xb6   : > { %5262 = vmatmul.mubr.msk.f32.gmra.mxu0 %vm313_vm0, %v1035_v37  ;;  %5812 = vmatmul.mubr.msk.f32.gmra.mxu1 %vm313_vm0, %v1033_v35 }
  0xb7   : > { %1253 = vmatprep.mubr.f32.mxu0 %v6524_v0  ;;  %5814 = vmatprep.mubr.msk.f32.mxu1 %vm313_vm0, %v1034_v36 }
  0xba   : > { %5263 = vmatmul.mubr.msk.f32.gmra.mxu0 %vm313_vm0, %v1036_v38  ;;  %5815 = vmatmul.mubr.msk.f32.gmra.mxu1 %vm313_vm0, %v1035_v37 }
  0xbb   : > { %1259 = vmatprep.mubr.f32.mxu0 %v6524_v0  ;;  %5817 = vmatprep.mubr.msk.f32.mxu1 %vm313_vm0, %v1036_v38 }
  0xbe   : > { %5264 = vmatmul.mubr.msk.f32.gmra.mxu0 %vm313_vm0, %v1037_v39  ;;  %5818 = vmatmul.mubr.msk.f32.gmra.mxu1 %vm313_vm0, %v1037_v39 }
  0xf2   : > { %v7038_v40 = vpop.f32.mrf.mxu0  ;;  %v7040_v41 = vpop.f32.mrf.mxu1 }
  0xf3   : > { %8438 = vst [vmem:[#allocation11_spill] sm:$0xff] %v7040_v41 }
  0xf4   : > { %v7042_v0 = vpop.f32.mrf.mxu0  ;;  %v7044_v43 = vpop.f32.mrf.mxu1 }
  0xf5   : > { %8439 = vst [vmem:[#allocation12_spill] sm:$0xff] %v7044_v43 }
  0xf6   : > { %v7046_v44 = vpop.f32.mrf.mxu0  ;;  %v7048_v45 = vpop.f32.mrf.mxu1 }
  0xf7   : > { %8440 = vst [vmem:[#allocation13_spill] sm:$0xff] %v7048_v45 }
  0xf8   : > { %v7050_v46 = vpop.f32.mrf.mxu0  ;;  %v7052_v47 = vpop.f32.mrf.mxu1 }
  0xf9   : > { %8441 = vst [vmem:[#allocation14_spill] sm:$0xff] %v7052_v47 }
  0xfa   : > { %v440_v48 = vpop.f32.mrf.mxu0  ;;  %v7054_v49 = vpop.f32.mrf.mxu1 }
  0xfb   : > { %8442 = vst [vmem:[#allocation15_spill] sm:$0xff] %v7054_v49 }
  0xfc   : > { %v7056_v50 = vpop.f32.mrf.mxu0  ;;  %v7058_v51 = vpop.f32.mrf.mxu1 }
  0xfd   : > { %8443 = vst [vmem:[#allocation16_spill] sm:$0xff] %v7058_v51 }
  0xfe   : > { %v446_v52 = vpop.f32.mrf.mxu0  ;;  %v7060_v53 = vpop.f32.mrf.mxu1 }
  0xff   : > { %8444 = vst [vmem:[#allocation17_spill] sm:$0xff] %v7060_v53 }
 0x100   : > { %v7062_v54 = vpop.f32.mrf.mxu0  ;;  %v7064_v55 = vpop.f32.mrf.mxu1 }
 0x101   : > { %8445 = vst [vmem:[#allocation18_spill] sm:$0xff] %v7064_v55 }
 0x102   : > { %v452_v56 = vpop.f32.mrf.mxu0  ;;  %v7066_v57 = vpop.f32.mrf.mxu1 }
 0x104   : > { %v454_v58 = vpop.f32.mrf.mxu0  ;;  %v7068_v59 = vpop.f32.mrf.mxu1 }
 0x106   : > { %v458_v60 = vpop.f32.mrf.mxu0  ;;  %v7070_v61 = vpop.f32.mrf.mxu1 }
 0x108   : > { %v460_v62 = vpop.f32.mrf.mxu0  ;;  %v7072_v63 = vpop.f32.mrf.mxu1 }
 0x10a   : > { %v7074_v1 = vpop.f32.mrf.mxu0  ;;  %v5732_v2 = vpop.f32.mrf.mxu1 }
 0x10c   : > { %v7076_v3 = vpop.f32.mrf.mxu0  ;;  %v7078_v4 = vpop.f32.mrf.mxu1 }
 0x10e   : > { %v7080_v5 = vpop.f32.mrf.mxu0  ;;  %v5735_v6 = vpop.f32.mrf.mxu1 }
 0x110   : > { %v7082_v7 = vpop.f32.mrf.mxu0  ;;  %v619_v8 = vpop.f32.mrf.mxu1 }
 0x112   : > { %v7084_v9 = vpop.f32.mrf.mxu0  ;;  %v5738_v10 = vpop.f32.mrf.mxu1 }
 0x114   : > { %v7086_v11 = vpop.f32.mrf.mxu0  ;;  %v629_v12 = vpop.f32.mrf.mxu1 }
 0x116   : > { %v7088_v13 = vpop.f32.mrf.mxu0  ;;  %v5741_v14 = vpop.f32.mrf.mxu1 }
 0x118   : > { %v7090_v15 = vpop.f32.mrf.mxu0  ;;  %v639_v16 = vpop.f32.mrf.mxu1 }
 0x11a   : > { %v7092_v17 = vpop.f32.mrf.mxu0  ;;  %v5744_v18 = vpop.f32.mrf.mxu1 }
 0x11c   : > { %v7094_v19 = vpop.f32.mrf.mxu0  ;;  %v649_v20 = vpop.f32.mrf.mxu1 }
 0x11e   : > { %v7096_v21 = vpop.f32.mrf.mxu0  ;;  %v5747_v22 = vpop.f32.mrf.mxu1 }
 0x120   : > { %v7098_v23 = vpop.f32.mrf.mxu0  ;;  %v659_v24 = vpop.f32.mrf.mxu1 }
 0x122   : > { %v7100_v25 = vpop.f32.mrf.mxu1  ;;  %v7102_v26 = vpop.f32.mrf.mxu0 }
 0x124   : > { %v7104_v27 = vpop.f32.mrf.mxu1  ;;  %v7106_v28 = vpop.f32.mrf.mxu0 }
 0x126   : > { %v7108_v29 = vpop.f32.mrf.mxu1  ;;  %v7110_v30 = vpop.f32.mrf.mxu0 }
 0x128   : > { %v7112_v31 = vpop.f32.mrf.mxu1  ;;  %v7114_v32 = vpop.f32.mrf.mxu0 }
 0x12a   : > { %v794_v33 = vpop.f32.mrf.mxu1  ;;  %v5768_v34 = vpop.f32.mrf.mxu0 }
 0x12b   : > { %v7116_v35 = vadd.f32 %v794_v33, %v440_v48  ;;  %v7118_v36 = vadd.f32 %v5768_v34, %v5732_v2 }
 0x12c   : > { %v796_v37 = vpop.f32.mrf.mxu1  ;;  %v7120_v38 = vpop.f32.mrf.mxu0 }
 0x12d   : > { %8446 = vst [vmem:[#allocation19_spill] sm:$0xff] %v7118_v36 }
 0x12e   : > { %v800_v39 = vpop.f32.mrf.mxu1  ;;  %v5771_v42 = vpop.f32.mrf.mxu0 }
 0x12f   : > { %v7122_v55 = vadd.f32 %v800_v39, %v446_v52  ;;  %v7124_v53 = vadd.f32 %v5771_v42, %v5735_v6 }
 0x130   : > { %v7126_v51 = vpop.f32.mrf.mxu1  ;;  %v973_v49 = vpop.f32.mrf.mxu0 }
 0x131   : > { %v7128_v47 = vadd.f32 %v973_v49, %v619_v8 }
 0x132   : > { %v806_v45 = vpop.f32.mrf.mxu1  ;;  %v5774_v43 = vpop.f32.mrf.mxu0 }
 0x133   : > { %8447 = vst [vmem:[#allocation20_spill] sm:$0xff] %v7128_v47  ;;  %v7130_v48 = vadd.f32 %v806_v45, %v452_v56  ;;  %v7132_v2 = vadd.f32 %v5774_v43, %v5738_v10 }
 0x134   : > { %v808_v33 = vpop.f32.mrf.mxu1  ;;  %v983_v34 = vpop.f32.mrf.mxu0 }
 0x135   : > { %8448 = vst [vmem:[#allocation21_spill] sm:$0xff] %v7132_v2  ;;  %v7134_v36 = vadd.f32 %v808_v33, %v454_v58  ;;  %v7136_v41 = vadd.f32 %v983_v34, %v629_v12 }
 0x136   : > { %v812_v52 = vpop.f32.mrf.mxu1  ;;  %v5777_v6 = vpop.f32.mrf.mxu0 }
 0x137   : > { %8449 = vst [vmem:[#allocation22_spill] sm:$0xff] %v7136_v41  ;;  %v7138_v39 = vadd.f32 %v812_v52, %v458_v60  ;;  %v7140_v42 = vadd.f32 %v5777_v6, %v5741_v14  ;;  %v6526_v41 = vmov 1983009808  }
 0x138   : > { %v814_v49 = vpop.f32.mrf.mxu1  ;;  %v993_v8 = vpop.f32.mrf.mxu0  ;;  %v1593_v2 = vunpack.c.l.s4 %v6526_v41 }
 0x139   : > { %8450 = vst [vmem:[#allocation23_spill] sm:$0xff] %v7140_v42  ;;  %v7142_v47 = vadd.f32 %v814_v49, %v460_v62  ;;  %v7144_v45 = vadd.f32 %v993_v8, %v639_v16  ;;  %v8428_v8 = vlaneseq }
 0x13a   : > { %v818_v43 = vpop.f32.mrf.mxu1  ;;  %v5780_v56 = vpop.f32.mrf.mxu0 }
 0x13b   : > { %8451 = vst [vmem:[#allocation24_spill] sm:$0xff] %v7144_v45  ;;  %v7147_v10 = vadd.f32 %v818_v43, %v7074_v1  ;;  %v7149_v58 = vadd.f32 %v5780_v56, %v5744_v18 }
 0x13c   : > { %v820_v12 = vpop.f32.mrf.mxu1  ;;  %v1003_v33 = vpop.f32.mrf.mxu0 }
 0x13d   : > { %8452 = vst [vmem:[#allocation25_spill] sm:$0xff] %v7149_v58  ;;  %v7152_v60 = vadd.f32 %v820_v12, %v7076_v3  ;;  %v7154_v14 = vadd.f32 %v1003_v33, %v649_v20 }
 0x13e   : > { %v824_v34 = vpop.f32.mrf.mxu1  ;;  %v5783_v52 = vpop.f32.mrf.mxu0 }
 0x13f   : > { %8453 = vst [vmem:[#allocation26_spill] sm:$0xff] %v7154_v14  ;;  %v7157_v62 = vadd.f32 %v824_v34, %v7080_v5  ;;  %v7159_v16 = vadd.f32 %v5783_v52, %v5747_v22  ;;  %v7174_v5 = vshrl.u32 %v8428_v8, 7 }
 0x140   : > { %v826_v6 = vpop.f32.mrf.mxu1  ;;  %v1013_v49 = vpop.f32.mrf.mxu0 }
 0x141   : > { %8454 = vst [vmem:[#allocation27_spill] sm:$0xff] %v7159_v16  ;;  %v7162_v1 = vadd.f32 %v826_v6, %v7082_v7  ;;  %v7164_v18 = vadd.f32 %v1013_v49, %v659_v24  ;;  %v7190_v6 = vsub.s32 1, %v7174_v5 }
 0x142   : > { %v830_v43 = vpop.f32.mrf.mxu1  ;;  %v7166_v3 = vpop.f32.mrf.mxu0 }
 0x143   : > { %8455 = vst [vmem:[#allocation28_spill] sm:$0xff] %v7164_v18  ;;  %v7169_v20 = vadd.f32 %v830_v43, %v7084_v9  ;;  %v7187_v9 = vsub.s32 0, %v7174_v5 }
 0x144   : > { %v832_v56 = vpop.f32.mrf.mxu1  ;;  %v7171_v12 = vpop.f32.mrf.mxu0 }
 0x145   : > { %v7177_v22 = vadd.f32 %v832_v56, %v7086_v11  ;;  %8456 = vst [vmem:[#allocation29_spill] sm:$0xff] %v7187_v9  ;;  %v7198_v11 = vld [vmem:[%s8424_s2] sm:$0x7]  ;;  %v797_v56 = vadd.f32 %v796_v37, %v7056_v50  ;;  %v803_v50 = vadd.f32 %v7126_v51, %v7062_v54 }
 0x146   : > { %v836_v7 = vpop.f32.mrf.mxu1  ;;  %v7179_v33 = vpop.f32.mrf.mxu0 }
 0x147   : > { %v7182_v24 = vadd.f32 %v836_v7, %v7088_v13 }
 0x148   : > { %v838_v34 = vpop.f32.mrf.mxu1  ;;  %v7184_v52 = vpop.f32.mrf.mxu0 }
 0x149   : > { %v7193_v49 = vadd.f32 %v838_v34, %v7090_v15  ;;  %v7207_v15 = vrot.slane %v7198_v11, %v7187_v9  ;;  %v7211_v34 = vrot.slane %v7198_v11, %v7190_v6 }
 0x14a   : > { %v842_v43 = vpop.f32.mrf.mxu1  ;;  %v1183_v13 = vpop.f32.mrf.mxu0 }
 0x14b   : > { %v7202_v7 = vadd.f32 %v842_v43, %v7092_v17  ;;  %v1417_v8 = vadd.f32 %v1183_v13, %v7116_v35 }
 0x14c   : > { %v844_v18 = vpop.f32.mrf.mxu1  ;;  %v1185_v16 = vpop.f32.mrf.mxu0 }
 0x14d   : > { %v7214_v14 = vadd.f32 %v844_v18, %v7094_v19  ;;  %v1418_v58 = vadd.f32 %v1185_v16, %v797_v56  ;;  %v7219_v35 = vadd.f32 %v7207_v15, %v1417_v8 }
 0x14e   : > { %v848_v17 = vpop.f32.mrf.mxu1  ;;  %v1189_v37 = vpop.f32.mrf.mxu0 }
 0x14f   : > { %v7222_v43 = vadd.f32 %v7211_v34, %v1418_v58  ;;  %v7225_v13 = vadd.f32 %v848_v17, %v7096_v21  ;;  %v1420_v45 = vadd.f32 %v1189_v37, %v7122_v55 }
 0x150   : > { %v850_v42 = vpop.f32.mrf.mxu1  ;;  %v1191_v19 = vpop.f32.mrf.mxu0 }
 0x151   : > { %v7231_v51 = vadd.f32 %v850_v42, %v7098_v23  ;;  %v1421_v54 = vadd.f32 %v1191_v19, %v803_v50  ;;  %v7236_v58 = vadd.f32 %v7207_v15, %v1420_v45 }
 0x152   : > { %v7233_v18 = vpop.f32.mrf.mxu1  ;;  %v1195_v8 = vpop.f32.mrf.mxu0 }
 0x153   : > { %8457 = vst [vmem:[#allocation30_spill] sm:$0xff] %v7231_v51  ;;  %v7239_v21 = vadd.f32 %v7211_v34, %v1421_v54  ;;  %v1423_v55 = vadd.f32 %v1195_v8, %v7130_v48 }
 0x154   : > { %v7242_v56 = vpop.f32.mrf.mxu1  ;;  %v1197_v17 = vpop.f32.mrf.mxu0 }
 0x155   : > { %v1424_v23 = vadd.f32 %v1197_v17, %v7134_v36  ;;  %v7250_v19 = vadd.f32 %v7207_v15, %v1423_v55  ;;  %v3253_v55 = vld [vmem:[#allocation5 + $0x78] sm:$0xff] }
 0x156   : > { %v7247_v42 = vpop.f32.mrf.mxu1  ;;  %v1201_v50 = vpop.f32.mrf.mxu0  ;;  %5864 = vmatprep.subr.mxu0 %v3253_v55 }
 0x157   : > { %8458 = vst [vmem:[#allocation31_spill] sm:$0xff] %v7250_v19  ;;  %v7253_v45 = vadd.f32 %v7211_v34, %v1424_v23  ;;  %v1426_v54 = vadd.f32 %v1201_v50, %v7138_v39  ;;  %v791_v50 = vadd.f32 %v7112_v31, %v7050_v46  ;;  %5865 = vmatpush3.msra.mxu0 %v3253_v55  ;;  %v1594_v55 = vunpack.c.0.s8 %v1593_v2 }
 0x158   : > { %v7256_v48 = vpop.f32.mrf.mxu1  ;;  %v1203_v8 = vpop.f32.mrf.mxu0  ;;  %v789_v46 = vadd.f32 %v7108_v29, %v7046_v44 }
 0x159   : > { %8459 = vst [vmem:[#allocation32_spill] sm:$0xff] %v7253_v45  ;;  %v1427_v37 = vadd.f32 %v1203_v8, %v7142_v47  ;;  %v7264_v9 = vadd.f32 %v7207_v15, %v1426_v54  ;;  %v1471_v8 = vsub.s32 2, %v7174_v5  ;;  %v8460_v45 = vlaneseq }
 0x15a   : > { %v7261_v36 = vpop.f32.mrf.mxu1  ;;  %v1207_v17 = vpop.f32.mrf.mxu0  ;;  %v1415_v31 = vadd.f32 %v7184_v52, %v791_v50  ;;  %v1414_v44 = vadd.f32 %v7179_v33, %v789_v46  ;;  %v7334_v46 = vadd.f32 %v7120_v38, %v7078_v4  ;;  %v3252_v4 = vld [vmem:[#allocation5 + $0x70] sm:$0xff] }
 0x15b   : > { %v7267_v23 = vadd.f32 %v7211_v34, %v1427_v37  ;;  %v1429_v39 = vadd.f32 %v1207_v17, %v7147_v10  ;;  %v7279_v37 = vand.u32 127, %v8460_v45  ;;  %v785_v10 = vadd.f32 %v7104_v27, %v7042_v0  ;;  %5866 = vmatprep.subr.mxu0 %v3252_v4 }
 0x15c   : > { %v7272_v16 = vpop.f32.mrf.mxu1  ;;  %v1209_v47 = vpop.f32.mrf.mxu0  ;;  %v783_v0 = vadd.f32 %v7100_v25, %v7038_v40  ;;  %v7302_v2 = vrot.slane %v7198_v11, %v1471_v8  ;;  %v944_v40 = vadd.f32 %v7106_v28, %v7068_v59  ;;  %v3286_v8 = vld [vmem:[#allocation5 + $0xf8] sm:$0xff]  ;;  %v959_v59 = vadd.f32 %v7110_v30, %v7070_v61  ;;  %5867 = vmatpush3.msra.mxu0 %v3252_v4 }
 0x15d   : > { %v1430_v54 = vadd.f32 %v1209_v47, %v7152_v60  ;;  %v7289_v51 = vadd.f32 %v7207_v15, %v1429_v39  ;;  %v1412_v27 = vadd.f32 %v7171_v12, %v785_v10  ;;  %v949_v39 = vadd.f32 %v7102_v26, %v7066_v57  ;;  %5820 = vmatprep.subr.mxu1 %v3286_v8 }
 0x15e   : > { %v7286_v17 = vpop.f32.mrf.mxu1  ;;  %v1213_v19 = vpop.f32.mrf.mxu0  ;;  %vm1526_vm1 = vcmp.lt.s32.totalorder %v7279_v37, 16  ;;  %v1411_v25 = vadd.f32 %v7166_v3, %v783_v0  ;;  %v1480_v12 = vadd.f32 %v7211_v34, %v1415_v31  ;;  %v7328_v28 = vadd.f32 %v7114_v32, %v7072_v63  ;;  %5821 = vmatpush3.msra.mxu1 %v3286_v8  ;;  %v3285_v63 = vld [vmem:[#allocation5 + $0xf0] sm:$0xff] }
 0x15f   : > { %v7292_v60 = vadd.f32 %v7211_v34, %v1430_v54  ;;  %v1432_v45 = vadd.f32 %v1213_v19, %v7157_v62  ;;  %v7315_v19 = vsub.s32 %v1594_v55, %v7174_v5  ;;  %v1477_v3 = vadd.f32 %v7211_v34, %v1412_v27  ;;  %5822 = vmatprep.subr.mxu1 %v3285_v63 }
 0x160   : > { %v7299_v29 = vpop.f32.mrf.mxu1  ;;  %v1215_v52 = vpop.f32.mrf.mxu0  ;;  %v1479_v5 = vadd.f32 %v7207_v15, %v1414_v44  ;;  %v1476_v32 = vadd.f32 %v7207_v15, %v1411_v25  ;;  %5823 = vmatpush3.msra.mxu1 %v3285_v63  ;;  %v8466_v63 = vld [vmem:[#allocation15_spill] sm:$0xff] }
 0x161   : > { %8461 = vst [vmem:[#allocation33_spill] sm:$0xff] %v7299_v29  ;;  %v1433_v62 = vadd.f32 %v1215_v52, %v7162_v1  ;;  %v7318_v57 = vadd.f32 %v7207_v15, %v1432_v45 }
 0x162   : > { %v1219_v33 = vpop.f32.mrf.mxu0  ;;  %v5798_v11 = vpop.f32.mrf.mxu1  ;;  %v1544_v31 = vmax.f32 %v1479_v5, %v1480_v12 }
 0x163   : > { %v7321_v26 = vadd.f32 %v7211_v34, %v1433_v62  ;;  %v1435_v1 = vadd.f32 %v1219_v33, %v7169_v20  ;;  %v1416_v47 = vadd.f32 %v5798_v11, %v949_v39  ;;  %v1543_v39 = vmax.f32 %v1476_v32, %v1477_v3  ;;  %v8462_v62 = vld [vmem:[#allocation11_spill] sm:$0xff]  ;;  %v8463_v11 = vld [vmem:[#allocation12_spill] sm:$0xff] }
 0x164   : > { %v1221_v54 = vpop.f32.mrf.mxu0  ;;  %v1332_v10 = vpop.f32.mrf.mxu1  ;;  %v7352_v25 = vadd.f32 %v7233_v18, %v8462_v62  ;;  %v8464_v18 = vld [vmem:[#allocation13_spill] sm:$0xff]  ;;  %v7384_v32 = vadd.f32 %v7261_v36, %v8466_v63 }
 0x165   : > { %v1481_v61 = vadd.f32 %v7302_v2, %v1416_v47  ;;  %v1436_v30 = vadd.f32 %v1221_v54, %v7177_v22  ;;  %v7342_v55 = vadd.f32 %v7207_v15, %v1435_v1  ;;  %v1413_v45 = vadd.f32 %v1332_v10, %v944_v40 }
 0x166   : > { %v1225_v0 = vpop.f32.mrf.mxu0  ;;  %v5801_v27 = vpop.f32.mrf.mxu1  ;;  %v7357_v1 = vadd.f32 %v7242_v56, %v8463_v11  ;;  %8467 = vst [vmem:[#allocation11_spill] sm:$0xff] %v7384_v32  ;;  %v8477_v32 = vmax.f32 %v7264_v9, %v7267_v23 }
 0x167   : > { %v1528_v38 = vsel %vm1526_vm1, -inf, %v1481_v61  ;;  %v7347_v44 = vadd.f32 %v7211_v34, %v1436_v30  ;;  %v1438_v22 = vadd.f32 %v1225_v0, %v7182_v24  ;;  %v1422_v52 = vadd.f32 %v5801_v27, %v959_v59 }
 0x168   : > { %v1560_v40 = vmax.f32 %v1544_v31, %v1528_v38  ;;  %v1478_v12 = vadd.f32 %v7302_v2, %v1413_v45  ;;  %v1227_v33 = vpop.f32.mrf.mxu0  ;;  %v7365_v59 = vadd.f32 %v7247_v42, %v8464_v18  ;;  %v8465_v42 = vld [vmem:[#allocation14_spill] sm:$0xff]  ;;  %v1342_v0 = vpop.f32.mrf.mxu1  ;;  %v8468_v38 = vmax.f32 %v7236_v58, %v7239_v21 }
 0x169   : > { %v1487_v47 = vadd.f32 %v7302_v2, %v1422_v52  ;;  %v1439_v8 = vadd.f32 %v1227_v33, %v7193_v49  ;;  %v7371_v10 = vadd.f32 %v7207_v15, %v1438_v22  ;;  %v7380_v30 = vadd.f32 %v7256_v48, %v8465_v42  ;;  %v8471_v33 = vld [vmem:[#allocation17_spill] sm:$0xff] }
 0x16a   : > { %v1608_v3 = vcombine.high %v1560_v40, %v1560_v40  ;;  %v1615_v5 = vrot.slane %v1560_v40, %v7315_v19  ;;  %v1527_v54 = vsel %vm1526_vm1, -inf, %v1478_v12  ;;  %v1231_v52 = vpop.f32.mrf.mxu0  ;;  %v7399_v11 = vadd.f32 %v7286_v17, %v8471_v33  ;;  %v5804_v50 = vpop.f32.mrf.mxu1 }
 0x16b   : > { %v1559_v56 = vmax.f32 %v1543_v39, %v1527_v54  ;;  %v1530_v61 = vsel %vm1526_vm1, -inf, %v1487_v47  ;;  %v7376_v49 = vadd.f32 %v7211_v34, %v1439_v8  ;;  %v8469_v39 = vld [vmem:[#allocation16_spill] sm:$0xff]  ;;  %v1419_v58 = vadd.f32 %v1342_v0, %v7328_v28 }
 0x16c   : > { %v1622_v31 = vrot.slane %v1608_v3, %v7315_v19  ;;  %v1623_v45 = vcombine.high %v1615_v5, %v1615_v5  ;;  %v1562_v22 = vmax.f32 %v8468_v38, %v1530_v61  ;;  %v7395_v36 = vadd.f32 %v7272_v16, %v8469_v39  ;;  %8472 = vst [vmem:[#allocation13_spill] sm:$0xff] %v7399_v11 }
 0x16d   : > { %v1591_v27 = vcombine.high %v1559_v56, %v1559_v56  ;;  %v1598_v4 = vrot.slane %v1559_v56, %v7315_v19  ;;  %v5285_v40 = vrot.slane %v1615_v5, 9  ;;  %v1954_v21 = vrot.slane %v1615_v5, %v7190_v6 }
 0x16e   : > { %8470 = vst [vmem:[#allocation12_spill] sm:$0xff] %v7395_v36  ;;  %v1624_v62 = vcombine.high %v1622_v31, %v1622_v31  ;;  %v5286_v12 = vrot.slane %v1623_v45, 9  ;;  %v1958_v18 = vrot.slane %v1623_v45, %v7190_v6  ;;  %v1962_v3 = vrot.slane %v1622_v31, %v7190_v6 }
 0x16f   : > { %v1605_v47 = vrot.slane %v1591_v27, %v7315_v19  ;;  %v1606_v8 = vcombine.high %v1598_v4, %v1598_v4  ;;  %v1441_v16 = vadd.f32 %v1231_v52, %v7202_v7  ;;  %v1938_v56 = vrot.slane %v1598_v4, %v7190_v6 }
 0x170   : > { %v5287_v42 = vrot.slane %v1622_v31, 9  ;;  %v5288_v63 = vrot.slane %v1624_v62, 9  ;;  %v7410_v27 = vmax.f32 %v1615_v5, %v5285_v40  ;;  %v7412_v28 = vmax.f32 %v1623_v45, %v5286_v12 }
 0x171   : > { %v1607_v54 = vcombine.high %v1605_v47, %v1605_v47  ;;  %v1942_v61 = vrot.slane %v1606_v8, %v7190_v6  ;;  %v1946_v17 = vrot.slane %v1605_v47, %v7190_v6  ;;  %v5281_v39 = vrot.slane %v1598_v4, 9 }
 0x172   : > { %v1642_v33 = vcombine.high %v1562_v22, %v1562_v22  ;;  %v5282_v52 = vrot.slane %v1606_v8, 9  ;;  %v5283_v24 = vrot.slane %v1605_v47, 9  ;;  %v7418_v48 = vrot.slane %v1562_v22, %v7315_v19 }
 0x173   : > { %v1950_v0 = vrot.slane %v1607_v54, %v7190_v6  ;;  %v2160_v38 = vsel %vm2159_vm2, %v1942_v61, %v1938_v56  ;;  %v5284_v5 = vrot.slane %v1607_v54, 9  ;;  %v1484_v40 = vadd.f32 %v7302_v2, %v1419_v58  ;;  %v1233_v58 = vpop.f32.mrf.mxu0 }
 0x174   : > { %v2162_v7 = vsel %vm2161_vm3, %v1946_v17, %v2160_v38  ;;  %v7422_v45 = vrot.slane %v1642_v33, %v7315_v19  ;;  %v7425_v12 = vmax.f32 %v1622_v31, %v5287_v42  ;;  %v7427_v56 = vmax.f32 %v1624_v62, %v5288_v63  ;;  %v3284_v31 = vld [vmem:[#allocation5 + $0xe8] sm:$0xff]  ;;  %v1352_v63 = vpop.f32.mrf.mxu1 }
 0x175   : > { %v2164_v20 = vsel %vm2163_vm4, %v1950_v0, %v2162_v7  ;;  %v7432_v17 = vcombine.high %v7418_v48, %v7418_v48  ;;  %v5293_v38 = vrot.slane %v7418_v48, 9  ;;  %v7440_v42 = vmax.f32 %v1598_v4, %v5281_v39  ;;  %5824 = vmatprep.subr.mxu1 %v3284_v31  ;;  %v3283_v4 = vld [vmem:[#allocation5 + $0xe0] sm:$0xff] }
 0x176   : > { %v2166_v61 = vsel %vm2165_vm5, %v1954_v21, %v2164_v20  ;;  %v1658_v0 = vcombine.high %v7422_v45, %v7422_v45  ;;  %v5295_v33 = vrot.slane %v7422_v45, 9  ;;  %v7442_v20 = vmax.f32 %v1606_v8, %v5282_v52  ;;  %5825 = vmatpush3.msra.mxu1 %v3284_v31  ;;  %v3250_v52 = vld [vmem:[#allocation5 + $0x60] sm:$0xff] }
 0x177   : > { %v2168_v22 = vsel %vm2167_vm6, %v1958_v18, %v2166_v61  ;;  %v7444_v21 = vmax.f32 %v1605_v47, %v5283_v24  ;;  %v3251_v18 = vld [vmem:[#allocation5 + $0x68] sm:$0xff]  ;;  %v7446_v7 = vmax.f32 %v1607_v54, %v5284_v5  ;;  %v5294_v61 = vrot.slane %v7432_v17, 9  ;;  %5826 = vmatprep.subr.mxu1 %v3283_v4  ;;  %v3279_v5 = vld [vmem:[#allocation5 + $0xc0] sm:$0xff] }
 0x178   : > { %v2170_v62 = vsel %vm2169_vm7, %v1962_v3, %v2168_v22  ;;  %v5296_v41 = vrot.slane %v1658_v0, 9  ;;  %v1529_v11 = vsel %vm1526_vm1, -inf, %v1484_v40  ;;  %5868 = vmatprep.subr.mxu0 %v3251_v18  ;;  %v8473_v24 = vmax.f32 %v7219_v35, %v7222_v43  ;;  %v8474_v3 = vld [vmem:[#allocation19_spill] sm:$0xff]  ;;  %v1237_v35 = vpop.f32.mrf.mxu0  ;;  %v3282_v43 = vld [vmem:[#allocation5 + $0xd8] sm:$0xff]  ;;  %5827 = vmatpush3.msra.mxu1 %v3283_v4 }
 0x179   : > { %2221 = vst [vmem:[#allocation4 + $0x30] sm:$0xfe] %v2170_v62  ;;  %v1428_v39 = vadd.f32 %v5804_v50, %v8474_v3  ;;  %v1442_v54 = vadd.f32 %v1233_v58, %v7214_v14  ;;  %v7463_v22 = vmax.f32 %v7418_v48, %v5293_v38  ;;  %v7466_v31 = vmax.f32 %v7422_v45, %v5295_v33  ;;  %v5807_v62 = vpop.f32.mrf.mxu1  ;;  %v3249_v38 = vld [vmem:[#allocation5 + $0x58] sm:$0xff] }
 0x17a   : > { %v1561_v47 = vmax.f32 %v8473_v24, %v1529_v11  ;;  %5869 = vmatpush3.msra.mxu0 %v3251_v18  ;;  %v7472_v11 = vadd.f32 %v7207_v15, %v1441_v16  ;;  %v7478_v24 = vmax.f32 %v7432_v17, %v5294_v61  ;;  %v7480_v33 = vmax.f32 %v1658_v0, %v5296_v41  ;;  %v3248_v61 = vld [vmem:[#allocation5 + $0x50] sm:$0xff]  ;;  %v1239_v40 = vpop.f32.mrf.mxu0 }
 0x17b   : > { %v7475_v58 = vadd.f32 %v7211_v34, %v1442_v54  ;;  %v1493_v18 = vadd.f32 %v7302_v2, %v1428_v39  ;;  %v1425_v3 = vadd.f32 %v1352_v63, %v7334_v46  ;;  %5870 = vmatprep.subr.mxu0 %v3250_v52  ;;  %v1444_v4 = vadd.f32 %v1237_v35, %v7225_v13  ;;  %v3280_v63 = vld [vmem:[#allocation5 + $0xc8] sm:$0xff] }
 0x17c   : > { %v1625_v50 = vcombine.high %v1561_v47, %v1561_v47  ;;  %v7469_v14 = vrot.slane %v1561_v47, %v7315_v19  ;;  %8475 = vst [vmem:[#allocation14_spill] sm:$0xff] %v7472_v11  ;;  %v3281_v47 = vld [vmem:[#allocation5 + $0xd0] sm:$0xff]  ;;  %5828 = vmatprep.subr.mxu1 %v3282_v43  ;;  %5871 = vmatpush3.msra.mxu0 %v3250_v52  ;;  %v3247_v35 = vld [vmem:[#allocation5 + $0x48] sm:$0xff] }
 0x17d   : > { %8476 = vst [vmem:[#allocation15_spill] sm:$0xff] %v7475_v58  ;;  %v1434_v0 = vadd.f32 %v5807_v62, %v7124_v53  ;;  %5829 = vmatpush3.msra.mxu1 %v3282_v43  ;;  %5872 = vmatprep.subr.mxu0 %v3249_v38  ;;  %v1532_v43 = vsel %vm1526_vm1, -inf, %v1493_v18  ;;  %v1490_v62 = vadd.f32 %v7302_v2, %v1425_v3 }
 0x17e   : > { %v7485_v16 = vrot.slane %v1625_v50, %v7315_v19  ;;  %v7489_v54 = vcombine.high %v7469_v14, %v7469_v14  ;;  %v1966_v41 = vrot.slane %v7469_v14, %v7190_v6  ;;  %5830 = vmatprep.subr.mxu1 %v3281_v47  ;;  %5873 = vmatpush3.msra.mxu0 %v3249_v38 }
 0x17f   : > { %5831 = vmatpush3.msra.mxu1 %v3281_v47  ;;  %5874 = vmatprep.subr.mxu0 %v3248_v61  ;;  %v7513_v38 = vadd.f32 %v7207_v15, %v1444_v4  ;;  %v3246_v47 = vld [vmem:[#allocation5 + $0x40] sm:$0xff]  ;;  %v7524_v4 = vadd.f32 %v7302_v2, %v1434_v0 }
 0x180   : > { %v2485_v39 = vld [vmem:[#allocation4 + $0x30] sm:$0xff]  ;;  %v7499_v50 = vcombine.high %v7485_v16, %v7485_v16  ;;  %v1970_v13 = vrot.slane %v7489_v54, %v7190_v6  ;;  %v1974_v52 = vrot.slane %v7485_v16, %v7190_v6  ;;  %5832 = vmatprep.subr.mxu1 %v3280_v63  ;;  %5875 = vmatpush3.msra.mxu0 %v3248_v61  ;;  %v8478_v61 = vld [vmem:[#allocation30_spill] sm:$0xff] }
 0x181   : > { %v2501_v46 = vcombine.high %v2485_v39, %v2485_v39  ;;  %v2508_v53 = vrot.slane %v2485_v39, %v7315_v19  ;;  %5833 = vmatpush3.msra.mxu1 %v3280_v63  ;;  %5876 = vmatprep.subr.mxu0 %v3247_v35 }
 0x182   : > { %v1978_v8 = vrot.slane %v7499_v50, %v7190_v6  ;;  %v2171_v36 = vsel %vm2159_vm2, %v1970_v13, %v1966_v41  ;;  %v7521_v41 = vmax.f32 %v8477_v32, %v1532_v43  ;;  %v7527_v13 = vadd.f32 %v1239_v40, %v8478_v61  ;;  %5834 = vmatprep.subr.mxu1 %v3279_v5  ;;  %v3245_v40 = vld [vmem:[#allocation5 + $0x38] sm:$0xff]  ;;  %v8479_v61 = vld [vmem:[#allocation29_spill] sm:$0xff] }
 0x183   : > { %v2515_v39 = vrot.slane %v2501_v46, %v7315_v19  ;;  %v2516_v18 = vcombine.high %v2508_v53, %v2508_v53  ;;  %v2637_v58 = vrot.slane %v2508_v53, 1  ;;  %v2733_v3 = vmax.f32 %v7440_v42, %v2508_v53  ;;  %v3278_v46 = vld [vmem:[#allocation5 + $0xb8] sm:$0xff]  ;;  %5877 = vmatpush3.msra.mxu0 %v3247_v35  ;;  %5835 = vmatpush3.msra.mxu1 %v3279_v5  ;;  %v3277_v5 = vld [vmem:[#allocation5 + $0xb0] sm:$0xff] }
 0x184   : > { %v2172_v11 = vsel %vm2161_vm3, %v1974_v52, %v2171_v36  ;;  %v1531_v32 = vsel %vm1526_vm1, -inf, %v1490_v62  ;;  %5878 = vmatprep.subr.mxu0 %v3246_v47  ;;  %5836 = vmatprep.subr.mxu1 %v3278_v46  ;;  %v5289_v35 = vrot.slane %v7469_v14, 9  ;;  %v5290_v62 = vrot.slane %v7489_v54, 9 }
 0x185   : > { %v2517_v29 = vcombine.high %v2515_v39, %v2515_v39  ;;  %v2638_v42 = vrot.slane %v2516_v18, 1  ;;  %v2639_v63 = vrot.slane %v2515_v39, 1  ;;  %v2734_v53 = vmax.f32 %v7442_v20, %v2637_v58  ;;  %5879 = vmatpush3.msra.mxu0 %v3246_v47  ;;  %5837 = vmatpush3.msra.mxu1 %v3278_v46  ;;  %v3276_v47 = vld [vmem:[#allocation5 + $0xa8] sm:$0xff] }
 0x186   : > { %v2735_v36 = vmax.f32 %v7444_v21, %v2516_v18  ;;  %v2737_v9 = vmax.f32 %v7410_v27, %v2515_v39  ;;  %v2173_v23 = vsel %vm2163_vm4, %v1978_v8, %v2172_v11  ;;  %v2896_v20 = vrot.slane %v2733_v3, %v8479_v61  ;;  %5880 = vmatprep.subr.mxu0 %v3245_v40  ;;  %v3244_v3 = vld [vmem:[#allocation5 + $0x30] sm:$0xff] }
 0x187   : > { %v2640_v0 = vrot.slane %v2517_v29, 1  ;;  %v2736_v52 = vmax.f32 %v7446_v7, %v2638_v42  ;;  %v2738_v43 = vmax.f32 %v7412_v28, %v2639_v63  ;;  %v2739_v21 = vmax.f32 %v7425_v12, %v2517_v29  ;;  %5838 = vmatprep.subr.mxu1 %v3277_v5  ;;  %5881 = vmatpush3.msra.mxu0 %v3245_v40 }
 0x188   : > { %v2900_v27 = vrot.slane %v2734_v53, %v8479_v61  ;;  %v2904_v8 = vrot.slane %v2735_v36, %v8479_v61  ;;  %v8480_v11 = vrot.slane %v7418_v48, %v7190_v6  ;;  %v2912_v28 = vrot.slane %v2737_v9, %v8479_v61  ;;  %v8484_v53 = vld [vmem:[#allocation32_spill] sm:$0xff]  ;;  %5839 = vmatpush3.msra.mxu1 %v3277_v5 }
 0x189   : > { %v2908_v7 = vrot.slane %v2736_v52, %v8479_v61  ;;  %v2740_v29 = vmax.f32 %v7427_v56, %v2640_v0  ;;  %v8481_v39 = vrot.slane %v7432_v17, %v7190_v6  ;;  %v1676_v18 = vcombine.high %v7521_v41, %v7521_v41  ;;  %v8483_v17 = vld [vmem:[#allocation31_spill] sm:$0xff]  ;;  %5882 = vmatprep.subr.mxu0 %v3244_v3 }
 0x18a   : > { %v2174_v58 = vsel %vm2165_vm5, %v8480_v11, %v2173_v23  ;;  %v3150_v12 = vsel %vm3149_vm8, %v2900_v27, %v2896_v20  ;;  %v8482_v42 = vrot.slane %v7422_v45, %v7190_v6  ;;  %v7564_v63 = vrot.slane %v7521_v41, %v7315_v19  ;;  %v3243_v20 = vld [vmem:[#allocation5 + $0x28] sm:$0xff]  ;;  %5840 = vmatprep.subr.mxu1 %v3276_v47 }
 0x18b   : > { %v2175_v48 = vsel %vm2167_vm6, %v8481_v39, %v2174_v58  ;;  %v3151_v46 = vsel %vm2159_vm2, %v2904_v8, %v3150_v12  ;;  %v8485_v36 = vmax.f32 %v8483_v17, %v8484_v53  ;;  %v2916_v23 = vrot.slane %v2738_v43, %v8479_v61  ;;  %5883 = vmatpush3.msra.mxu0 %v3244_v3  ;;  %v3242_v58 = vld [vmem:[#allocation5 + $0x20] sm:$0xff]  ;;  %v3241_v3 = vld [vmem:[#allocation5 + $0x18] sm:$0xff] }
 0x18c   : > { %v2176_v56 = vsel %vm2169_vm7, %v8482_v42, %v2175_v48  ;;  %v2920_v0 = vrot.slane %v2739_v21, %v8479_v61  ;;  %v3152_v52 = vsel %vm2161_vm3, %v2908_v7, %v3151_v46  ;;  %v5291_v45 = vrot.slane %v7485_v16, 9  ;;  %5841 = vmatpush3.msra.mxu1 %v3276_v47  ;;  %5884 = vmatprep.subr.mxu0 %v3243_v20 }
 0x18d   : > { %v1563_v9 = vmax.f32 %v8485_v36, %v1531_v32  ;;  %2222 = vst [vmem:[#allocation4] sm:$0xfe] %v2176_v56  ;;  %v3153_v27 = vsel %vm2163_vm4, %v2912_v28, %v3152_v52  ;;  %v5292_v41 = vrot.slane %v7499_v50, 9  ;;  %v3275_v32 = vld [vmem:[#allocation5 + $0xa0] sm:$0xff]  ;;  %v2924_v40 = vrot.slane %v2740_v29, %v8479_v61  ;;  %v3274_v29 = vld [vmem:[#allocation5 + $0x98] sm:$0xff]  ;;  %5885 = vmatpush3.msra.mxu0 %v3243_v20 }
 0x18e   : > { %v3154_v43 = vsel %vm2165_vm5, %v2916_v23, %v3153_v27  ;;  %v7581_v21 = vmax.f32 %v7469_v14, %v5289_v35  ;;  %v7584_v5 = vmax.f32 %v7489_v54, %v5290_v62  ;;  %v7588_v28 = vrot.slane %v1676_v18, %v7315_v19  ;;  %5842 = vmatprep.subr.mxu1 %v3275_v32  ;;  %v3240_v23 = vld [vmem:[#allocation5 + $0x10] sm:$0xff]  ;;  %v3272_v27 = vld [vmem:[#allocation5 + $0x88] sm:$0xff] }
 0x18f   : > { %v1659_v8 = vcombine.high %v1563_v9, %v1563_v9  ;;  %v7576_v11 = vrot.slane %v1563_v9, %v7315_v19  ;;  %v3155_v7 = vsel %vm2167_vm6, %v2920_v0, %v3154_v43  ;;  %v7592_v12 = vcombine.high %v7564_v63, %v7564_v63  ;;  %5843 = vmatpush3.msra.mxu1 %v3275_v32 }
 0x190   : > { %v3156_v14 = vsel %vm2169_vm7, %v2924_v40, %v3155_v7  ;;  %v1534_v62 = vsel %vm1526_vm1, -inf, %v7524_v4  ;;  %v7606_v39 = vmax.f32 %v7485_v16, %v5291_v45  ;;  %v2432_v48 = vmax.f32 %v7499_v50, %v5292_v41  ;;  %5886 = vmatprep.subr.mxu0 %v3242_v58  ;;  %5844 = vmatprep.subr.mxu1 %v3274_v29  ;;  %v3273_v50 = vld [vmem:[#allocation5 + $0x90] sm:$0xff]  ;;  %v3239_v7 = vld [vmem:[#allocation5 + $0x8] sm:$0xff] }
 0x191   : > { %v7596_v35 = vrot.slane %v1659_v8, %v7315_v19  ;;  %v7600_v54 = vcombine.high %v7576_v11, %v7576_v11  ;;  %3214 = vst [vmem:[#allocation2 + $0x1] sm:$0xff] %v3156_v14  ;;  %v2010_v18 = vrot.slane %v7564_v63, %v7190_v6  ;;  %v1994_v4 = vrot.slane %v7576_v11, %v7190_v6 }
 0x192   : > { %v7623_v56 = vcombine.high %v7588_v28, %v7588_v28  ;;  %v5301_v17 = vrot.slane %v7564_v63, 9  ;;  %v5302_v53 = vrot.slane %v7592_v12, 9  ;;  %v8486_v36 = vmax.f32 %v7318_v57, %v7321_v26  ;;  %5887 = vmatpush3.msra.mxu0 %v3242_v58  ;;  %5845 = vmatpush3.msra.mxu1 %v3274_v29 }
 0x193   : > { %v7613_v47 = vcombine.high %v7596_v35, %v7596_v35  ;;  %v1998_v46 = vrot.slane %v7600_v54, %v7190_v6  ;;  %v2002_v16 = vrot.slane %v7596_v35, %v7190_v6  ;;  %5888 = vmatprep.subr.mxu0 %v3241_v3  ;;  %v2014_v41 = vrot.slane %v7592_v12, %v7190_v6 }
 0x194   : > { %v2486_v42 = vld [vmem:[#allocation4] sm:$0xff]  ;;  %v7630_v9 = vmax.f32 %v8486_v36, %v1534_v62  ;;  %v2018_v57 = vrot.slane %v7588_v28, %v7190_v6  ;;  %v5303_v26 = vrot.slane %v7588_v28, 9  ;;  %5846 = vmatprep.subr.mxu1 %v3273_v50  ;;  %5889 = vmatpush3.msra.mxu0 %v3241_v3  ;;  %v5304_v29 = vrot.slane %v7623_v56, 9 }
 0x195   : > { %v2518_v0 = vcombine.high %v2486_v42, %v2486_v42  ;;  %v2525_v52 = vrot.slane %v2486_v42, %v7315_v19  ;;  %v2006_v45 = vrot.slane %v7613_v47, %v7190_v6  ;;  %v2177_v20 = vsel %vm2159_vm2, %v1998_v46, %v1994_v4  ;;  %5847 = vmatpush3.msra.mxu1 %v3273_v50  ;;  %v3271_v3 = vld [vmem:[#allocation5 + $0x80] sm:$0xff] }
 0x196   : > { %v2178_v8 = vsel %vm2161_vm3, %v2002_v16, %v2177_v20  ;;  %5890 = vmatprep.subr.mxu0 %v3240_v23  ;;  %v7646_v14 = vmax.f32 %v7564_v63, %v5301_v17  ;;  %v7649_v62 = vmax.f32 %v7592_v12, %v5302_v53  ;;  %5848 = vmatprep.subr.mxu1 %v3272_v27  ;;  %v5297_v12 = vrot.slane %v7576_v11, 9  ;;  %v3238_v17 = vld [vmem:[#allocation5] sm:$0xff]  ;;  %v7665_v20 = vld [vmem:[#allocation5 + $0x178] sm:$0xff] }
 0x197   : > { %v2532_v32 = vrot.slane %v2518_v0, %v7315_v19  ;;  %v2533_v40 = vcombine.high %v2525_v52, %v2525_v52  ;;  %v2641_v43 = vrot.slane %v2525_v52, 1  ;;  %v2741_v58 = vmax.f32 %v7581_v21, %v2525_v52  ;;  %5891 = vmatpush3.msra.mxu0 %v3240_v23  ;;  %5849 = vmatpush3.msra.mxu1 %v3272_v27 }
 0x198   : > { %v2179_v4 = vsel %vm2163_vm4, %v2006_v45, %v2178_v8  ;;  %v7655_v36 = vmax.f32 %v7588_v28, %v5303_v26  ;;  %5892 = vmatprep.subr.mxu0 %v3239_v7  ;;  %5850 = vmatprep.subr.mxu1 %v3271_v3  ;;  %v1710_v27 = vcombine.high %v7630_v9, %v7630_v9 }
 0x199   : > { %v2534_v46 = vcombine.high %v2532_v32, %v2532_v32  ;;  %v2642_v16 = vrot.slane %v2533_v40, 1  ;;  %v2643_v42 = vrot.slane %v2532_v32, 1  ;;  %v2742_v21 = vmax.f32 %v7584_v5, %v2641_v43  ;;  %v1362_v5 = vpop.f32.mrf.mxu1  ;;  %5893 = vmatpush3.msra.mxu0 %v3239_v7  ;;  %5851 = vmatpush3.msra.mxu1 %v3271_v3 }
 0x19a   : > { %v2743_v50 = vmax.f32 %v7606_v39, %v2533_v40  ;;  %v2180_v63 = vsel %vm2165_vm5, %v2010_v18, %v2179_v4  ;;  %v2745_v52 = vmax.f32 %v7463_v22, %v2532_v32  ;;  %v2928_v45 = vrot.slane %v2741_v58, %v8479_v61  ;;  %5894 = vmatprep.subr.mxu0 %v3238_v17 }
 0x19b   : > { %v2644_v53 = vrot.slane %v2534_v46, 1  ;;  %v2744_v0 = vmax.f32 %v2432_v48, %v2642_v16  ;;  %v2746_v39 = vmax.f32 %v7478_v24, %v2643_v42  ;;  %v2932_v28 = vrot.slane %v2742_v21, %v8479_v61  ;;  %v1243_v24 = vpop.f32.mrf.mxu0  ;;  %5895 = vmatpush3.msra.mxu0 %v3238_v17  ;;  %v5810_v7 = vpop.f32.mrf.mxu1  ;;  %5908 = vmatprep.subr.mxu1 %v7665_v20 }
 0x19c   : > { %v2936_v23 = vrot.slane %v2743_v50, %v8479_v61  ;;  %v2181_v18 = vsel %vm2167_vm6, %v2014_v41, %v2180_v63  ;;  %v2747_v48 = vmax.f32 %v7466_v31, %v2534_v46  ;;  %v7673_v26 = vrot.slane %v7630_v9, %v7315_v19 }
 0x19d   : > { %v2940_v22 = vrot.slane %v2744_v0, %v8479_v61  ;;  %v2748_v8 = vmax.f32 %v7480_v33, %v2644_v53  ;;  %v3157_v41 = vsel %vm3149_vm8, %v2932_v28, %v2928_v45  ;;  %v7678_v32 = vmax.f32 %v7623_v56, %v5304_v29  ;;  %v1245_v42 = vpop.f32.mrf.mxu0  ;;  %v1372_v45 = vpop.f32.mrf.mxu1 }
 0x19e   : > { %v2182_v31 = vsel %vm2169_vm7, %v2018_v57, %v2181_v18  ;;  %v2944_v40 = vrot.slane %v2745_v52, %v8479_v61  ;;  %v3158_v43 = vsel %vm2159_vm2, %v2936_v23, %v3157_v41  ;;  %v5298_v9 = vrot.slane %v7600_v54, 9 }
 0x19f   : > { %2223 = vst [vmem:[#allocation4 + $0x18] sm:$0xfe] %v2182_v31  ;;  %v5299_v58 = vrot.slane %v7596_v35, 9  ;;  %v2948_v33 = vrot.slane %v2746_v39, %v8479_v61  ;;  %v3159_v56 = vsel %vm2161_vm3, %v2940_v22, %v3158_v43  ;;  %v5300_v29 = vrot.slane %v7613_v47, 9  ;;  %v1249_v18 = vpop.f32.mrf.mxu0  ;;  %v5813_v43 = vpop.f32.mrf.mxu1 }
 0x1a0   : > { %v2437_v57 = vmax.f32 %v7576_v11, %v5297_v12  ;;  %v2952_v4 = vrot.slane %v2747_v48, %v8479_v61  ;;  %v3160_v3 = vsel %vm2163_vm4, %v2944_v40, %v3159_v56  ;;  %v7693_v46 = vrot.slane %v1710_v27, %v7315_v19  ;;  %v8487_v11 = vld [vmem:[#allocation20_spill] sm:$0xff]  ;;  %v8490_v56 = vld [vmem:[#allocation22_spill] sm:$0xff] }
 0x1a1   : > { %v7697_v16 = vcombine.high %v7673_v26, %v7673_v26  ;;  %v2956_v21 = vrot.slane %v2748_v8, %v8479_v61  ;;  %v3161_v50 = vsel %vm2165_vm5, %v2948_v33, %v3160_v3  ;;  %v7703_v63 = vadd.f32 %v7211_v34, %v7527_v13 }
 0x1a2   : > { %v1431_v12 = vadd.f32 %v1362_v5, %v8487_v11  ;;  %v3162_v17 = vsel %vm2167_vm6, %v2952_v4, %v3161_v50  ;;  %v2438_v53 = vmax.f32 %v7600_v54, %v5298_v9  ;;  %v2439_v0 = vmax.f32 %v7596_v35, %v5299_v58  ;;  %v8489_v9 = vld [vmem:[#allocation21_spill] sm:$0xff] }
 0x1a3   : > { %v1447_v52 = vadd.f32 %v1243_v24, %v7352_v25  ;;  %v3163_v39 = vsel %vm2169_vm7, %v2956_v21, %v3162_v17  ;;  %v2440_v28 = vmax.f32 %v7613_v47, %v5300_v29  ;;  %v1554_v23 = vmax.f32 %v7513_v38, %v7703_v63 }
 0x1a4   : > { %v1496_v13 = vadd.f32 %v7302_v2, %v1431_v12  ;;  %3215 = vst [vmem:[#allocation2 + $0x11] sm:$0xff] %v3163_v39  ;;  %v7717_v5 = vcombine.high %v7693_v46, %v7693_v46  ;;  %v2038_v35 = vrot.slane %v7673_v26, %v7190_v6  ;;  %v5309_v25 = vrot.slane %v7673_v26, 9  ;;  %v8491_v12 = vld [vmem:[#allocation23_spill] sm:$0xff] }
 0x1a5   : > { %v1448_v54 = vadd.f32 %v1245_v42, %v7357_v1  ;;  %v2042_v47 = vrot.slane %v7697_v16, %v7190_v6  ;;  %v2046_v22 = vrot.slane %v7693_v46, %v7190_v6  ;;  %v5310_v27 = vrot.slane %v7697_v16, 9 }
 0x1a6   : > { %v2487_v48 = vld [vmem:[#allocation4 + $0x18] sm:$0xff]  ;;  %v1533_v24 = vsel %vm1526_vm1, -inf, %v1496_v13  ;;  %v8488_v31 = vmax.f32 %v7289_v51, %v7292_v60  ;;  %v7735_v40 = vadd.f32 %v7207_v15, %v1447_v52  ;;  %v1440_v58 = vadd.f32 %v5810_v7, %v8489_v9  ;;  %v1251_v51 = vpop.f32.mrf.mxu0 }
 0x1a7   : > { %v2535_v8 = vcombine.high %v2487_v48, %v2487_v48  ;;  %v2542_v41 = vrot.slane %v2487_v48, %v7315_v19  ;;  %v7739_v33 = vadd.f32 %v7211_v34, %v1448_v54  ;;  %v1437_v29 = vadd.f32 %v1372_v45, %v8490_v56 }
 0x1a8   : > { %v1565_v1 = vmax.f32 %v8488_v31, %v1533_v24  ;;  %v1450_v4 = vadd.f32 %v1249_v18, %v7365_v59  ;;  %v1446_v17 = vadd.f32 %v5813_v43, %v8491_v12  ;;  %v1451_v18 = vadd.f32 %v1251_v51, %v7380_v30 }
 0x1a9   : > { %v2549_v3 = vrot.slane %v2535_v8, %v7315_v19  ;;  %v2550_v42 = vcombine.high %v2542_v41, %v2542_v41  ;;  %v2645_v21 = vrot.slane %v2542_v41, 1  ;;  %v2749_v50 = vmax.f32 %v2437_v57, %v2542_v41 }
 0x1aa   : > { %v1693_v60 = vcombine.high %v1565_v1, %v1565_v1  ;;  %v7745_v11 = vrot.slane %v1565_v1, %v7315_v19  ;;  %v1555_v7 = vmax.f32 %v7735_v40, %v7739_v33  ;;  %v1505_v57 = vadd.f32 %v7302_v2, %v1440_v58 }
 0x1ab   : > { %v2551_v52 = vcombine.high %v2549_v3, %v2549_v3  ;;  %v2646_v39 = vrot.slane %v2550_v42, 1  ;;  %v2647_v45 = vrot.slane %v2549_v3, 1  ;;  %v2750_v13 = vmax.f32 %v2438_v53, %v2645_v21 }
 0x1ac   : > { %v2751_v59 = vmax.f32 %v2439_v0, %v2550_v42  ;;  %v7751_v54 = vrot.slane %v1693_v60, %v7315_v19  ;;  %v2753_v8 = vmax.f32 %v7646_v14, %v2549_v3  ;;  %v2960_v41 = vrot.slane %v2749_v50, %v8479_v61 }
 0x1ad   : > { %v2648_v48 = vrot.slane %v2551_v52, 1  ;;  %v2752_v24 = vmax.f32 %v2440_v28, %v2646_v39  ;;  %v2754_v31 = vmax.f32 %v7649_v62, %v2647_v45  ;;  %v2964_v1 = vrot.slane %v2750_v13, %v8479_v61 }
 0x1ae   : > { %v2968_v53 = vrot.slane %v2751_v59, %v8479_v61  ;;  %v1708_v0 = vcombine.high %v7745_v11, %v7745_v11  ;;  %v2755_v43 = vmax.f32 %v7655_v36, %v2551_v52  ;;  %v1502_v28 = vadd.f32 %v7302_v2, %v1437_v29 }
 0x1af   : > { %v2756_v9 = vmax.f32 %v7678_v32, %v2648_v48  ;;  %v2972_v30 = vrot.slane %v2752_v24, %v8479_v61  ;;  %v3164_v14 = vsel %vm3149_vm8, %v2964_v1, %v2960_v41  ;;  %v1709_v62 = vcombine.high %v7751_v54, %v7751_v54 }
 0x1b0   : > { %v2022_v58 = vrot.slane %v7745_v11, %v7190_v6  ;;  %v2026_v56 = vrot.slane %v1708_v0, %v7190_v6  ;;  %v2976_v3 = vrot.slane %v2753_v8, %v8479_v61  ;;  %v3165_v36 = vsel %vm2159_vm2, %v2968_v53, %v3164_v14 }
 0x1b1   : > { %v2030_v32 = vrot.slane %v7751_v54, %v7190_v6  ;;  %v1511_v42 = vadd.f32 %v7302_v2, %v1446_v17  ;;  %v2980_v29 = vrot.slane %v2754_v31, %v8479_v61  ;;  %v3166_v21 = vsel %vm2161_vm3, %v2972_v30, %v3165_v36 }
 0x1b2   : > { %v2034_v50 = vrot.slane %v1709_v62, %v7190_v6  ;;  %v2183_v51 = vsel %vm2159_vm2, %v2026_v56, %v2022_v58  ;;  %v2984_v60 = vrot.slane %v2755_v43, %v8479_v61  ;;  %v3167_v12 = vsel %vm2163_vm4, %v2976_v3, %v3166_v21  ;;  %v8494_v58 = vld [vmem:[#allocation18_spill] sm:$0xff]  ;;  %v8495_v56 = vld [vmem:[#allocation33_spill] sm:$0xff]  ;;  %v1382_v21 = vpop.f32.mrf.mxu1 }
 0x1b3   : > { %v2184_v52 = vsel %vm2161_vm3, %v2030_v32, %v2183_v51  ;;  %v1536_v39 = vsel %vm1526_vm1, -inf, %v1505_v57  ;;  %v2988_v45 = vrot.slane %v2756_v9, %v8479_v61  ;;  %v3168_v17 = vsel %vm2165_vm5, %v2980_v29, %v3167_v12 }
 0x1b4   : > { %v5311_v13 = vrot.slane %v7693_v46, 9  ;;  %v2185_v59 = vsel %vm2163_vm4, %v2034_v50, %v2184_v52  ;;  %v3169_v48 = vsel %vm2167_vm6, %v2984_v60, %v3168_v17  ;;  %v5312_v24 = vrot.slane %v7717_v5, 9 }
 0x1b5   : > { %v2186_v8 = vsel %vm2165_vm5, %v2038_v35, %v2185_v59  ;;  %v7797_v41 = vadd.f32 %v7207_v15, %v1450_v4  ;;  %v3170_v57 = vsel %vm2169_vm7, %v2988_v45, %v3169_v48  ;;  %v8492_v1 = vmax.f32 %v7371_v10, %v7376_v49  ;;  %v8497_v48 = vld [vmem:[#allocation11_spill] sm:$0xff] }
 0x1b6   : > { %v2187_v31 = vsel %vm2167_vm6, %v2042_v47, %v2186_v8  ;;  %v1535_v43 = vsel %vm1526_vm1, -inf, %v1502_v28  ;;  %3216 = vst [vmem:[#allocation2 + $0x21] sm:$0xff] %v3170_v57  ;;  %v8493_v4 = vmax.f32 %v7342_v55, %v7347_v44  ;;  %v1538_v47 = vsel %vm1526_vm1, -inf, %v1511_v42 }
 0x1b7   : > { %v1568_v53 = vmax.f32 %v8492_v1, %v1536_v39  ;;  %v2188_v35 = vsel %vm2169_vm7, %v2046_v22, %v2187_v31  ;;  %v7819_v30 = vadd.f32 %v7211_v34, %v1451_v18  ;;  %v5305_v10 = vrot.slane %v7745_v11, 9 }
 0x1b8   : > { %v1567_v9 = vmax.f32 %v8493_v4, %v1535_v43  ;;  %2224 = vst [vmem:[#allocation4 + $0x10] sm:$0xfe] %v2188_v35  ;;  %v5306_v49 = vrot.slane %v1708_v0, 9  ;;  %v7825_v14 = vmax.f32 %v1554_v23, %v1538_v47  ;;  %v7835_v3 = vadd.f32 %v8495_v56, %v8494_v58 }
 0x1b9   : > { %v1744_v28 = vcombine.high %v1568_v53, %v1568_v53  ;;  %v1751_v22 = vrot.slane %v1568_v53, %v7315_v19  ;;  %v1556_v18 = vmax.f32 %v7797_v41, %v7819_v30  ;;  %v7840_v36 = vmax.f32 %v7673_v26, %v5309_v25 }
 0x1ba   : > { %v1727_v55 = vcombine.high %v1567_v9, %v1567_v9  ;;  %v7829_v44 = vrot.slane %v1567_v9, %v7315_v19  ;;  %v5307_v38 = vrot.slane %v7751_v54, 9  ;;  %v5308_v63 = vrot.slane %v1709_v62, 9 }
 0x1bb   : > { %v2450_v23 = vmax.f32 %v7697_v16, %v5310_v27  ;;  %v7847_v32 = vmax.f32 %v7693_v46, %v5311_v13  ;;  %v2452_v26 = vmax.f32 %v7717_v5, %v5312_v24  ;;  %v2445_v25 = vmax.f32 %v7745_v11, %v5305_v10  ;;  %v1255_v16 = vpop.f32.mrf.mxu0 }
 0x1bc   : > { %v7850_v42 = vrot.slane %v1727_v55, %v7315_v19  ;;  %v7854_v29 = vcombine.high %v7829_v44, %v7829_v44  ;;  %v2446_v50 = vmax.f32 %v1708_v0, %v5306_v49  ;;  %v7859_v51 = vrot.slane %v1744_v28, %v7315_v19  ;;  %v8496_v0 = vld [vmem:[#allocation24_spill] sm:$0xff] }
 0x1bd   : > { %v1759_v27 = vcombine.high %v1751_v22, %v1751_v22  ;;  %v2050_v60 = vrot.slane %v7829_v44, %v7190_v6  ;;  %v2447_v5 = vmax.f32 %v7751_v54, %v5307_v38  ;;  %v2448_v52 = vmax.f32 %v1709_v62, %v5308_v63 }
 0x1be   : > { %v7863_v46 = vcombine.high %v7850_v42, %v7850_v42  ;;  %v2054_v12 = vrot.slane %v7854_v29, %v7190_v6  ;;  %v2058_v11 = vrot.slane %v7850_v42, %v7190_v6  ;;  %v1443_v39 = vadd.f32 %v1382_v21, %v8496_v0 }
 0x1bf   : > { %v2488_v45 = vld [vmem:[#allocation4 + $0x10] sm:$0xff]  ;;  %v2066_v17 = vrot.slane %v1751_v22, %v7190_v6  ;;  %v7878_v24 = vadd.f32 %v1255_v16, %v8497_v48  ;;  %v5317_v62 = vrot.slane %v1751_v22, 9  ;;  %v1760_v31 = vcombine.high %v7859_v51, %v7859_v51 }
 0x1c0   : > { %v2062_v13 = vrot.slane %v7863_v46, %v7190_v6  ;;  %v2189_v59 = vsel %vm2159_vm2, %v2054_v12, %v2050_v60  ;;  %v2552_v8 = vcombine.high %v2488_v45, %v2488_v45  ;;  %v2559_v54 = vrot.slane %v2488_v45, %v7315_v19 }
 0x1c1   : > { %v2190_v57 = vsel %vm2161_vm3, %v2058_v11, %v2189_v59  ;;  %v2070_v1 = vrot.slane %v1759_v27, %v7190_v6  ;;  %v5313_v43 = vrot.slane %v7829_v44, 9  ;;  %v2074_v10 = vrot.slane %v7859_v51, %v7190_v6 }
 0x1c2   : > { %v2191_v53 = vsel %vm2163_vm4, %v2062_v13, %v2190_v57  ;;  %v2566_v35 = vrot.slane %v2552_v8, %v7315_v19  ;;  %v2567_v4 = vcombine.high %v2559_v54, %v2559_v54  ;;  %v2649_v9 = vrot.slane %v2559_v54, 1 }
 0x1c3   : > { %v2757_v47 = vmax.f32 %v2445_v25, %v2559_v54  ;;  %v5318_v49 = vrot.slane %v1759_v27, 9  ;;  %v5319_v28 = vrot.slane %v7859_v51, 9  ;;  %v2192_v55 = vsel %vm2165_vm5, %v2066_v17, %v2191_v53 }
 0x1c4   : > { %v2568_v58 = vcombine.high %v2566_v35, %v2566_v35  ;;  %v2650_v56 = vrot.slane %v2567_v4, 1  ;;  %v2651_v38 = vrot.slane %v2566_v35, 1  ;;  %v2758_v63 = vmax.f32 %v2446_v50, %v2649_v9 }
 0x1c5   : > { %v2759_v21 = vmax.f32 %v2447_v5, %v2567_v4  ;;  %v5320_v16 = vrot.slane %v1760_v31, 9  ;;  %v7892_v60 = vmax.f32 %v1751_v22, %v5317_v62  ;;  %v2193_v12 = vsel %vm2167_vm6, %v2070_v1, %v2192_v55 }
 0x1c6   : > { %v2652_v11 = vrot.slane %v2568_v58, 1  ;;  %v2760_v25 = vmax.f32 %v2448_v52, %v2650_v56  ;;  %v2761_v0 = vmax.f32 %v7840_v36, %v2566_v35  ;;  %v2992_v45 = vrot.slane %v2757_v47, %v8479_v61 }
 0x1c7   : > { %v2762_v13 = vmax.f32 %v2450_v23, %v2651_v38  ;;  %v2996_v59 = vrot.slane %v2758_v63, %v8479_v61  ;;  %v3000_v17 = vrot.slane %v2759_v21, %v8479_v61  ;;  %v2194_v48 = vsel %vm2169_vm7, %v2074_v10, %v2193_v12  ;;  %v8498_v21 = vld [vmem:[#allocation14_spill] sm:$0xff] }
 0x1c8   : > { %v2763_v50 = vmax.f32 %v7847_v32, %v2568_v58  ;;  %v3004_v22 = vrot.slane %v2760_v25, %v8479_v61  ;;  %v7902_v5 = vmax.f32 %v1759_v27, %v5318_v49  ;;  %2225 = vst [vmem:[#allocation4 + $0x8] sm:$0xfe] %v2194_v48  ;;  %v1778_v52 = vcombine.high %v7825_v14, %v7825_v14 }
 0x1c9   : > { %v2764_v36 = vmax.f32 %v2452_v26, %v2652_v11  ;;  %v3171_v8 = vsel %vm3149_vm8, %v2996_v59, %v2992_v45  ;;  %v5314_v23 = vrot.slane %v7854_v29, 9  ;;  %v5315_v54 = vrot.slane %v7850_v42, 9 }
 0x1ca   : > { %v3008_v62 = vrot.slane %v2761_v0, %v8479_v61  ;;  %v3172_v57 = vsel %vm2159_vm2, %v3000_v17, %v3171_v8  ;;  %v5316_v32 = vrot.slane %v7863_v46, 9  ;;  %v1508_v27 = vadd.f32 %v7302_v2, %v1443_v39  ;;  %v5816_v39 = vpop.f32.mrf.mxu1 }
 0x1cb   : > { %v3012_v1 = vrot.slane %v2762_v13, %v8479_v61  ;;  %v3173_v53 = vsel %vm2161_vm3, %v3004_v22, %v3172_v57  ;;  %v7916_v26 = vmax.f32 %v7859_v51, %v5319_v28  ;;  %v2460_v35 = vmax.f32 %v1760_v31, %v5320_v16  ;;  %v8499_v16 = vld [vmem:[#allocation15_spill] sm:$0xff] }
 0x1cc   : > { %v3016_v4 = vrot.slane %v2763_v50, %v8479_v61  ;;  %v3174_v9 = vsel %vm2163_vm4, %v3008_v62, %v3173_v53  ;;  %v7922_v47 = vrot.slane %v7825_v14, %v7315_v19  ;;  %v7925_v10 = vrot.slane %v1778_v52, %v7315_v19 }
 0x1cd   : > { %v3020_v49 = vrot.slane %v2764_v36, %v8479_v61  ;;  %v3175_v55 = vsel %vm2165_vm5, %v3012_v1, %v3174_v9  ;;  %v2453_v51 = vmax.f32 %v7829_v44, %v5313_v43  ;;  %v2454_v31 = vmax.f32 %v7854_v29, %v5314_v23  ;;  %v8501_v29 = vld [vmem:[#allocation25_spill] sm:$0xff] }
 0x1ce   : > { %v3176_v28 = vsel %vm2167_vm6, %v3016_v4, %v3175_v55  ;;  %v2455_v58 = vmax.f32 %v7850_v42, %v5315_v54  ;;  %v2456_v56 = vmax.f32 %v7863_v46, %v5316_v32  ;;  %v1537_v14 = vsel %vm1526_vm1, -inf, %v1508_v27 }
 0x1cf   : > { %v7937_v38 = vsel %vm2169_vm7, %v3020_v49, %v3176_v28  ;;  %v2489_v63 = vld [vmem:[#allocation4 + $0x8] sm:$0xff]  ;;  %v8500_v12 = vmax.f32 %v8498_v21, %v8499_v16  ;;  %v7944_v44 = vadd.f32 %v7207_v15, %v7878_v24  ;;  %v1452_v43 = vadd.f32 %v5816_v39, %v8501_v29 }
 0x1d0   : > { %3217 = vst [vmem:[#allocation2 + $0x31] sm:$0xff] %v7937_v38  ;;  %v2569_v42 = vcombine.high %v2489_v63, %v2489_v63  ;;  %v2576_v46 = vrot.slane %v2489_v63, %v7315_v19  ;;  %v7951_v25 = vcombine.high %v7922_v47, %v7922_v47  ;;  %v7955_v0 = vcombine.high %v7925_v10, %v7925_v10 }
 0x1d1   : > { %v1569_v11 = vmax.f32 %v8500_v12, %v1537_v14  ;;  %v2094_v45 = vrot.slane %v7922_v47, %v7190_v6  ;;  %v2102_v24 = vrot.slane %v7925_v10, %v7190_v6  ;;  %v5325_v52 = vrot.slane %v7922_v47, 9 }
 0x1d2   : > { %v2583_v17 = vrot.slane %v2569_v42, %v7315_v19  ;;  %v2584_v48 = vcombine.high %v2576_v46, %v2576_v46  ;;  %v2653_v50 = vrot.slane %v2576_v46, 1  ;;  %v2765_v22 = vmax.f32 %v2453_v51, %v2576_v46  ;;  %v1257_v51 = vpop.f32.mrf.mxu0  ;;  %v8502_v46 = vld [vmem:[#allocation12_spill] sm:$0xff] }
 0x1d3   : > { %v1761_v13 = vcombine.high %v1569_v11, %v1569_v11  ;;  %v7962_v59 = vrot.slane %v1569_v11, %v7315_v19  ;;  %v5327_v36 = vrot.slane %v7925_v10, 9  ;;  %v2098_v1 = vrot.slane %v7951_v25, %v7190_v6 }
 0x1d4   : > { %v2585_v54 = vcombine.high %v2583_v17, %v2583_v17  ;;  %v2654_v62 = vrot.slane %v2584_v48, 1  ;;  %v2655_v57 = vrot.slane %v2583_v17, 1  ;;  %v2766_v32 = vmax.f32 %v2454_v31, %v2653_v50 }
 0x1d5   : > { %v7968_v8 = vrot.slane %v1761_v13, %v7315_v19  ;;  %v7972_v23 = vcombine.high %v7962_v59, %v7962_v59  ;;  %v2767_v27 = vmax.f32 %v2455_v58, %v2584_v48  ;;  %v2078_v4 = vrot.slane %v7962_v59, %v7190_v6 }
 0x1d6   : > { %v2656_v9 = vrot.slane %v2585_v54, 1  ;;  %v2768_v39 = vmax.f32 %v2456_v56, %v2654_v62  ;;  %v2769_v49 = vmax.f32 %v7892_v60, %v2583_v17  ;;  %v3024_v55 = vrot.slane %v2765_v22, %v8479_v61  ;;  %v1392_v60 = vpop.f32.mrf.mxu1  ;;  %v8503_v22 = vld [vmem:[#allocation26_spill] sm:$0xff] }
 0x1d7   : > { %v7978_v53 = vcombine.high %v7968_v8, %v7968_v8  ;;  %v2770_v31 = vmax.f32 %v7902_v5, %v2655_v57  ;;  %v3028_v28 = vrot.slane %v2766_v32, %v8479_v61  ;;  %v3032_v58 = vrot.slane %v2767_v27, %v8479_v61 }
 0x1d8   : > { %v2082_v14 = vrot.slane %v7972_v23, %v7190_v6  ;;  %v2771_v63 = vmax.f32 %v7916_v26, %v2585_v54  ;;  %v2772_v21 = vmax.f32 %v2460_v35, %v2656_v9  ;;  %v3036_v16 = vrot.slane %v2768_v39, %v8479_v61 }
 0x1d9   : > { %v1517_v56 = vadd.f32 %v7302_v2, %v1452_v43  ;;  %v3178_v12 = vsel %vm3149_vm8, %v3028_v28, %v3024_v55  ;;  %v2086_v5 = vrot.slane %v7968_v8, %v7190_v6  ;;  %v2090_v11 = vrot.slane %v7978_v53, %v7190_v6  ;;  %v1261_v43 = vpop.f32.mrf.mxu0  ;;  %v5819_v55 = vpop.f32.mrf.mxu1 }
 0x1da   : > { %v2195_v29 = vsel %vm2159_vm2, %v2082_v14, %v2078_v4  ;;  %v3040_v42 = vrot.slane %v2769_v49, %v8479_v61  ;;  %v3179_v26 = vsel %vm2159_vm2, %v3032_v58, %v3178_v12  ;;  %v5326_v35 = vrot.slane %v7951_v25, 9 }
 0x1db   : > { %v1454_v13 = vadd.f32 %v1257_v51, %v8502_v46  ;;  %v3044_v17 = vrot.slane %v2770_v31, %v8479_v61  ;;  %v3180_v48 = vsel %vm2161_vm3, %v3036_v16, %v3179_v26  ;;  %v2196_v50 = vsel %vm2161_vm3, %v2086_v5, %v2195_v29  ;;  %v1263_v14 = vpop.f32.mrf.mxu0  ;;  %v1402_v12 = vpop.f32.mrf.mxu1 }
 0x1dc   : > { %v1449_v54 = vadd.f32 %v1392_v60, %v8503_v22  ;;  %v3048_v62 = vrot.slane %v2771_v63, %v8479_v61  ;;  %v3181_v57 = vsel %vm2163_vm4, %v3040_v42, %v3180_v48  ;;  %v5328_v32 = vrot.slane %v7955_v0, 9  ;;  %v3254_v63 = vld [vmem:[#allocation2 + $0x1] sm:$0xff] }
 0x1dd   : > { %v2197_v27 = vsel %vm2163_vm4, %v2090_v11, %v2196_v50  ;;  %v3052_v4 = vrot.slane %v2772_v21, %v8479_v61  ;;  %v3182_v9 = vsel %vm2165_vm5, %v3044_v17, %v3181_v57  ;;  %v1540_v49 = vsel %vm1526_vm1, -inf, %v1517_v56  ;;  %v8504_v56 = vld [vmem:[#allocation13_spill] sm:$0xff]  ;;  %v8505_v17 = vld [vmem:[#allocation27_spill] sm:$0xff]  ;;  %v8506_v50 = vld [vmem:[#allocation28_spill] sm:$0xff] }
 0x1de   : > { %v2198_v39 = vsel %vm2165_vm5, %v2094_v45, %v2197_v27  ;;  %v3183_v51 = vsel %vm2167_vm6, %v3048_v62, %v3182_v9  ;;  %v1572_v28 = vmax.f32 %v1556_v18, %v1540_v49  ;;  %v8021_v58 = vadd.f32 %v7211_v34, %v1454_v13 }
 0x1df   : > { %v2199_v31 = vsel %vm2167_vm6, %v2098_v1, %v2198_v39  ;;  %v8024_v21 = vsel %vm2169_vm7, %v3052_v4, %v3183_v51  ;;  %v8027_v45 = vmax.f32 %v7922_v47, %v5325_v52  ;;  %v1514_v16 = vadd.f32 %v7302_v2, %v1449_v54 }
 0x1e0   : > { %v2200_v1 = vsel %vm2169_vm7, %v2102_v24, %v2199_v31  ;;  %3218 = vst [vmem:[#allocation2 + $0x41] sm:$0xff] %v8024_v21  ;;  %v5321_v41 = vrot.slane %v7962_v59, 9  ;;  %v5322_v30 = vrot.slane %v7972_v23, 9  ;;  %v1557_v18 = vmax.f32 %v7944_v44, %v8021_v58 }
 0x1e1   : > { %2226 = vst [vmem:[#allocation4 + $0x20] sm:$0xfe] %v2200_v1  ;;  %v1456_v47 = vadd.f32 %v1261_v43, %v8504_v56  ;;  %v5323_v52 = vrot.slane %v7968_v8, 9  ;;  %v1539_v60 = vsel %vm1526_vm1, -inf, %v1514_v16  ;;  %v1457_v24 = vadd.f32 %v1263_v14, %v7835_v3 }
 0x1e2   : > { %v3262_v5 = vmax.f32 %v3254_v63, 0.0  ;;  %v8047_v11 = vmax.f32 %v7925_v10, %v5327_v36  ;;  %v5324_v29 = vrot.slane %v7978_v53, 9  ;;  %v1812_v42 = vcombine.high %v1572_v28, %v1572_v28 }
 0x1e3   : > { %v8051_v26 = vrot.slane %v1572_v28, %v7315_v19  ;;  %v2466_v46 = vmax.f32 %v7951_v25, %v5326_v35  ;;  %v2468_v13 = vmax.f32 %v7955_v0, %v5328_v32  ;;  %v1571_v3 = vmax.f32 %v1555_v7, %v1539_v60 }
 0x1e4   : > { %v8059_v43 = vadd.f32 %v7211_v34, %v1457_v24  ;;  %5852 = vmatprep.mubr.f32.mxu1 %v3262_v5  ;;  %v2461_v10 = vmax.f32 %v7962_v59, %v5321_v41  ;;  %v8063_v36 = vadd.f32 %v7207_v15, %v1456_v47  ;;  %v1458_v48 = vadd.f32 %v5819_v55, %v8505_v17 }
 0x1e5   : > { %v1455_v22 = vadd.f32 %v1402_v12, %v8506_v50  ;;  %v2462_v25 = vmax.f32 %v7972_v23, %v5322_v30  ;;  %v2463_v0 = vmax.f32 %v7968_v8, %v5323_v52  ;;  %v1795_v35 = vcombine.high %v1571_v3, %v1571_v3 }
 0x1e6   : > { %v8070_v40 = vrot.slane %v1571_v3, %v7315_v19  ;;  %v2464_v34 = vmax.f32 %v7978_v53, %v5324_v29  ;;  %v8074_v33 = vrot.slane %v1812_v42, %v7315_v19  ;;  %v8078_v15 = vcombine.high %v8051_v26, %v8051_v26 }
 0x1e7   : > { %v1558_v7 = vmax.f32 %v8063_v36, %v8059_v43  ;;  %v2122_v8 = vrot.slane %v8051_v26, %v7190_v6  ;;  %v5333_v23 = vrot.slane %v8051_v26, 9  ;;  %v8086_v54 = vrot.slane %v1795_v35, %v7315_v19  ;;  %v3255_v35 = vld [vmem:[#allocation2 + $0x11] sm:$0xff] }
 0x1e8   : > { %v2490_v59 = vld [vmem:[#allocation4 + $0x20] sm:$0xff]  ;;  %v8090_v53 = vcombine.high %v8070_v40, %v8070_v40  ;;  %v1523_v32 = vadd.f32 %v7302_v2, %v1458_v48  ;;  %v1520_v27 = vadd.f32 %v7302_v2, %v1455_v22  ;;  %v2106_v9 = vrot.slane %v8070_v40, %v7190_v6 }
 0x1e9   : > { %v2586_v62 = vcombine.high %v2490_v59, %v2490_v59  ;;  %v2593_v57 = vrot.slane %v2490_v59, %v7315_v19  ;;  %v8097_v4 = vcombine.high %v8086_v54, %v8086_v54  ;;  %v2114_v49 = vrot.slane %v8086_v54, %v7190_v6 }
 0x1ea   : > { %v2110_v39 = vrot.slane %v8090_v53, %v7190_v6  ;;  %v8108_v2 = vcombine.high %v8074_v33, %v8074_v33  ;;  %v2126_v14 = vrot.slane %v8078_v15, %v7190_v6  ;;  %v2130_v60 = vrot.slane %v8074_v33, %v7190_v6 }
 0x1eb   : > { %v2600_v55 = vrot.slane %v2586_v62, %v7315_v19  ;;  %v2601_v51 = vcombine.high %v2593_v57, %v2593_v57  ;;  %v2657_v31 = vrot.slane %v2593_v57, 1  ;;  %v2773_v28 = vmax.f32 %v2461_v10, %v2593_v57 }
 0x1ec   : > { %v2118_v63 = vrot.slane %v8097_v4, %v7190_v6  ;;  %v2201_v1 = vsel %vm2159_vm2, %v2110_v39, %v2106_v9  ;;  %v5334_v17 = vrot.slane %v8078_v15, 9  ;;  %v5335_v48 = vrot.slane %v8074_v33, 9 }
 0x1ed   : > { %v2602_v16 = vcombine.high %v2600_v55, %v2600_v55  ;;  %v2658_v41 = vrot.slane %v2601_v51, 1  ;;  %v2659_v30 = vrot.slane %v2600_v55, 1  ;;  %v2774_v56 = vmax.f32 %v2462_v25, %v2657_v31 }
 0x1ee   : > { %v2775_v47 = vmax.f32 %v2463_v0, %v2601_v51  ;;  %v2777_v52 = vmax.f32 %v8027_v45, %v2600_v55  ;;  %v2202_v24 = vsel %vm2161_vm3, %v2114_v49, %v2201_v1  ;;  %v3056_v42 = vrot.slane %v2773_v28, %v8479_v61  ;;  %v3222_v0 = vld [vmem:[#allocation2] sm:$0xff]  ;;  %v3223_v49 = vld [vmem:[#allocation2 + $0x10] sm:$0xff] }
 0x1ef   : > { %v2660_v12 = vrot.slane %v2602_v16, 1  ;;  %v2776_v5 = vmax.f32 %v2464_v34, %v2658_v41  ;;  %v2778_v29 = vmax.f32 %v2466_v46, %v2659_v30  ;;  %v2779_v3 = vmax.f32 %v8047_v11, %v2602_v16  ;;  %v3224_v55 = vld [vmem:[#allocation2 + $0x20] sm:$0xff]  ;;  %v3528_v41 = vld [vmem:[#allocation5 + $0x170] sm:$0xff] }
 0x1f0   : > { %v3060_v43 = vrot.slane %v2774_v56, %v8479_v61  ;;  %v3064_v10 = vrot.slane %v2775_v47, %v8479_v61  ;;  %v2203_v36 = vsel %vm2163_vm4, %v2118_v63, %v2202_v24  ;;  %v5336_v50 = vrot.slane %v8108_v2, 9  ;;  %v3527_v24 = vld [vmem:[#allocation5 + $0x168] sm:$0xff] }
 0x1f1   : > { %v3068_v45 = vrot.slane %v2776_v5, %v8479_v61  ;;  %v2780_v22 = vmax.f32 %v2468_v13, %v2660_v12  ;;  %v2204_v25 = vsel %vm2165_vm5, %v2122_v8, %v2203_v36  ;;  %v1542_v11 = vsel %vm1526_vm1, -inf, %v1523_v32  ;;  %v3256_v32 = vld [vmem:[#allocation2 + $0x21] sm:$0xff] }
 0x1f2   : > { %v3185_v46 = vsel %vm3149_vm8, %v3060_v43, %v3056_v42  ;;  %v3072_v34 = vrot.slane %v2777_v52, %v8479_v61  ;;  %v3076_v59 = vrot.slane %v2778_v29, %v8479_v61  ;;  %v2205_v57 = vsel %vm2167_vm6, %v2126_v14, %v2204_v25 }
 0x1f3   : > { %v3186_v62 = vsel %vm2159_vm2, %v3064_v10, %v3185_v46  ;;  %v3080_v9 = vrot.slane %v2779_v3, %v8479_v61  ;;  %v2206_v39 = vsel %vm2169_vm7, %v2130_v60, %v2205_v57  ;;  %v8139_v8 = vmax.f32 %v1558_v7, %v1542_v11  ;;  %v3525_v10 = vld [vmem:[#allocation5 + $0x158] sm:$0xff]  ;;  %v3524_v46 = vld [vmem:[#allocation5 + $0x150] sm:$0xff] }
 0x1f4   : > { %v3187_v13 = vsel %vm2161_vm3, %v3068_v45, %v3186_v62  ;;  %2227 = vst [vmem:[#allocation4 + $0x28] sm:$0xfe] %v2206_v39  ;;  %v1541_v31 = vsel %vm1526_vm1, -inf, %v1520_v27  ;;  %v3230_v28 = vmax.f32 %v3222_v0, 0.0  ;;  %v3263_v63 = vmax.f32 %v3255_v35, 0.0  ;;  %v3523_v62 = vld [vmem:[#allocation5 + $0x148] sm:$0xff] }
 0x1f5   : > { %v3188_v51 = vsel %vm2163_vm4, %v3072_v34, %v3187_v13  ;;  %v3084_v14 = vrot.slane %v2780_v22, %v8479_v61  ;;  %v5329_v16 = vrot.slane %v8070_v40, 9  ;;  %v1573_v7 = vmax.f32 %v1557_v18, %v1541_v31 }
 0x1f6   : > { %v3189_v1 = vsel %vm2165_vm5, %v3076_v59, %v3188_v51  ;;  %5896 = vmatprep.mubr.f32.mxu0 %v3230_v28  ;;  %5853 = vmatmul.mubr.f32.vlgmr.msra.gmra.mxu1 %v3263_v63  ;;  %v3231_v56 = vmax.f32 %v3223_v49, 0.0  ;;  %v3264_v37 = vmax.f32 %v3256_v32, 0.0  ;;  %v3232_v27 = vmax.f32 %v3224_v55, 0.0  ;;  %v3522_v51 = vld [vmem:[#allocation5 + $0x140] sm:$0xff] }
 0x1f7   : > { %v3190_v30 = vsel %vm2167_vm6, %v3080_v9, %v3189_v1  ;;  %v5330_v52 = vrot.slane %v8090_v53, 9  ;;  %v5331_v60 = vrot.slane %v8086_v54, 9  ;;  %5909 = vmatpush3.msra.mxu1 %v7665_v20  ;;  %v8161_v44 = vmax.f32 %v8051_v26, %v5333_v23  ;;  %v3526_v26 = vld [vmem:[#allocation5 + $0x160] sm:$0xff] }
 0x1f8   : > { %v8152_v47 = vsel %vm2169_vm7, %v3084_v14, %v3190_v30  ;;  %v1829_v58 = vcombine.high %v1573_v7, %v1573_v7  ;;  %v8164_v18 = vrot.slane %v1573_v7, %v7315_v19  ;;  %5897 = vmatmul.mubr.f32.vlgmr.msra.gmra.mxu0 %v3231_v56  ;;  %5910 = vmatprep.subr.mxu1 %v3528_v41  ;;  %v5332_v29 = vrot.slane %v8097_v4, 9  ;;  %v3521_v30 = vld [vmem:[#allocation5 + $0x138] sm:$0xff] }
 0x1f9   : > { %3219 = vst [vmem:[#allocation2 + $0x51] sm:$0xff] %v8152_v47  ;;  %v2474_v12 = vmax.f32 %v8078_v15, %v5334_v17  ;;  %v8168_v5 = vmax.f32 %v8074_v33, %v5335_v48  ;;  %v8171_v20 = vmax.f32 %v8108_v2, %v5336_v50  ;;  %5911 = vmatpush3.msra.mxu1 %v3528_v41 }
 0x1fa   : > { %5855 = vmatprep.mubr.f32.mxu1 %v3264_v37  ;;  %v2469_v23 = vmax.f32 %v8070_v40, %v5329_v16  ;;  %v8176_v42 = vrot.slane %v1829_v58, %v7315_v19  ;;  %v8180_v3 = vcombine.high %v8164_v18, %v8164_v18  ;;  %5912 = vmatprep.subr.mxu1 %v3527_v24  ;;  %v3226_v58 = vld [vmem:[#allocation2 + $0x40] sm:$0xff] }
 0x1fb   : > { %5899 = vmatprep.mubr.f32.mxu0 %v3232_v27  ;;  %v2470_v33 = vmax.f32 %v8090_v53, %v5330_v52  ;;  %v2471_v15 = vmax.f32 %v8086_v54, %v5331_v60  ;;  %v2491_v2 = vld [vmem:[#allocation4 + $0x28] sm:$0xff]  ;;  %v1846_v43 = vcombine.high %v8139_v8, %v8139_v8  ;;  %v8188_v40 = vrot.slane %v8139_v8, %v7315_v19  ;;  %v3225_v27 = vld [vmem:[#allocation2 + $0x30] sm:$0xff] }
 0x1fc   : > { %5913 = vmatpush3.msra.mxu1 %v3527_v24  ;;  %v2603_v36 = vcombine.high %v2491_v2, %v2491_v2  ;;  %v2610_v45 = vrot.slane %v2491_v2, %v7315_v19  ;;  %v8193_v17 = vcombine.high %v8176_v42, %v8176_v42  ;;  %v3265_v54 = vmax.f32 %v7937_v38, 0.0 }
 0x1fd   : > { %5914 = vmatprep.subr.mxu1 %v3526_v26  ;;  %v2472_v53 = vmax.f32 %v8097_v4, %v5332_v29  ;;  %v2134_v48 = vrot.slane %v8164_v18, %v7190_v6  ;;  %v2138_v50 = vrot.slane %v8180_v3, %v7190_v6  ;;  %v2142_v22 = vrot.slane %v8176_v42, %v7190_v6 }
 0x1fe   : > { %5915 = vmatpush3.msra.mxu1 %v3526_v26  ;;  %v2617_v25 = vrot.slane %v2603_v36, %v7315_v19  ;;  %v2618_v11 = vcombine.high %v2610_v45, %v2610_v45  ;;  %v2661_v0 = vrot.slane %v2610_v45, 1  ;;  %v2781_v35 = vmax.f32 %v2469_v23, %v2610_v45 }
 0x1ff   : > { %5916 = vmatprep.subr.mxu1 %v3525_v10  ;;  %5856 = vmatmul.mubr.f32.gmra.mxu1 %v3265_v54  ;;  %v8205_v38 = vrot.slane %v1846_v43, %v7315_v19  ;;  %v8209_v4 = vcombine.high %v8188_v40, %v8188_v40  ;;  %v2146_v34 = vrot.slane %v8193_v17, %v7190_v6  ;;  %v3233_v2 = vmax.f32 %v3225_v27, 0.0  ;;  %v3519_v54 = vld [vmem:[#allocation5 + $0x128] sm:$0xff] }
 0x200   : > { %v2207_v59 = vsel %vm2159_vm2, %v2138_v50, %v2134_v48  ;;  %5917 = vmatpush3.msra.mxu1 %v3525_v10  ;;  %v2619_v57 = vcombine.high %v2617_v25, %v2617_v25  ;;  %v2662_v9 = vrot.slane %v2618_v11, 1  ;;  %v2663_v13 = vrot.slane %v2617_v25, 1 }
 0x201   : > { %v2782_v39 = vmax.f32 %v2470_v33, %v2661_v0  ;;  %5918 = vmatprep.subr.mxu1 %v3524_v46  ;;  %v2783_v8 = vmax.f32 %v2471_v15, %v2618_v11  ;;  %v2785_v49 = vmax.f32 %v8161_v44, %v2617_v25  ;;  %v2150_v32 = vrot.slane %v8188_v40, %v7190_v6 }
 0x202   : > { %v2208_v55 = vsel %vm2161_vm3, %v2142_v22, %v2207_v59  ;;  %5919 = vmatpush3.msra.mxu1 %v3524_v46  ;;  %v2664_v31 = vrot.slane %v2619_v57, 1  ;;  %v2784_v28 = vmax.f32 %v2472_v53, %v2662_v9  ;;  %v2786_v63 = vmax.f32 %v2474_v12, %v2663_v13  ;;  %v3520_v12 = vld [vmem:[#allocation5 + $0x130] sm:$0xff]  ;;  %5900 = vmatmul.mubr.f32.gmra.mxu0 %v3233_v2  ;;  %v3518_v46 = vld [vmem:[#allocation5 + $0x120] sm:$0xff] }
 0x203   : > { %v3088_v14 = vrot.slane %v2781_v35, %v8479_v61  ;;  %5920 = vmatprep.subr.mxu1 %v3523_v62  ;;  %v2787_v1 = vmax.f32 %v8168_v5, %v2619_v57  ;;  %v3092_v16 = vrot.slane %v2782_v39, %v8479_v61  ;;  %v3096_v7 = vrot.slane %v2783_v8, %v8479_v61  ;;  %v3515_v8 = vld [vmem:[#allocation5 + $0x108] sm:$0xff] }
 0x204   : > { %v2209_v41 = vsel %vm2163_vm4, %v2146_v34, %v2208_v55  ;;  %5921 = vmatpush3.msra.mxu1 %v3523_v62  ;;  %v3100_v56 = vrot.slane %v2784_v28, %v8479_v61  ;;  %v2154_v37 = vrot.slane %v8209_v4, %v7190_v6  ;;  %v2788_v52 = vmax.f32 %v8171_v20, %v2664_v31  ;;  %v3227_v20 = vld [vmem:[#allocation2 + $0x50] sm:$0xff] }
 0x205   : > { %5922 = vmatprep.subr.mxu1 %v3522_v51  ;;  %v3192_v60 = vsel %vm3149_vm8, %v3092_v16, %v3088_v14  ;;  %v2158_v24 = vrot.slane %v8205_v38, %v7190_v6  ;;  %v2210_v44 = vsel %vm2165_vm5, %v2150_v32, %v2209_v41  ;;  %v3104_v5 = vrot.slane %v2785_v49, %v8479_v61  ;;  %v3516_v34 = vld [vmem:[#allocation5 + $0x110] sm:$0xff] }
 0x206   : > { %5923 = vmatpush3.msra.mxu1 %v3522_v51  ;;  %v3108_v29 = vrot.slane %v2786_v63, %v8479_v61  ;;  %v3193_v26 = vsel %vm2159_vm2, %v3096_v7, %v3192_v60  ;;  %v2211_v23 = vsel %vm2167_vm6, %v2154_v37, %v2210_v44  ;;  %v3112_v33 = vrot.slane %v2787_v1, %v8479_v61  ;;  %v3514_v1 = vld [vmem:[#allocation5 + $0x100] sm:$0xff] }
 0x207   : > { %5924 = vmatprep.subr.mxu1 %v3521_v30  ;;  %v3194_v15 = vsel %vm2161_vm3, %v3100_v56, %v3193_v26  ;;  %v2212_v6 = vsel %vm2169_vm7, %v2158_v24, %v2211_v23  ;;  %v3266_v10 = vmax.f32 %v8024_v21, 0.0  ;;  %v3234_v36 = vmax.f32 %v3226_v58, 0.0 }
 0x208   : > { %5925 = vmatpush3.msra.mxu1 %v3521_v30  ;;  %v3195_v43 = vsel %vm2163_vm4, %v3104_v5, %v3194_v15  ;;  %2228 = vst [vmem:[#allocation4 + $0x38] sm:$0xfe] %v2212_v6  ;;  %v3267_v45 = vmax.f32 %v8152_v47, 0.0  ;;  %v3116_v53 = vrot.slane %v2788_v52, %v8479_v61  ;;  %v3235_v50 = vmax.f32 %v3227_v20, 0.0  ;;  %v3517_v47 = vld [vmem:[#allocation5 + $0x118] sm:$0xff] }
 0x209   : > { %5926 = vmatprep.subr.mxu1 %v3520_v12  ;;  %v3196_v48 = vsel %vm2165_vm5, %v3108_v29, %v3195_v43  ;;  %5858 = vmatprep.mubr.f32.mxu1 %v3266_v10  ;;  %v1862_v11 = vcombine.high %v8205_v38, %v8205_v38  ;;  %v5337_v0 = vrot.slane %v8164_v18, 9  ;;  %v5338_v35 = vrot.slane %v8180_v3, 9 }
 0x20a   : > { %5927 = vmatpush3.msra.mxu1 %v3520_v12  ;;  %v3197_v22 = vsel %vm2167_vm6, %v3112_v33, %v3196_v48  ;;  %5902 = vmatprep.mubr.f32.mxu0 %v3234_v36  ;;  %v5341_v59 = vrot.slane %v8188_v40, 9  ;;  %v5339_v62 = vrot.slane %v8176_v42, 9  ;;  %v5340_v57 = vrot.slane %v8193_v17, 9 }
 0x20b   : > { %v3198_v25 = vsel %vm2169_vm7, %v3116_v53, %v3197_v22  ;;  %5859 = vmatmul.mubr.f32.gmra.mxu1 %v3267_v45  ;;  %5928 = vmatprep.subr.mxu1 %v3519_v54  ;;  %v5342_v49 = vrot.slane %v8209_v4, 9  ;;  %v5343_v32 = vrot.slane %v8205_v38, 9  ;;  %v5344_v55 = vrot.slane %v1862_v11, 9  ;;  %v3498_v22 = vld [vmem:[#allocation2 + $0x12] sm:$0xff] }
 0x20c   : > { %3220 = vst [vmem:[#allocation2 + $0x61] sm:$0xff] %v3198_v25  ;;  %v3268_v21 = vmax.f32 %v3198_v25, 0.0  ;;  %5929 = vmatpush3.msra.mxu1 %v3519_v54  ;;  %5903 = vmatmul.mubr.f32.gmra.mxu0 %v3235_v50  ;;  %v2477_v51 = vmax.f32 %v8164_v18, %v5337_v0  ;;  %v2478_v31 = vmax.f32 %v8180_v3, %v5338_v35  ;;  %v3497_v54 = vld [vmem:[#allocation2 + $0x2] sm:$0xff]  ;;  %v3506_v25 = vmax.f32 %v3498_v22, 0.0  ;;  %v8284_v22 = vld [vmem:[%s8426_s4] ss:$0 sm:$0xff] }
 0x20d   : > { %5930 = vmatprep.subr.mxu1 %v3518_v46  ;;  %v2481_v16 = vmax.f32 %v8188_v40, %v5341_v59  ;;  %v2479_v7 = vmax.f32 %v8176_v42, %v5339_v62  ;;  %v2480_v41 = vmax.f32 %v8193_v17, %v5340_v57  ;;  %v2483_v3 = vmax.f32 %v8205_v38, %v5343_v32  ;;  %v3502_v59 = vld [vmem:[#allocation2 + $0x52] sm:$0xff] }
 0x20e   : > { %5861 = vmatprep.mubr.f32.mxu1 %v3268_v21  ;;  %5931 = vmatpush3.msra.mxu1 %v3518_v46  ;;  %v2484_v40 = vmax.f32 %v1862_v11, %v5344_v55  ;;  %v3505_v50 = vmax.f32 %v3497_v54, 0.0  ;;  %v3499_v46 = vld [vmem:[#allocation2 + $0x22] sm:$0xff]  ;;  %v3510_v57 = vmax.f32 %v3502_v59, 0.0  ;;  %v3738_v32 = vld [vmem:[#allocation5 + $0x270] sm:$0xff] }
 0x20f   : > { %v2492_v9 = vld [vmem:[#allocation4 + $0x38] sm:$0xff]  ;;  %5932 = vmatprep.subr.mxu1 %v3517_v47  ;;  %v3507_v21 = vmax.f32 %v3499_v46, 0.0  ;;  %v3501_v11 = vld [vmem:[#allocation2 + $0x42] sm:$0xff]  ;;  %v3705_v55 = vld [vmem:[#allocation5 + $0x1f0] sm:$0xff] }
 0x210   : > { %v2620_v13 = vcombine.high %v2492_v9, %v2492_v9  ;;  %v2627_v39 = vrot.slane %v2492_v9, %v7315_v19  ;;  %5933 = vmatpush3.msra.mxu1 %v3517_v47  ;;  %v3500_v47 = vld [vmem:[#allocation2 + $0x32] sm:$0xff] }
 0x211   : > { %5934 = vmatprep.subr.mxu1 %v3516_v34  ;;  %v3508_v35 = vmax.f32 %v3500_v47, 0.0 }
 0x212   : > { %v2634_v28 = vrot.slane %v2620_v13, %v7315_v19  ;;  %v2635_v63 = vcombine.high %v2627_v39, %v2627_v39  ;;  %v2665_v14 = vrot.slane %v2627_v39, 1  ;;  %5935 = vmatpush3.msra.mxu1 %v3516_v34  ;;  %v2789_v30 = vmax.f32 %v2477_v51, %v2627_v39  ;;  %v3737_v51 = vld [vmem:[#allocation5 + $0x268] sm:$0xff] }
 0x213   : > { %v3228_v56 = vld [vmem:[#allocation2 + $0x60] sm:$0xff]  ;;  %5936 = vmatprep.subr.mxu1 %v3515_v8  ;;  %v2482_v19 = vmax.f32 %v8209_v4, %v5342_v49  ;;  %v3509_v34 = vmax.f32 %v3501_v11, 0.0  ;;  %v3706_v49 = vld [vmem:[#allocation5 + $0x1f8] sm:$0xff] }
 0x214   : > { %v2636_v37 = vcombine.high %v2634_v28, %v2634_v28  ;;  %v2666_v18 = vrot.slane %v2635_v63, 1  ;;  %v2667_v27 = vrot.slane %v2634_v28, 1  ;;  %v2790_v52 = vmax.f32 %v2478_v31, %v2665_v14  ;;  %5937 = vmatpush3.msra.mxu1 %v3515_v8  ;;  %v3503_v62 = vld [vmem:[#allocation2 + $0x62] sm:$0xff]  ;;  %v3739_v8 = vld [vmem:[#allocation5 + $0x278] sm:$0xff] }
 0x215   : > { %v2791_v60 = vmax.f32 %v2479_v7, %v2635_v63  ;;  %v3236_v24 = vmax.f32 %v3228_v56, 0.0  ;;  %5938 = vmatprep.subr.mxu1 %v3514_v1  ;;  %v2793_v58 = vmax.f32 %v2481_v16, %v2634_v28  ;;  %v3120_v12 = vrot.slane %v2789_v30, %v8479_v61  ;;  %5952 = vmatprep.subr.mxu0 %v3739_v8  ;;  %v3704_v31 = vld [vmem:[#allocation5 + $0x1e8] sm:$0xff]  ;;  %v3736_v28 = vld [vmem:[#allocation5 + $0x260] sm:$0xff]  ;;  %v3735_v14 = vld [vmem:[#allocation5 + $0x258] sm:$0xff] }
 0x216   : > { %v2668_v44 = vrot.slane %v2636_v37, 1  ;;  %v2792_v42 = vmax.f32 %v2480_v41, %v2666_v18  ;;  %5939 = vmatpush3.msra.mxu1 %v3514_v1  ;;  %v2794_v17 = vmax.f32 %v2482_v19, %v2667_v27  ;;  %v3124_v5 = vrot.slane %v2790_v52, %v8479_v61  ;;  %5953 = vmatpush3.msra.mxu0 %v3739_v8  ;;  %v3703_v63 = vld [vmem:[#allocation5 + $0x1e0] sm:$0xff]  ;;  %v3734_v1 = vld [vmem:[#allocation5 + $0x250] sm:$0xff]  ;;  %v3733_v16 = vld [vmem:[#allocation5 + $0x248] sm:$0xff] }
 0x217   : > { %v3128_v29 = vrot.slane %v2791_v60, %v8479_v61  ;;  %5905 = vmatprep.mubr.f32.mxu0 %v3236_v24  ;;  %v2795_v26 = vmax.f32 %v2483_v3, %v2636_v37  ;;  %v3136_v20 = vrot.slane %v2793_v58, %v8479_v61  ;;  %v3511_v9 = vmax.f32 %v3503_v62, 0.0  ;;  %5996 = vmatprep.subr.mxu1 %v3706_v49  ;;  %v3702_v7 = vld [vmem:[#allocation5 + $0x1d8] sm:$0xff]  ;;  %v3732_v41 = vld [vmem:[#allocation5 + $0x240] sm:$0xff]  ;;  %v3701_v30 = vld [vmem:[#allocation5 + $0x1d0] sm:$0xff] }
 0x218   : > { %v3132_v4 = vrot.slane %v2792_v42, %v8479_v61  ;;  %v2796_v38 = vmax.f32 %v2484_v40, %v2668_v44  ;;  %v3199_v23 = vsel %vm3149_vm8, %v3124_v5, %v3120_v12  ;;  %v3140_v15 = vrot.slane %v2794_v17, %v8479_v61  ;;  %5954 = vmatprep.subr.mxu0 %v3738_v32  ;;  %v3700_v56 = vld [vmem:[#allocation5 + $0x1c8] sm:$0xff]  ;;  %v3731_v37 = vld [vmem:[#allocation5 + $0x238] sm:$0xff]  ;;  %v3699_v18 = vld [vmem:[#allocation5 + $0x1c0] sm:$0xff] }
 0x219   : > { %v3200_v33 = vsel %vm2159_vm2, %v3128_v29, %v3199_v23  ;;  %v3144_v2 = vrot.slane %v2795_v26, %v8479_v61  ;;  %5955 = vmatpush3.msra.mxu0 %v3738_v32  ;;  %v3730_v27 = vld [vmem:[#allocation5 + $0x230] sm:$0xff]  ;;  %v3729_v52 = vld [vmem:[#allocation5 + $0x228] sm:$0xff]  ;;  %v3698_v19 = vld [vmem:[#allocation5 + $0x1b8] sm:$0xff] }
 0x21a   : > { %v3201_v6 = vsel %vm2161_vm3, %v3132_v4, %v3200_v33  ;;  %v3148_v10 = vrot.slane %v2796_v38, %v8479_v61  ;;  %5956 = vmatprep.subr.mxu0 %v3737_v51  ;;  %v3728_v3 = vld [vmem:[#allocation5 + $0x220] sm:$0xff]  ;;  %v3697_v60 = vld [vmem:[#allocation5 + $0x1b0] sm:$0xff]  ;;  %v3727_v24 = vld [vmem:[#allocation5 + $0x218] sm:$0xff] }
 0x21b   : > { %v3202_v43 = vsel %vm2163_vm4, %v3136_v20, %v3201_v6  ;;  %5957 = vmatpush3.msra.mxu0 %v3737_v51  ;;  %v3696_v40 = vld [vmem:[#allocation5 + $0x1a8] sm:$0xff]  ;;  %v3726_v44 = vld [vmem:[#allocation5 + $0x210] sm:$0xff]  ;;  %v3695_v42 = vld [vmem:[#allocation5 + $0x1a0] sm:$0xff] }
 0x21c   : > { %v3203_v36 = vsel %vm2165_vm5, %v3140_v15, %v3202_v43  ;;  %5958 = vmatprep.subr.mxu0 %v3736_v28  ;;  %v3725_v58 = vld [vmem:[#allocation5 + $0x208] sm:$0xff]  ;;  %v3694_v17 = vld [vmem:[#allocation5 + $0x198] sm:$0xff]  ;;  %v3724_v12 = vld [vmem:[#allocation5 + $0x200] sm:$0xff] }
 0x21d   : > { %v3204_v45 = vsel %vm2167_vm6, %v3144_v2, %v3203_v36  ;;  %5959 = vmatpush3.msra.mxu0 %v3736_v28  ;;  %v3693_v5 = vld [vmem:[#allocation5 + $0x190] sm:$0xff]  ;;  %v8278_v29 = vld [vmem:[#allocation5 + $0x2f8] sm:$0xff]  ;;  %v3692_v26 = vld [vmem:[#allocation5 + $0x188] sm:$0xff] }
 0x21e   : > { %v3205_v53 = vsel %vm2169_vm7, %v3148_v10, %v3204_v45  ;;  %5960 = vmatprep.subr.mxu0 %v3735_v14  ;;  %v3691_v4 = vld [vmem:[#allocation5 + $0x180] sm:$0xff] }
 0x21f   : > { %3221 = vst [vmem:[#allocation2 + $0x71] sm:$0xff] %v3205_v53  ;;  %v3269_v48 = vmax.f32 %v3205_v53, 0.0  ;;  %5961 = vmatpush3.msra.mxu0 %v3735_v14 }
 0x220   : > { %5962 = vmatprep.subr.mxu0 %v3734_v1 }
 0x221   : > { %5862 = vmatmul.mubr.f32.gmra.mxu1 %v3269_v48  ;;  %5963 = vmatpush3.msra.mxu0 %v3734_v1 }
 0x222   : > { %5940 = vmatprep.mubr.f32.mxu1 %v3505_v50  ;;  %5964 = vmatprep.subr.mxu0 %v3733_v16 }
 0x223   : > { %5965 = vmatpush3.msra.mxu0 %v3733_v16 }
 0x224   : > { %5966 = vmatprep.subr.mxu0 %v3732_v41 }
 0x225   : > { %5941 = vmatmul.mubr.f32.vlgmr.msra.gmra.mxu1 %v3506_v25  ;;  %5967 = vmatpush3.msra.mxu0 %v3732_v41 }
 0x226   : > { %v3229_v61 = vld [vmem:[#allocation2 + $0x70] sm:$0xff]  ;;  %5943 = vmatprep.mubr.f32.mxu1 %v3507_v21  ;;  %5997 = vmatpush3.msra.mxu1 %v3706_v49 }
 0x227   : > { %v3237_v0 = vmax.f32 %v3229_v61, 0.0  ;;  %v3504_v13 = vld [vmem:[#allocation2 + $0x72] sm:$0xff]  ;;  %5998 = vmatprep.subr.mxu1 %v3705_v55  ;;  %5968 = vmatprep.subr.mxu0 %v3731_v37 }
 0x228   : > { %v3512_v39 = vmax.f32 %v3504_v13, 0.0  ;;  %5999 = vmatpush3.msra.mxu1 %v3705_v55  ;;  %5969 = vmatpush3.msra.mxu0 %v3731_v37 }
 0x229   : > { %5906 = vmatmul.mubr.f32.gmra.mxu0 %v3237_v0  ;;  %5944 = vmatmul.mubr.f32.gmra.mxu1 %v3508_v35 }
 0x22a   : > { %5946 = vmatprep.mubr.f32.mxu1 %v3509_v34  ;;  %6000 = vmatprep.subr.mxu1 %v3704_v31 }
 0x22b   : > { %6001 = vmatpush3.msra.mxu1 %v3704_v31  ;;  %5970 = vmatprep.subr.mxu0 %v3730_v27 }
 0x22c   : > { %6002 = vmatprep.subr.mxu1 %v3703_v63  ;;  %5971 = vmatpush3.msra.mxu0 %v3730_v27 }
 0x22d   : > { %5947 = vmatmul.mubr.f32.gmra.mxu1 %v3510_v57  ;;  %5972 = vmatprep.subr.mxu0 %v3729_v52 }
 0x22e   : > { %5949 = vmatprep.mubr.f32.mxu1 %v3511_v9  ;;  %6003 = vmatpush3.msra.mxu1 %v3703_v63  ;;  %v3981_v63 = vld [vmem:[#allocation5 + $0x2f0] sm:$0xff] }
 0x22f   : > { %6004 = vmatprep.subr.mxu1 %v3702_v7  ;;  %5973 = vmatpush3.msra.mxu0 %v3729_v52 }
 0x230   : > { %6005 = vmatpush3.msra.mxu1 %v3702_v7  ;;  %5974 = vmatprep.subr.mxu0 %v3728_v3 }
 0x231   : > { %5950 = vmatmul.mubr.f32.gmra.mxu1 %v3512_v39  ;;  %6006 = vmatprep.subr.mxu1 %v3701_v30 }
 0x232   : > { %6007 = vmatpush3.msra.mxu1 %v3701_v30  ;;  %5975 = vmatpush3.msra.mxu0 %v3728_v3 }
 0x233   : > { %6008 = vmatprep.subr.mxu1 %v3700_v56  ;;  %5976 = vmatprep.subr.mxu0 %v3727_v24 }
 0x234   : > { %6009 = vmatpush3.msra.mxu1 %v3700_v56  ;;  %5977 = vmatpush3.msra.mxu0 %v3727_v24  ;;  %v3980_v56 = vld [vmem:[#allocation5 + $0x2e8] sm:$0xff] }
 0x235   : > { %6010 = vmatprep.subr.mxu1 %v3699_v18  ;;  %5978 = vmatprep.subr.mxu0 %v3726_v44 }
 0x236   : > { %6011 = vmatpush3.msra.mxu1 %v3699_v18  ;;  %5979 = vmatpush3.msra.mxu0 %v3726_v44 }
 0x237   : > { %6012 = vmatprep.subr.mxu1 %v3698_v19  ;;  %5980 = vmatprep.subr.mxu0 %v3725_v58 }
 0x238   : > { %6013 = vmatpush3.msra.mxu1 %v3698_v19  ;;  %5981 = vmatpush3.msra.mxu0 %v3725_v58 }
 0x239   : > { %6014 = vmatprep.subr.mxu1 %v3697_v60  ;;  %5982 = vmatprep.subr.mxu0 %v3724_v12 }
 0x23a   : > { %6015 = vmatpush3.msra.mxu1 %v3697_v60  ;;  %5983 = vmatpush3.msra.mxu0 %v3724_v12  ;;  %v3979_v60 = vld [vmem:[#allocation5 + $0x2e0] sm:$0xff] }
 0x23b   : > { %6016 = vmatprep.subr.mxu1 %v3696_v40  ;;  %6040 = vmatprep.subr.mxu0 %v8278_v29 }
 0x23c   : > { %6017 = vmatpush3.msra.mxu1 %v3696_v40 }
 0x23d   : > { %6018 = vmatprep.subr.mxu1 %v3695_v42 }
 0x23e   : > { %6019 = vmatpush3.msra.mxu1 %v3695_v42 }
 0x23f   : > { %6020 = vmatprep.subr.mxu1 %v3694_v17 }
 0x240   : > { %6021 = vmatpush3.msra.mxu1 %v3694_v17 }
 0x241   : > { %6022 = vmatprep.subr.mxu1 %v3693_v5 }
 0x242   : > { %6023 = vmatpush3.msra.mxu1 %v3693_v5  ;;  %v3978_v5 = vld [vmem:[#allocation5 + $0x2d8] sm:$0xff] }
 0x243   : > { %6024 = vmatprep.subr.mxu1 %v3692_v26 }
 0x244   : > { %6025 = vmatpush3.msra.mxu1 %v3692_v26 }
 0x245   : > { %6026 = vmatprep.subr.mxu1 %v3691_v4 }
 0x246   : > { %6027 = vmatpush3.msra.mxu1 %v3691_v4 }
 0x2b6   : > { %v5854_v38 = vpop.f32.mrf.mxu1 }
 0x2b8   : > { %v3353_v23 = vpop.f32.mrf.mxu1  ;;  %v5898_v15 = vpop.f32.mrf.mxu0 }
 0x2b9   : > { %v3464_v53 = vadd.f32 %v5898_v15, %v5854_v38 }
 0x2ba   : > { %v3458_v2 = vpop.f32.mrf.mxu0 }
 0x2bb   : > { %v3459_v46 = vadd.f32 %v3458_v2, %v3353_v23  ;;  %v3977_v23 = vld [vmem:[#allocation5 + $0x2d0] sm:$0xff] }
 0x2bf   : > { %v5857_v20 = vpop.f32.mrf.mxu1 }
 0x2c1   : > { %v3363_v33 = vpop.f32.mrf.mxu1 }
 0x2c2   : > { %v5901_v43 = vpop.f32.mrf.mxu0 }
 0x2c3   : > { %v3474_v47 = vadd.f32 %v5901_v43, %v5857_v20 }
 0x2c4   : > { %v3468_v45 = vpop.f32.mrf.mxu0 }
 0x2c5   : > { %v3469_v34 = vadd.f32 %v3468_v45, %v3363_v33 }
 0x2cb   : > { %v5860_v6 = vpop.f32.mrf.mxu1 }
 0x2cc   : > { %v5904_v48 = vpop.f32.mrf.mxu0 }
 0x2cd   : > { %v3373_v10 = vpop.f32.mrf.mxu1  ;;  %v3484_v13 = vadd.f32 %v5904_v48, %v5860_v6  ;;  %v3976_v6 = vld [vmem:[#allocation5 + $0x2c8] sm:$0xff] }
 0x2ce   : > { %v3478_v0 = vpop.f32.mrf.mxu0 }
 0x2cf   : > { %v3479_v51 = vadd.f32 %v3478_v0, %v3373_v10  ;;  %v3970_v0 = vld [vmem:[#allocation5 + $0x298] sm:$0xff] }
 0x2e1   : > { %v5863_v36 = vpop.f32.mrf.mxu1 }
 0x2e3   : > { %v3383_v54 = vpop.f32.mrf.mxu1 }
 0x2e5   : > { %v5942_v50 = vpop.f32.mrf.mxu1 }
 0x2e6   : > { %v3636_v25 = vadd.f32 %v5942_v50, %v3464_v53 }
 0x2e7   : > { %v3596_v21 = vpop.f32.mrf.mxu1 }
 0x2e8   : > { %v3651_v11 = vadd.f32 %v8284_v22, %v3636_v25  ;;  %v3635_v61 = vadd.f32 %v3596_v21, %v3459_v46  ;;  %v3973_v21 = vld [vmem:[#allocation5 + $0x2b0] sm:$0xff] }
 0x2e9   : > { %v5945_v35 = vpop.f32.mrf.mxu1  ;;  %v5907_v57 = vpop.f32.mrf.mxu0 }
 0x2ea   : > { %3659 = vst [vmem:[#allocation3 + $0x11] sm:$0xff] %v3651_v11  ;;  %v3650_v59 = vadd.f32 %v8284_v22, %v3635_v61  ;;  %v3638_v62 = vadd.f32 %v5945_v35, %v3474_v47  ;;  %v3716_v55 = vmax.f32 %v3651_v11, 0.0  ;;  %v3494_v16 = vadd.f32 %v5907_v57, %v5863_v36  ;;  %v3972_v11 = vld [vmem:[#allocation5 + $0x2a8] sm:$0xff]  ;;  %v3971_v61 = vld [vmem:[#allocation5 + $0x2a0] sm:$0xff]  ;;  %v3969_v35 = vld [vmem:[#allocation5 + $0x290] sm:$0xff] }
 0x2eb   : > { %v3606_v9 = vpop.f32.mrf.mxu1  ;;  %v3488_v14 = vpop.f32.mrf.mxu0 }
 0x2ec   : > { %3658 = vst [vmem:[#allocation3 + $0x1] sm:$0xff] %v3650_v59  ;;  %v3653_v39 = vadd.f32 %v8284_v22, %v3638_v62  ;;  %v3637_v8 = vadd.f32 %v3606_v9, %v3469_v34  ;;  %v3715_v49 = vmax.f32 %v3650_v59, 0.0  ;;  %v3489_v27 = vadd.f32 %v3488_v14, %v3383_v54  ;;  %v3975_v54 = vld [vmem:[#allocation5 + $0x2c0] sm:$0xff]  ;;  %v3968_v34 = vld [vmem:[#allocation5 + $0x288] sm:$0xff] }
 0x2ed   : > { %v5948_v32 = vpop.f32.mrf.mxu1  ;;  %v3967_v59 = vld [vmem:[#allocation5 + $0x280] sm:$0xff] }
 0x2ee   : > { %3661 = vst [vmem:[#allocation3 + $0x31] sm:$0xff] %v3653_v39  ;;  %v3652_v31 = vadd.f32 %v8284_v22, %v3637_v8  ;;  %v3640_v28 = vadd.f32 %v5948_v32, %v3484_v13  ;;  %5984 = vmatprep.mubr.f32.mxu0 %v3715_v49  ;;  %v3718_v18 = vmax.f32 %v3653_v39, 0.0 }
 0x2ef   : > { %v3616_v1 = vpop.f32.mrf.mxu1  ;;  %5985 = vmatmul.mubr.f32.vlgmr.msra.gmra.mxu0 %v3716_v55 }
 0x2f0   : > { %3660 = vst [vmem:[#allocation3 + $0x21] sm:$0xff] %v3652_v31  ;;  %v3655_v7 = vadd.f32 %v8284_v22, %v3640_v28  ;;  %v3639_v41 = vadd.f32 %v3616_v1, %v3479_v51  ;;  %6041 = vmatpush3.msra.mxu0 %v8278_v29  ;;  %v3717_v30 = vmax.f32 %v3652_v31, 0.0  ;;  %v4193_v1 = vld [vmem:[#allocation5 + $0x3f8] sm:$0xff] }
 0x2f1   : > { %v5951_v37 = vpop.f32.mrf.mxu1  ;;  %6042 = vmatprep.subr.mxu0 %v3981_v63  ;;  %v3675_v3 = vld [vmem:[#allocation3 + $0x10] sm:$0xff]  ;;  %6084 = vmatprep.subr.mxu1 %v4193_v1 }
 0x2f2   : > { %3663 = vst [vmem:[#allocation3 + $0x51] sm:$0xff] %v3655_v7  ;;  %v3654_v52 = vadd.f32 %v8284_v22, %v3639_v41  ;;  %v3642_v19 = vadd.f32 %v5951_v37, %v3494_v16  ;;  %6043 = vmatpush3.msra.mxu0 %v3981_v63  ;;  %5987 = vmatprep.mubr.f32.mxu0 %v3717_v30  ;;  %v3683_v12 = vmax.f32 %v3675_v3, 0.0  ;;  %v3720_v4 = vmax.f32 %v3655_v7, 0.0  ;;  %v3951_v62 = vld [vmem:[#allocation3 + $0x12] sm:$0xff]  ;;  %v4191_v30 = vld [vmem:[#allocation5 + $0x3e8] sm:$0xff]  ;;  %v4190_v37 = vld [vmem:[#allocation5 + $0x3e0] sm:$0xff] }
 0x2f3   : > { %v3626_v24 = vpop.f32.mrf.mxu1  ;;  %v3674_v40 = vld [vmem:[#allocation3] sm:$0xff]  ;;  %6044 = vmatprep.subr.mxu0 %v3980_v56  ;;  %5988 = vmatmul.mubr.f32.gmra.mxu0 %v3718_v18  ;;  %v3959_v9 = vmax.f32 %v3951_v62, 0.0  ;;  %v4160_v16 = vld [vmem:[#allocation5 + $0x378] sm:$0xff]  ;;  %v4192_v7 = vld [vmem:[#allocation5 + $0x3f0] sm:$0xff] }
 0x2f4   : > { %3662 = vst [vmem:[#allocation3 + $0x41] sm:$0xff] %v3654_v52  ;;  %v3657_v44 = vadd.f32 %v8284_v22, %v3642_v19  ;;  %v3641_v42 = vadd.f32 %v3626_v24, %v3489_v27  ;;  %v3682_v58 = vmax.f32 %v3674_v40, 0.0  ;;  %6045 = vmatpush3.msra.mxu0 %v3980_v56  ;;  %v3719_v17 = vmax.f32 %v3654_v52, 0.0  ;;  %v3950_v36 = vld [vmem:[#allocation3 + $0x2] sm:$0xff]  ;;  %v4159_v41 = vld [vmem:[#allocation5 + $0x370] sm:$0xff]  ;;  %v4189_v27 = vld [vmem:[#allocation5 + $0x3d8] sm:$0xff] }
 0x2f5   : > { %6046 = vmatprep.subr.mxu0 %v3979_v60  ;;  %v3677_v26 = vld [vmem:[#allocation3 + $0x30] sm:$0xff]  ;;  %v3958_v50 = vmax.f32 %v3950_v36, 0.0  ;;  %v4158_v56 = vld [vmem:[#allocation5 + $0x368] sm:$0xff]  ;;  %v4157_v18 = vld [vmem:[#allocation5 + $0x360] sm:$0xff] }
 0x2f6   : > { %3665 = vst [vmem:[#allocation3 + $0x71] sm:$0xff] %v3657_v44  ;;  %v3656_v29 = vadd.f32 %v8284_v22, %v3641_v42  ;;  %6028 = vmatprep.mubr.f32.mxu1 %v3682_v58  ;;  %6047 = vmatpush3.msra.mxu0 %v3979_v60  ;;  %v3685_v15 = vmax.f32 %v3677_v26, 0.0  ;;  %v3722_v10 = vmax.f32 %v3657_v44, 0.0  ;;  %v3974_v22 = vld [vmem:[#allocation5 + $0x2b8] sm:$0xff]  ;;  %v4188_v19 = vld [vmem:[#allocation5 + $0x3d0] sm:$0xff]  ;;  %v4187_v60 = vld [vmem:[#allocation5 + $0x3c8] sm:$0xff] }
 0x2f7   : > { %6029 = vmatmul.mubr.f32.vlgmr.msra.gmra.mxu1 %v3683_v12  ;;  %v3676_v38 = vld [vmem:[#allocation3 + $0x20] sm:$0xff]  ;;  %5990 = vmatprep.mubr.f32.mxu0 %v3719_v17  ;;  %v3953_v39 = vld [vmem:[#allocation3 + $0x32] sm:$0xff]  ;;  %v4154_v44 = vld [vmem:[#allocation5 + $0x348] sm:$0xff] }
 0x2f8   : > { %3664 = vst [vmem:[#allocation3 + $0x61] sm:$0xff] %v3656_v29  ;;  %v3684_v20 = vmax.f32 %v3676_v38, 0.0  ;;  %6048 = vmatprep.subr.mxu0 %v3978_v5  ;;  %5991 = vmatmul.mubr.f32.gmra.mxu0 %v3720_v4  ;;  %v3721_v33 = vmax.f32 %v3656_v29, 0.0  ;;  %v3952_v57 = vld [vmem:[#allocation3 + $0x22] sm:$0xff]  ;;  %v3961_v49 = vmax.f32 %v3953_v39, 0.0  ;;  %v4156_v52 = vld [vmem:[#allocation5 + $0x358] sm:$0xff] }
 0x2f9   : > { %6049 = vmatpush3.msra.mxu0 %v3978_v5  ;;  %v3679_v2 = vld [vmem:[#allocation3 + $0x50] sm:$0xff]  ;;  %v3960_v13 = vmax.f32 %v3952_v57, 0.0  ;;  %6085 = vmatpush3.msra.mxu1 %v4193_v1  ;;  %v4186_v24 = vld [vmem:[#allocation5 + $0x3c0] sm:$0xff]  ;;  %v4185_v40 = vld [vmem:[#allocation5 + $0x3b8] sm:$0xff] }
 0x2fa   : > { %6031 = vmatprep.mubr.f32.mxu1 %v3684_v20  ;;  %6050 = vmatprep.subr.mxu0 %v3977_v23  ;;  %v3687_v53 = vmax.f32 %v3679_v2, 0.0  ;;  %v3955_v55 = vld [vmem:[#allocation3 + $0x52] sm:$0xff]  ;;  %v4153_v58 = vld [vmem:[#allocation5 + $0x340] sm:$0xff]  ;;  %v4183_v17 = vld [vmem:[#allocation5 + $0x3a8] sm:$0xff] }
 0x2fb   : > { %6032 = vmatmul.mubr.f32.gmra.mxu1 %v3685_v15  ;;  %v3678_v43 = vld [vmem:[#allocation3 + $0x40] sm:$0xff]  ;;  %6051 = vmatpush3.msra.mxu0 %v3977_v23  ;;  %v3963_v31 = vmax.f32 %v3955_v55, 0.0  ;;  %v4155_v3 = vld [vmem:[#allocation5 + $0x350] sm:$0xff]  ;;  %v4152_v12 = vld [vmem:[#allocation5 + $0x338] sm:$0xff] }
 0x2fc   : > { %v3686_v45 = vmax.f32 %v3678_v43, 0.0  ;;  %5993 = vmatprep.mubr.f32.mxu0 %v3721_v33  ;;  %6052 = vmatprep.subr.mxu0 %v3976_v6  ;;  %v3954_v8 = vld [vmem:[#allocation3 + $0x42] sm:$0xff]  ;;  %v4184_v42 = vld [vmem:[#allocation5 + $0x3b0] sm:$0xff]  ;;  %v4181_v26 = vld [vmem:[#allocation5 + $0x398] sm:$0xff] }
 0x2fd   : > { %5994 = vmatmul.mubr.f32.gmra.mxu0 %v3722_v10  ;;  %v3681_v48 = vld [vmem:[#allocation3 + $0x70] sm:$0xff]  ;;  %v3962_v32 = vmax.f32 %v3954_v8, 0.0  ;;  %6086 = vmatprep.subr.mxu1 %v4192_v7  ;;  %v4182_v5 = vld [vmem:[#allocation5 + $0x3a0] sm:$0xff]  ;;  %v4150_v4 = vld [vmem:[#allocation5 + $0x328] sm:$0xff] }
 0x2fe   : > { %6034 = vmatprep.mubr.f32.mxu1 %v3686_v45  ;;  %6053 = vmatpush3.msra.mxu0 %v3976_v6  ;;  %v3689_v47 = vmax.f32 %v3681_v48, 0.0  ;;  %v3957_v63 = vld [vmem:[#allocation3 + $0x72] sm:$0xff]  ;;  %v4149_v23 = vld [vmem:[#allocation5 + $0x320] sm:$0xff]  ;;  %v4179_v20 = vld [vmem:[#allocation5 + $0x388] sm:$0xff] }
 0x2ff   : > { %6035 = vmatmul.mubr.f32.gmra.mxu1 %v3687_v53  ;;  %v3680_v46 = vld [vmem:[#allocation3 + $0x60] sm:$0xff]  ;;  %6054 = vmatprep.subr.mxu0 %v3975_v54  ;;  %v3965_v14 = vmax.f32 %v3957_v63, 0.0  ;;  %v4151_v29 = vld [vmem:[#allocation5 + $0x330] sm:$0xff]  ;;  %v4148_v33 = vld [vmem:[#allocation5 + $0x318] sm:$0xff] }
 0x300   : > { %v3688_v25 = vmax.f32 %v3680_v46, 0.0  ;;  %6072 = vmatprep.mubr.f32.mxu0 %v3958_v50  ;;  %6055 = vmatpush3.msra.mxu0 %v3975_v54  ;;  %v3956_v51 = vld [vmem:[#allocation3 + $0x62] sm:$0xff]  ;;  %v4180_v38 = vld [vmem:[#allocation5 + $0x390] sm:$0xff]  ;;  %v8295_v43 = vld [vmem:[#allocation5 + $0x478] sm:$0xff] }
 0x301   : > { %6056 = vmatprep.subr.mxu0 %v3974_v22  ;;  %v3964_v28 = vmax.f32 %v3956_v51, 0.0  ;;  %6087 = vmatpush3.msra.mxu1 %v4192_v7  ;;  %v4178_v15 = vld [vmem:[#allocation5 + $0x380] sm:$0xff]  ;;  %v4147_v6 = vld [vmem:[#allocation5 + $0x310] sm:$0xff]  ;;  %v4146_v2 = vld [vmem:[#allocation5 + $0x308] sm:$0xff] }
 0x302   : > { %6037 = vmatprep.mubr.f32.mxu1 %v3688_v25  ;;  %6057 = vmatpush3.msra.mxu0 %v3974_v22  ;;  %v4145_v10 = vld [vmem:[#allocation5 + $0x300] sm:$0xff]  ;;  %v6426_v51 = vld [vmem:[#allocation2 + $0x11] sm:$0xff] }
 0x303   : > { %6038 = vmatmul.mubr.f32.gmra.mxu1 %v3689_v47  ;;  %6058 = vmatprep.subr.mxu0 %v3973_v21 }
 0x304   : > { %6059 = vmatpush3.msra.mxu0 %v3973_v21  ;;  %6088 = vmatprep.subr.mxu1 %v4191_v30 }
 0x305   : > { %6060 = vmatprep.subr.mxu0 %v3972_v11  ;;  %6089 = vmatpush3.msra.mxu1 %v4191_v30 }
 0x306   : > { %6061 = vmatpush3.msra.mxu0 %v3972_v11  ;;  %6090 = vmatprep.subr.mxu1 %v4190_v37 }
 0x307   : > { %6062 = vmatprep.subr.mxu0 %v3971_v61  ;;  %6091 = vmatpush3.msra.mxu1 %v4190_v37  ;;  %v3669_v37 = vld [vmem:[#allocation2 + $0x31] sm:$0xff] }
 0x308   : > { %6063 = vmatpush3.msra.mxu0 %v3971_v61  ;;  %6092 = vmatprep.subr.mxu1 %v4189_v27 }
 0x309   : > { %6064 = vmatprep.subr.mxu0 %v3970_v0  ;;  %6093 = vmatpush3.msra.mxu1 %v4189_v27 }
 0x30a   : > { %6065 = vmatpush3.msra.mxu0 %v3970_v0  ;;  %6094 = vmatprep.subr.mxu1 %v4188_v19 }
 0x30b   : > { %6066 = vmatprep.subr.mxu0 %v3969_v35  ;;  %6095 = vmatpush3.msra.mxu1 %v4188_v19 }
 0x30c   : > { %6067 = vmatpush3.msra.mxu0 %v3969_v35  ;;  %6096 = vmatprep.subr.mxu1 %v4187_v60 }
 0x30d   : > { %6068 = vmatprep.subr.mxu0 %v3968_v34  ;;  %6097 = vmatpush3.msra.mxu1 %v4187_v60 }
 0x30e   : > { %6069 = vmatpush3.msra.mxu0 %v3968_v34  ;;  %6098 = vmatprep.subr.mxu1 %v4186_v24  ;;  %v8301_v34 = vld [vmem:[%s8426_s4 + $0x1] ss:$0 sm:$0xff] }
 0x30f   : > { %6070 = vmatprep.subr.mxu0 %v3967_v59  ;;  %6099 = vmatpush3.msra.mxu1 %v4186_v24 }
 0x310   : > { %6071 = vmatpush3.msra.mxu0 %v3967_v59  ;;  %6100 = vmatprep.subr.mxu1 %v4185_v40 }
 0x311   : > { %6073 = vmatmul.mubr.f32.vlgmr.msra.gmra.mxu0 %v3959_v9  ;;  %6128 = vmatprep.subr.mxu0 %v4160_v16 }
 0x312   : > { %6075 = vmatprep.mubr.f32.mxu0 %v3960_v13  ;;  %6129 = vmatpush3.msra.mxu0 %v4160_v16  ;;  %v6427_v16 = vld [vmem:[#allocation2 + $0x1] sm:$0xff] }
 0x313   : > { %6130 = vmatprep.subr.mxu0 %v4159_v41  ;;  %6101 = vmatpush3.msra.mxu1 %v4185_v40 }
 0x314   : > { %6131 = vmatpush3.msra.mxu0 %v4159_v41  ;;  %6102 = vmatprep.subr.mxu1 %v4184_v42 }
 0x315   : > { %6076 = vmatmul.mubr.f32.gmra.mxu0 %v3961_v49  ;;  %6132 = vmatprep.subr.mxu0 %v4158_v56 }
 0x316   : > { %6078 = vmatprep.mubr.f32.mxu0 %v3962_v32  ;;  %6133 = vmatpush3.msra.mxu0 %v4158_v56 }
 0x317   : > { %6134 = vmatprep.subr.mxu0 %v4157_v18  ;;  %6103 = vmatpush3.msra.mxu1 %v4184_v42  ;;  %v6428_v42 = vld [vmem:[#allocation2 + $0x21] sm:$0xff] }
 0x318   : > { %6135 = vmatpush3.msra.mxu0 %v4157_v18  ;;  %6104 = vmatprep.subr.mxu1 %v4183_v17 }
 0x319   : > { %6079 = vmatmul.mubr.f32.gmra.mxu0 %v3963_v31  ;;  %6136 = vmatprep.subr.mxu0 %v4156_v52 }
 0x31a   : > { %6081 = vmatprep.mubr.f32.mxu0 %v3964_v28  ;;  %6137 = vmatpush3.msra.mxu0 %v4156_v52 }
 0x31b   : > { %6138 = vmatprep.subr.mxu0 %v4155_v3  ;;  %6105 = vmatpush3.msra.mxu1 %v4183_v17 }
 0x31c   : > { %6139 = vmatpush3.msra.mxu0 %v4155_v3  ;;  %6106 = vmatprep.subr.mxu1 %v4182_v5 }
 0x31d   : > { %6082 = vmatmul.mubr.f32.gmra.mxu0 %v3965_v14  ;;  %6140 = vmatprep.subr.mxu0 %v4154_v44 }
 0x31e   : > { %6141 = vmatpush3.msra.mxu0 %v4154_v44  ;;  %6107 = vmatpush3.msra.mxu1 %v4182_v5  ;;  %v4435_v5 = vld [vmem:[#allocation5 + $0x470] sm:$0xff] }
 0x31f   : > { %6142 = vmatprep.subr.mxu0 %v4153_v58  ;;  %6108 = vmatprep.subr.mxu1 %v4181_v26 }
 0x320   : > { %6143 = vmatpush3.msra.mxu0 %v4153_v58  ;;  %6109 = vmatpush3.msra.mxu1 %v4181_v26  ;;  %v3671_v26 = vld [vmem:[#allocation2 + $0x51] sm:$0xff] }
 0x321   : > { %6144 = vmatprep.subr.mxu0 %v4152_v12  ;;  %6110 = vmatprep.subr.mxu1 %v4180_v38 }
 0x322   : > { %6145 = vmatpush3.msra.mxu0 %v4152_v12  ;;  %6111 = vmatpush3.msra.mxu1 %v4180_v38 }
 0x323   : > { %6146 = vmatprep.subr.mxu0 %v4151_v29  ;;  %6112 = vmatprep.subr.mxu1 %v4179_v20 }
 0x324   : > { %6147 = vmatpush3.msra.mxu0 %v4151_v29  ;;  %6113 = vmatpush3.msra.mxu1 %v4179_v20 }
 0x325   : > { %6148 = vmatprep.subr.mxu0 %v4150_v4  ;;  %6114 = vmatprep.subr.mxu1 %v4178_v15 }
 0x326   : > { %6149 = vmatpush3.msra.mxu0 %v4150_v4  ;;  %6115 = vmatpush3.msra.mxu1 %v4178_v15  ;;  %v4434_v15 = vld [vmem:[#allocation5 + $0x468] sm:$0xff] }
 0x327   : > { %6150 = vmatprep.subr.mxu0 %v4149_v23  ;;  %6172 = vmatprep.subr.mxu1 %v8295_v43 }
 0x328   : > { %6151 = vmatpush3.msra.mxu0 %v4149_v23 }
 0x329   : > { %6152 = vmatprep.subr.mxu0 %v4148_v33 }
 0x32a   : > { %6153 = vmatpush3.msra.mxu0 %v4148_v33 }
 0x32b   : > { %6154 = vmatprep.subr.mxu0 %v4147_v6 }
 0x32c   : > { %6155 = vmatpush3.msra.mxu0 %v4147_v6  ;;  %v3670_v6 = vld [vmem:[#allocation2 + $0x41] sm:$0xff] }
 0x32d   : > { %6156 = vmatprep.subr.mxu0 %v4146_v2 }
 0x32e   : > { %6157 = vmatpush3.msra.mxu0 %v4146_v2 }
 0x32f   : > { %6158 = vmatprep.subr.mxu0 %v4145_v10 }
 0x330   : > { %6159 = vmatpush3.msra.mxu0 %v4145_v10 }
 0x3af   : > { %v5986_v36 = vpop.f32.mrf.mxu0 }
 0x3b1   : > { %v3806_v45 = vpop.f32.mrf.mxu0 }
 0x3b3   : > { %v5989_v54 = vpop.f32.mrf.mxu0 }
 0x3b5   : > { %v3816_v48 = vpop.f32.mrf.mxu0 }
 0x3b7   : > { %v6030_v53 = vpop.f32.mrf.mxu1 }
 0x3b8   : > { %v5992_v22 = vpop.f32.mrf.mxu0  ;;  %v3917_v0 = vadd.f32 %v6030_v53, %v5986_v36 }
 0x3b9   : > { %v3911_v50 = vpop.f32.mrf.mxu1 }
 0x3ba   : > { %v3826_v25 = vpop.f32.mrf.mxu0  ;;  %v3912_v59 = vadd.f32 %v3911_v50, %v3806_v45 }
 0x3bb   : > { %v6033_v46 = vpop.f32.mrf.mxu1 }
 0x3bc   : > { %v3927_v13 = vadd.f32 %v6033_v46, %v5989_v54 }
 0x3bd   : > { %v3921_v21 = vpop.f32.mrf.mxu1  ;;  %v5995_v47 = vpop.f32.mrf.mxu0 }
 0x3be   : > { %v3922_v32 = vadd.f32 %v3921_v21, %v3816_v48  ;;  %v4433_v48 = vld [vmem:[#allocation5 + $0x460] sm:$0xff] }
 0x3bf   : > { %v6036_v11 = vpop.f32.mrf.mxu1  ;;  %v3836_v61 = vpop.f32.mrf.mxu0 }
 0x3c0   : > { %v3937_v1 = vadd.f32 %v6036_v11, %v5992_v22 }
 0x3c1   : > { %v3931_v62 = vpop.f32.mrf.mxu1 }
 0x3c2   : > { %v3932_v56 = vadd.f32 %v3931_v62, %v3826_v25 }
 0x3c3   : > { %v6039_v55 = vpop.f32.mrf.mxu1 }
 0x3c4   : > { %v3947_v44 = vadd.f32 %v6039_v55, %v5995_v47  ;;  %v3672_v47 = vld [vmem:[#allocation2 + $0x61] sm:$0xff] }
 0x3c5   : > { %v3941_v27 = vpop.f32.mrf.mxu1 }
 0x3c6   : > { %v3942_v29 = vadd.f32 %v3941_v27, %v3836_v61  ;;  %v4432_v61 = vld [vmem:[#allocation5 + $0x458] sm:$0xff]  ;;  %v4423_v27 = vld [vmem:[#allocation5 + $0x410] sm:$0xff] }
 0x3d1   : > { %v6074_v35 = vpop.f32.mrf.mxu0 }
 0x3d2   : > { %v4089_v57 = vadd.f32 %v6074_v35, %v3917_v0 }
 0x3d3   : > { %v4049_v9 = vpop.f32.mrf.mxu0 }
 0x3d4   : > { %v4105_v39 = vadd.f32 %v8301_v34, %v4089_v57  ;;  %v4088_v8 = vadd.f32 %v4049_v9, %v3912_v59 }
 0x3d5   : > { %v6077_v49 = vpop.f32.mrf.mxu0 }
 0x3d6   : > { %v4113_v31 = vadd.f32 %v6426_v51, %v4105_v39  ;;  %v4104_v28 = vadd.f32 %v8301_v34, %v4088_v8  ;;  %v4091_v63 = vadd.f32 %v6077_v49, %v3927_v13  ;;  %v4430_v39 = vld [vmem:[#allocation5 + $0x448] sm:$0xff] }
 0x3d7   : > { %v4059_v14 = vpop.f32.mrf.mxu0 }
 0x3d8   : > { %4121 = vst [vmem:[#allocation2 + $0x11] sm:$0xff] %v4113_v31  ;;  %v4112_v7 = vadd.f32 %v6427_v16, %v4104_v28  ;;  %v4107_v41 = vadd.f32 %v8301_v34, %v4091_v63  ;;  %v4090_v30 = vadd.f32 %v4059_v14, %v3922_v32  ;;  %v4170_v40 = vmax.f32 %v4113_v31, 0.0  ;;  %v4429_v31 = vld [vmem:[#allocation5 + $0x440] sm:$0xff] }
 0x3d9   : > { %v6080_v18 = vpop.f32.mrf.mxu0 }
 0x3da   : > { %4120 = vst [vmem:[#allocation2 + $0x1] sm:$0xff] %v4112_v7  ;;  %v8306_v52 = vadd.f32 %v4107_v41, %v3669_v37  ;;  %v4106_v19 = vadd.f32 %v8301_v34, %v4090_v30  ;;  %v4093_v3 = vadd.f32 %v6080_v18, %v3937_v1  ;;  %v4169_v60 = vmax.f32 %v4112_v7, 0.0  ;;  %v4428_v1 = vld [vmem:[#allocation5 + $0x438] sm:$0xff]  ;;  %v4427_v41 = vld [vmem:[#allocation5 + $0x430] sm:$0xff]  ;;  %v4425_v37 = vld [vmem:[#allocation5 + $0x420] sm:$0xff] }
 0x3db   : > { %v4069_v24 = vpop.f32.mrf.mxu0  ;;  %v4424_v18 = vld [vmem:[#allocation5 + $0x418] sm:$0xff] }
 0x3dc   : > { %4123 = vst [vmem:[#allocation2 + $0x31] sm:$0xff] %v8306_v52  ;;  %v8310_v58 = vadd.f32 %v6428_v42, %v4106_v19  ;;  %v4109_v17 = vadd.f32 %v8301_v34, %v4093_v3  ;;  %v4092_v12 = vadd.f32 %v4069_v24, %v3932_v56  ;;  %6116 = vmatprep.mubr.f32.mxu1 %v4169_v60  ;;  %v4172_v10 = vmax.f32 %v8306_v52, 0.0  ;;  %v4426_v56 = vld [vmem:[#allocation5 + $0x428] sm:$0xff]  ;;  %v4421_v3 = vld [vmem:[#allocation5 + $0x400] sm:$0xff] }
 0x3dd   : > { %v6083_v4 = vpop.f32.mrf.mxu0  ;;  %6117 = vmatmul.mubr.f32.vlgmr.msra.gmra.mxu1 %v4170_v40  ;;  %v4422_v19 = vld [vmem:[#allocation5 + $0x408] sm:$0xff] }
 0x3de   : > { %4122 = vst [vmem:[#allocation2 + $0x21] sm:$0xff] %v8310_v58  ;;  %v8314_v38 = vadd.f32 %v4109_v17, %v3671_v26  ;;  %v4108_v23 = vadd.f32 %v8301_v34, %v4092_v12  ;;  %v4095_v20 = vadd.f32 %v6083_v4, %v3947_v44  ;;  %6173 = vmatpush3.msra.mxu1 %v8295_v43  ;;  %v4171_v33 = vmax.f32 %v8310_v58, 0.0  ;;  %v3673_v43 = vld [vmem:[#allocation2 + $0x71] sm:$0xff] }
 0x3df   : > { %v4079_v2 = vpop.f32.mrf.mxu0  ;;  %6174 = vmatprep.subr.mxu1 %v4435_v5  ;;  %v4129_v53 = vld [vmem:[#allocation2 + $0x10] sm:$0xff] }
 0x3e0   : > { %4125 = vst [vmem:[#allocation2 + $0x51] sm:$0xff] %v8314_v38  ;;  %v8321_v36 = vadd.f32 %v4108_v23, %v3670_v6  ;;  %v4111_v45 = vadd.f32 %v8301_v34, %v4095_v20  ;;  %v4094_v54 = vadd.f32 %v4079_v2, %v3942_v29  ;;  %6175 = vmatpush3.msra.mxu1 %v4435_v5  ;;  %v4137_v11 = vmax.f32 %v4129_v53, 0.0  ;;  %v4405_v60 = vld [vmem:[#allocation2 + $0x12] sm:$0xff]  ;;  %v4612_v53 = vld [vmem:[#allocation5 + $0x4e8] sm:$0xff] }
 0x3e1   : > { %6119 = vmatprep.mubr.f32.mxu1 %v4171_v33  ;;  %v4128_v50 = vld [vmem:[#allocation2] sm:$0xff]  ;;  %6176 = vmatprep.subr.mxu1 %v4434_v15  ;;  %v4174_v59 = vmax.f32 %v8314_v38, 0.0  ;;  %v4413_v40 = vmax.f32 %v4405_v60, 0.0  ;;  %v4646_v6 = vld [vmem:[#allocation5 + $0x570] sm:$0xff]  ;;  %v4614_v2 = vld [vmem:[#allocation5 + $0x4f8] sm:$0xff] }
 0x3e2   : > { %6120 = vmatmul.mubr.f32.gmra.mxu1 %v4172_v10  ;;  %4124 = vst [vmem:[#allocation2 + $0x41] sm:$0xff] %v8321_v36  ;;  %v8325_v22 = vadd.f32 %v4111_v45, %v3673_v43  ;;  %v4110_v46 = vadd.f32 %v8301_v34, %v4094_v54  ;;  %v4136_v25 = vmax.f32 %v4128_v50, 0.0  ;;  %v4173_v21 = vmax.f32 %v8321_v36, 0.0  ;;  %v4431_v34 = vld [vmem:[#allocation5 + $0x450] sm:$0xff]  ;;  %v4404_v55 = vld [vmem:[#allocation2 + $0x2] sm:$0xff] }
 0x3e3   : > { %6177 = vmatpush3.msra.mxu1 %v4434_v15  ;;  %v4131_v35 = vld [vmem:[#allocation2 + $0x30] sm:$0xff]  ;;  %v4412_v14 = vmax.f32 %v4404_v55, 0.0  ;;  %v4647_v15 = vld [vmem:[#allocation5 + $0x578] sm:$0xff]  ;;  %v4645_v45 = vld [vmem:[#allocation5 + $0x568] sm:$0xff] }
 0x3e4   : > { %6178 = vmatprep.subr.mxu1 %v4433_v48  ;;  %4127 = vst [vmem:[#allocation2 + $0x71] sm:$0xff] %v8325_v22  ;;  %v8330_v0 = vadd.f32 %v4110_v46, %v3672_v47  ;;  %6160 = vmatprep.mubr.f32.mxu0 %v4136_v25  ;;  %v4139_v13 = vmax.f32 %v4131_v35, 0.0  ;;  %v4176_v32 = vmax.f32 %v8325_v22, 0.0  ;;  %v4407_v42 = vld [vmem:[#allocation2 + $0x32] sm:$0xff]  ;;  %v4644_v54 = vld [vmem:[#allocation5 + $0x560] sm:$0xff]  ;;  %v4641_v25 = vld [vmem:[#allocation5 + $0x548] sm:$0xff] }
 0x3e5   : > { %6179 = vmatpush3.msra.mxu1 %v4433_v48  ;;  %6161 = vmatmul.mubr.f32.vlgmr.msra.gmra.mxu0 %v4137_v11  ;;  %v4130_v62 = vld [vmem:[#allocation2 + $0x20] sm:$0xff]  ;;  %v4415_v12 = vmax.f32 %v4407_v42, 0.0  ;;  %v4613_v10 = vld [vmem:[#allocation5 + $0x4f0] sm:$0xff]  ;;  %v4643_v48 = vld [vmem:[#allocation5 + $0x558] sm:$0xff] }
 0x3e6   : > { %6122 = vmatprep.mubr.f32.mxu1 %v4173_v21  ;;  %4126 = vst [vmem:[#allocation2 + $0x61] sm:$0xff] %v8330_v0  ;;  %v4138_v57 = vmax.f32 %v4130_v62, 0.0  ;;  %6180 = vmatprep.subr.mxu1 %v4432_v61  ;;  %v4175_v9 = vmax.f32 %v8330_v0, 0.0  ;;  %v4406_v24 = vld [vmem:[#allocation2 + $0x22] sm:$0xff]  ;;  %v4642_v50 = vld [vmem:[#allocation5 + $0x550] sm:$0xff]  ;;  %v4610_v46 = vld [vmem:[#allocation5 + $0x4d8] sm:$0xff] }
 0x3e7   : > { %6123 = vmatmul.mubr.f32.gmra.mxu1 %v4174_v59  ;;  %v4133_v8 = vld [vmem:[#allocation2 + $0x50] sm:$0xff]  ;;  %v4414_v44 = vmax.f32 %v4406_v24, 0.0  ;;  %6216 = vmatprep.subr.mxu0 %v4647_v15  ;;  %v4611_v43 = vld [vmem:[#allocation5 + $0x4e0] sm:$0xff]  ;;  %v4608_v11 = vld [vmem:[#allocation5 + $0x4c8] sm:$0xff] }
 0x3e8   : > { %6181 = vmatpush3.msra.mxu1 %v4432_v61  ;;  %6163 = vmatprep.mubr.f32.mxu0 %v4138_v57  ;;  %v4141_v28 = vmax.f32 %v4133_v8, 0.0  ;;  %v4409_v29 = vld [vmem:[#allocation2 + $0x52] sm:$0xff]  ;;  %v4640_v47 = vld [vmem:[#allocation5 + $0x540] sm:$0xff]  ;;  %v4637_v62 = vld [vmem:[#allocation5 + $0x528] sm:$0xff] }
 0x3e9   : > { %6182 = vmatprep.subr.mxu1 %v4431_v34  ;;  %6164 = vmatmul.mubr.f32.gmra.mxu0 %v4139_v13  ;;  %v4132_v49 = vld [vmem:[#allocation2 + $0x40] sm:$0xff]  ;;  %v4417_v4 = vmax.f32 %v4409_v29, 0.0  ;;  %v4609_v21 = vld [vmem:[#allocation5 + $0x4d0] sm:$0xff]  ;;  %v4639_v61 = vld [vmem:[#allocation5 + $0x538] sm:$0xff] }
 0x3ea   : > { %6183 = vmatpush3.msra.mxu1 %v4431_v34  ;;  %v4140_v51 = vmax.f32 %v4132_v49, 0.0  ;;  %6125 = vmatprep.mubr.f32.mxu1 %v4175_v9  ;;  %v4408_v17 = vld [vmem:[#allocation2 + $0x42] sm:$0xff]  ;;  %v4638_v35 = vld [vmem:[#allocation5 + $0x530] sm:$0xff]  ;;  %v4606_v34 = vld [vmem:[#allocation5 + $0x4b8] sm:$0xff] }
 0x3eb   : > { %6184 = vmatprep.subr.mxu1 %v4430_v39  ;;  %6126 = vmatmul.mubr.f32.gmra.mxu1 %v4176_v32  ;;  %v4135_v63 = vld [vmem:[#allocation2 + $0x70] sm:$0xff]  ;;  %v4416_v5 = vmax.f32 %v4408_v17, 0.0  ;;  %v4607_v59 = vld [vmem:[#allocation5 + $0x4c0] sm:$0xff]  ;;  %v4635_v13 = vld [vmem:[#allocation5 + $0x518] sm:$0xff] }
 0x3ec   : > { %6166 = vmatprep.mubr.f32.mxu0 %v4140_v51  ;;  %6185 = vmatpush3.msra.mxu1 %v4430_v39  ;;  %v4143_v30 = vmax.f32 %v4135_v63, 0.0  ;;  %v4411_v20 = vld [vmem:[#allocation2 + $0x72] sm:$0xff]  ;;  %v4636_v57 = vld [vmem:[#allocation5 + $0x520] sm:$0xff]  ;;  %v4604_v39 = vld [vmem:[#allocation5 + $0x4a8] sm:$0xff] }
 0x3ed   : > { %6167 = vmatmul.mubr.f32.gmra.mxu0 %v4141_v28  ;;  %v4134_v16 = vld [vmem:[#allocation2 + $0x60] sm:$0xff]  ;;  %6186 = vmatprep.subr.mxu1 %v4429_v31  ;;  %v4419_v33 = vmax.f32 %v4411_v20, 0.0  ;;  %v4605_v9 = vld [vmem:[#allocation5 + $0x4b0] sm:$0xff]  ;;  %v4633_v32 = vld [vmem:[#allocation5 + $0x508] sm:$0xff] }
 0x3ee   : > { %v4142_v7 = vmax.f32 %v4134_v16, 0.0  ;;  %6204 = vmatprep.mubr.f32.mxu1 %v4412_v14  ;;  %6187 = vmatpush3.msra.mxu1 %v4429_v31  ;;  %v4410_v26 = vld [vmem:[#allocation2 + $0x62] sm:$0xff]  ;;  %v4634_v8 = vld [vmem:[#allocation5 + $0x510] sm:$0xff]  ;;  %v4602_v55 = vld [vmem:[#allocation5 + $0x498] sm:$0xff] }
 0x3ef   : > { %6188 = vmatprep.subr.mxu1 %v4428_v1  ;;  %v4418_v23 = vmax.f32 %v4410_v26, 0.0  ;;  %6217 = vmatpush3.msra.mxu0 %v4647_v15  ;;  %v4603_v49 = vld [vmem:[#allocation5 + $0x4a0] sm:$0xff]  ;;  %v4601_v31 = vld [vmem:[#allocation5 + $0x490] sm:$0xff]  ;;  %v4890_v28 = vld [vmem:[#allocation5 + $0x5f8] sm:$0xff] }
 0x3f0   : > { %6169 = vmatprep.mubr.f32.mxu0 %v4142_v7  ;;  %6189 = vmatpush3.msra.mxu1 %v4428_v1  ;;  %v4632_v51 = vld [vmem:[#allocation5 + $0x500] sm:$0xff]  ;;  %v4600_v63 = vld [vmem:[#allocation5 + $0x488] sm:$0xff] }
 0x3f1   : > { %6170 = vmatmul.mubr.f32.gmra.mxu0 %v4143_v30  ;;  %6190 = vmatprep.subr.mxu1 %v4427_v41  ;;  %v4599_v14 = vld [vmem:[#allocation5 + $0x480] sm:$0xff] }
 0x3f2   : > { %6191 = vmatpush3.msra.mxu1 %v4427_v41  ;;  %6218 = vmatprep.subr.mxu0 %v4646_v6  ;;  %v8339_v42 = vld [vmem:[%s8426_s4 + $0x2] ss:$0 sm:$0xff] }
 0x3f3   : > { %6192 = vmatprep.subr.mxu1 %v4426_v56  ;;  %6219 = vmatpush3.msra.mxu0 %v4646_v6 }
 0x3f4   : > { %6193 = vmatpush3.msra.mxu1 %v4426_v56  ;;  %6220 = vmatprep.subr.mxu0 %v4645_v45 }
 0x3f5   : > { %6194 = vmatprep.subr.mxu1 %v4425_v37  ;;  %6221 = vmatpush3.msra.mxu0 %v4645_v45 }
 0x3f6   : > { %6195 = vmatpush3.msra.mxu1 %v4425_v37  ;;  %6222 = vmatprep.subr.mxu0 %v4644_v54 }
 0x3f7   : > { %6196 = vmatprep.subr.mxu1 %v4424_v18  ;;  %6223 = vmatpush3.msra.mxu0 %v4644_v54 }
 0x3f8   : > { %6197 = vmatpush3.msra.mxu1 %v4424_v18  ;;  %6224 = vmatprep.subr.mxu0 %v4643_v48 }
 0x3f9   : > { %6198 = vmatprep.subr.mxu1 %v4423_v27  ;;  %6225 = vmatpush3.msra.mxu0 %v4643_v48 }
 0x3fa   : > { %6199 = vmatpush3.msra.mxu1 %v4423_v27  ;;  %6226 = vmatprep.subr.mxu0 %v4642_v50 }
 0x3fb   : > { %6200 = vmatprep.subr.mxu1 %v4422_v19  ;;  %6227 = vmatpush3.msra.mxu0 %v4642_v50 }
 0x3fc   : > { %6201 = vmatpush3.msra.mxu1 %v4422_v19  ;;  %6228 = vmatprep.subr.mxu0 %v4641_v25 }
 0x3fd   : > { %6202 = vmatprep.subr.mxu1 %v4421_v3  ;;  %6229 = vmatpush3.msra.mxu0 %v4641_v25 }
 0x3fe   : > { %6203 = vmatpush3.msra.mxu1 %v4421_v3  ;;  %6230 = vmatprep.subr.mxu0 %v4640_v47 }
 0x3ff   : > { %6205 = vmatmul.mubr.f32.vlgmr.msra.gmra.mxu1 %v4413_v40  ;;  %6260 = vmatprep.subr.mxu1 %v4614_v2 }
 0x400   : > { %6207 = vmatprep.mubr.f32.mxu1 %v4414_v44  ;;  %6261 = vmatpush3.msra.mxu1 %v4614_v2 }
 0x401   : > { %6262 = vmatprep.subr.mxu1 %v4613_v10  ;;  %6231 = vmatpush3.msra.mxu0 %v4640_v47  ;;  %v4889_v47 = vld [vmem:[#allocation5 + $0x5f0] sm:$0xff] }
 0x402   : > { %6263 = vmatpush3.msra.mxu1 %v4613_v10  ;;  %6232 = vmatprep.subr.mxu0 %v4639_v61 }
 0x403   : > { %6208 = vmatmul.mubr.f32.gmra.mxu1 %v4415_v12  ;;  %6264 = vmatprep.subr.mxu1 %v4612_v53 }
 0x404   : > { %6210 = vmatprep.mubr.f32.mxu1 %v4416_v5  ;;  %6265 = vmatpush3.msra.mxu1 %v4612_v53 }
 0x405   : > { %6266 = vmatprep.subr.mxu1 %v4611_v43  ;;  %6233 = vmatpush3.msra.mxu0 %v4639_v61 }
 0x406   : > { %6267 = vmatpush3.msra.mxu1 %v4611_v43  ;;  %6234 = vmatprep.subr.mxu0 %v4638_v35 }
 0x407   : > { %6211 = vmatmul.mubr.f32.gmra.mxu1 %v4417_v4  ;;  %6268 = vmatprep.subr.mxu1 %v4610_v46 }
 0x408   : > { %6213 = vmatprep.mubr.f32.mxu1 %v4418_v23  ;;  %6269 = vmatpush3.msra.mxu1 %v4610_v46 }
 0x409   : > { %6270 = vmatprep.subr.mxu1 %v4609_v21  ;;  %6235 = vmatpush3.msra.mxu0 %v4638_v35 }
 0x40a   : > { %6271 = vmatpush3.msra.mxu1 %v4609_v21  ;;  %6236 = vmatprep.subr.mxu0 %v4637_v62 }
 0x40b   : > { %6214 = vmatmul.mubr.f32.gmra.mxu1 %v4419_v33  ;;  %6272 = vmatprep.subr.mxu1 %v4608_v11 }
 0x40c   : > { %6273 = vmatpush3.msra.mxu1 %v4608_v11  ;;  %6237 = vmatpush3.msra.mxu0 %v4637_v62 }
 0x40d   : > { %6274 = vmatprep.subr.mxu1 %v4607_v59  ;;  %6238 = vmatprep.subr.mxu0 %v4636_v57 }
 0x40e   : > { %6275 = vmatpush3.msra.mxu1 %v4607_v59  ;;  %6239 = vmatpush3.msra.mxu0 %v4636_v57  ;;  %v4888_v57 = vld [vmem:[#allocation5 + $0x5e8] sm:$0xff] }
 0x40f   : > { %6276 = vmatprep.subr.mxu1 %v4606_v34  ;;  %6240 = vmatprep.subr.mxu0 %v4635_v13 }
 0x410   : > { %6277 = vmatpush3.msra.mxu1 %v4606_v34  ;;  %6241 = vmatpush3.msra.mxu0 %v4635_v13 }
 0x411   : > { %6278 = vmatprep.subr.mxu1 %v4605_v9  ;;  %6242 = vmatprep.subr.mxu0 %v4634_v8 }
 0x412   : > { %6279 = vmatpush3.msra.mxu1 %v4605_v9  ;;  %6243 = vmatpush3.msra.mxu0 %v4634_v8 }
 0x413   : > { %6280 = vmatprep.subr.mxu1 %v4604_v39  ;;  %6244 = vmatprep.subr.mxu0 %v4633_v32 }
 0x414   : > { %6281 = vmatpush3.msra.mxu1 %v4604_v39  ;;  %6245 = vmatpush3.msra.mxu0 %v4633_v32 }
 0x415   : > { %6282 = vmatprep.subr.mxu1 %v4603_v49  ;;  %6246 = vmatprep.subr.mxu0 %v4632_v51 }
 0x416   : > { %6283 = vmatpush3.msra.mxu1 %v4603_v49  ;;  %6247 = vmatpush3.msra.mxu0 %v4632_v51 }
 0x417   : > { %6284 = vmatprep.subr.mxu1 %v4602_v55  ;;  %6304 = vmatprep.subr.mxu0 %v4890_v28 }
 0x418   : > { %6285 = vmatpush3.msra.mxu1 %v4602_v55  ;;  %v4887_v55 = vld [vmem:[#allocation5 + $0x5e0] sm:$0xff] }
 0x419   : > { %6286 = vmatprep.subr.mxu1 %v4601_v31 }
 0x41a   : > { %6287 = vmatpush3.msra.mxu1 %v4601_v31 }
 0x41b   : > { %6288 = vmatprep.subr.mxu1 %v4600_v63 }
 0x41c   : > { %6289 = vmatpush3.msra.mxu1 %v4600_v63 }
 0x41d   : > { %6290 = vmatprep.subr.mxu1 %v4599_v14 }
 0x41e   : > { %6291 = vmatpush3.msra.mxu1 %v4599_v14 }
 0x49d   : > { %v6118_v1 = vpop.f32.mrf.mxu1 }
 0x49f   : > { %v4260_v16 = vpop.f32.mrf.mxu1 }
 0x4a2   : > { %v6121_v7 = vpop.f32.mrf.mxu1 }
 0x4a4   : > { %v4270_v30 = vpop.f32.mrf.mxu1 }
 0x4a5   : > { %v6162_v41 = vpop.f32.mrf.mxu0 }
 0x4a6   : > { %v4371_v40 = vadd.f32 %v6162_v41, %v6118_v1 }
 0x4a7   : > { %v4365_v56 = vpop.f32.mrf.mxu0  ;;  %v6124_v37 = vpop.f32.mrf.mxu1 }
 0x4a8   : > { %v4366_v17 = vadd.f32 %v4365_v56, %v4260_v16 }
 0x4a9   : > { %v6165_v18 = vpop.f32.mrf.mxu0  ;;  %v4280_v27 = vpop.f32.mrf.mxu1 }
 0x4aa   : > { %v4381_v26 = vadd.f32 %v6165_v18, %v6121_v7  ;;  %v4886_v7 = vld [vmem:[#allocation5 + $0x5d8] sm:$0xff]  ;;  %v4885_v18 = vld [vmem:[#allocation5 + $0x5d0] sm:$0xff] }
 0x4ab   : > { %v4375_v19 = vpop.f32.mrf.mxu0  ;;  %v6127_v3 = vpop.f32.mrf.mxu1 }
 0x4ac   : > { %v4376_v33 = vadd.f32 %v4375_v19, %v4270_v30 }
 0x4ad   : > { %v6168_v60 = vpop.f32.mrf.mxu0  ;;  %v4290_v24 = vpop.f32.mrf.mxu1 }
 0x4ae   : > { %v4391_v45 = vadd.f32 %v6168_v60, %v6124_v37  ;;  %v4884_v60 = vld [vmem:[#allocation5 + $0x5c8] sm:$0xff] }
 0x4af   : > { %v4385_v5 = vpop.f32.mrf.mxu0 }
 0x4b0   : > { %v4386_v46 = vadd.f32 %v4385_v5, %v4280_v27 }
 0x4b1   : > { %v6171_v2 = vpop.f32.mrf.mxu0 }
 0x4b2   : > { %v4401_v35 = vadd.f32 %v6171_v2, %v6127_v3  ;;  %v4879_v2 = vld [vmem:[#allocation5 + $0x5a0] sm:$0xff] }
 0x4b3   : > { %v4395_v11 = vpop.f32.mrf.mxu0 }
 0x4b4   : > { %v4396_v39 = vadd.f32 %v4395_v11, %v4290_v24 }
 0x4bf   : > { %v6206_v44 = vpop.f32.mrf.mxu1 }
 0x4c0   : > { %v4543_v12 = vadd.f32 %v6206_v44, %v4371_v40 }
 0x4c1   : > { %v4503_v29 = vpop.f32.mrf.mxu1 }
 0x4c2   : > { %v4559_v4 = vadd.f32 %v8339_v42, %v4543_v12  ;;  %v4542_v23 = vadd.f32 %v4503_v29, %v4366_v17  ;;  %v4883_v12 = vld [vmem:[#allocation5 + $0x5c0] sm:$0xff] }
 0x4c3   : > { %v6209_v20 = vpop.f32.mrf.mxu1 }
 0x4c4   : > { %4567 = vst [vmem:[#allocation3 + $0x11] sm:$0xff] %v4559_v4  ;;  %v4558_v15 = vadd.f32 %v8339_v42, %v4542_v23  ;;  %v4545_v6 = vadd.f32 %v6209_v20, %v4381_v26  ;;  %v4624_v50 = vmax.f32 %v4559_v4, 0.0  ;;  %v4882_v4 = vld [vmem:[#allocation5 + $0x5b8] sm:$0xff] }
 0x4c5   : > { %v4513_v10 = vpop.f32.mrf.mxu1 }
 0x4c6   : > { %4566 = vst [vmem:[#allocation3 + $0x1] sm:$0xff] %v4558_v15  ;;  %v4561_v54 = vadd.f32 %v8339_v42, %v4545_v6  ;;  %v4544_v53 = vadd.f32 %v4513_v10, %v4376_v33  ;;  %v4623_v48 = vmax.f32 %v4558_v15, 0.0  ;;  %v4881_v33 = vld [vmem:[#allocation5 + $0x5b0] sm:$0xff]  ;;  %v4880_v6 = vld [vmem:[#allocation5 + $0x5a8] sm:$0xff]  ;;  %v4878_v10 = vld [vmem:[#allocation5 + $0x598] sm:$0xff] }
 0x4c7   : > { %v6212_v43 = vpop.f32.mrf.mxu1 }
 0x4c8   : > { %4569 = vst [vmem:[#allocation3 + $0x31] sm:$0xff] %v4561_v54  ;;  %v4560_v25 = vadd.f32 %v8339_v42, %v4544_v53  ;;  %v4547_v21 = vadd.f32 %v6212_v43, %v4391_v45  ;;  %6248 = vmatprep.mubr.f32.mxu0 %v4623_v48  ;;  %v4626_v13 = vmax.f32 %v4561_v54, 0.0  ;;  %v4877_v45 = vld [vmem:[#allocation5 + $0x590] sm:$0xff]  ;;  %v4876_v54 = vld [vmem:[#allocation5 + $0x588] sm:$0xff]  ;;  %v4875_v53 = vld [vmem:[#allocation5 + $0x580] sm:$0xff] }
 0x4c9   : > { %v4523_v61 = vpop.f32.mrf.mxu1  ;;  %6249 = vmatmul.mubr.f32.vlgmr.msra.gmra.mxu0 %v4624_v50 }
 0x4ca   : > { %4568 = vst [vmem:[#allocation3 + $0x21] sm:$0xff] %v4560_v25  ;;  %v4563_v59 = vadd.f32 %v8339_v42, %v4547_v21  ;;  %v4546_v62 = vadd.f32 %v4523_v61, %v4386_v46  ;;  %6305 = vmatpush3.msra.mxu0 %v4890_v28  ;;  %v4625_v34 = vmax.f32 %v4560_v25, 0.0 }
 0x4cb   : > { %v6215_v9 = vpop.f32.mrf.mxu1  ;;  %6306 = vmatprep.subr.mxu0 %v4889_v47  ;;  %v4583_v32 = vld [vmem:[#allocation3 + $0x10] sm:$0xff] }
 0x4cc   : > { %4571 = vst [vmem:[#allocation3 + $0x51] sm:$0xff] %v4563_v59  ;;  %v4562_v8 = vadd.f32 %v8339_v42, %v4546_v62  ;;  %v4549_v49 = vadd.f32 %v6215_v9, %v4401_v35  ;;  %6307 = vmatpush3.msra.mxu0 %v4889_v47  ;;  %6251 = vmatprep.mubr.f32.mxu0 %v4625_v34  ;;  %v4591_v16 = vmax.f32 %v4583_v32, 0.0  ;;  %v4628_v56 = vmax.f32 %v4563_v59, 0.0  ;;  %v4859_v48 = vld [vmem:[#allocation3 + $0x12] sm:$0xff] }
 0x4cd   : > { %v4533_v51 = vpop.f32.mrf.mxu1  ;;  %v4582_v31 = vld [vmem:[#allocation3] sm:$0xff]  ;;  %6308 = vmatprep.subr.mxu0 %v4888_v57  ;;  %6252 = vmatmul.mubr.f32.gmra.mxu0 %v4626_v13  ;;  %v4867_v50 = vmax.f32 %v4859_v48, 0.0 }
 0x4ce   : > { %4570 = vst [vmem:[#allocation3 + $0x41] sm:$0xff] %v4562_v8  ;;  %v4565_v28 = vadd.f32 %v8339_v42, %v4549_v49  ;;  %v4548_v63 = vadd.f32 %v4533_v51, %v4396_v39  ;;  %v4590_v14 = vmax.f32 %v4582_v31, 0.0  ;;  %6309 = vmatpush3.msra.mxu0 %v4888_v57  ;;  %v4627_v1 = vmax.f32 %v4562_v8, 0.0 }
 0x4cf   : > { %6310 = vmatprep.subr.mxu0 %v4887_v55  ;;  %v4585_v30 = vld [vmem:[#allocation3 + $0x30] sm:$0xff] }
 0x4d0   : > { %4573 = vst [vmem:[#allocation3 + $0x71] sm:$0xff] %v4565_v28  ;;  %v4564_v41 = vadd.f32 %v8339_v42, %v4548_v63  ;;  %6292 = vmatprep.mubr.f32.mxu1 %v4590_v14  ;;  %6311 = vmatpush3.msra.mxu0 %v4887_v55  ;;  %v4593_v3 = vmax.f32 %v4585_v30, 0.0  ;;  %v4630_v44 = vmax.f32 %v4565_v28, 0.0  ;;  %v4858_v42 = vld [vmem:[#allocation3 + $0x2] sm:$0xff]  ;;  %v4861_v25 = vld [vmem:[#allocation3 + $0x32] sm:$0xff] }
 0x4d1   : > { %6293 = vmatmul.mubr.f32.vlgmr.msra.gmra.mxu1 %v4591_v16  ;;  %v4584_v37 = vld [vmem:[#allocation3 + $0x20] sm:$0xff]  ;;  %6254 = vmatprep.mubr.f32.mxu0 %v4627_v1  ;;  %v4866_v26 = vmax.f32 %v4858_v42, 0.0  ;;  %v4869_v47 = vmax.f32 %v4861_v25, 0.0 }
 0x4d2   : > { %4572 = vst [vmem:[#allocation3 + $0x61] sm:$0xff] %v4564_v41  ;;  %v4592_v27 = vmax.f32 %v4584_v37, 0.0  ;;  %6312 = vmatprep.subr.mxu0 %v4886_v7  ;;  %6255 = vmatmul.mubr.f32.gmra.mxu0 %v4628_v56  ;;  %v4629_v19 = vmax.f32 %v4564_v41, 0.0  ;;  %v4860_v43 = vld [vmem:[#allocation3 + $0x22] sm:$0xff] }
 0x4d3   : > { %6313 = vmatpush3.msra.mxu0 %v4886_v7  ;;  %v4587_v24 = vld [vmem:[#allocation3 + $0x50] sm:$0xff]  ;;  %v4868_v46 = vmax.f32 %v4860_v43, 0.0  ;;  %v5351_v41 = vld [vmem:[%s8426_s4 + $0x3] ss:$0 sm:$0xff] }
 0x4d4   : > { %6295 = vmatprep.mubr.f32.mxu1 %v4592_v27  ;;  %6314 = vmatprep.subr.mxu0 %v4885_v18  ;;  %v4595_v5 = vmax.f32 %v4587_v24, 0.0  ;;  %v4863_v61 = vld [vmem:[#allocation3 + $0x52] sm:$0xff] }
 0x4d5   : > { %6296 = vmatmul.mubr.f32.gmra.mxu1 %v4593_v3  ;;  %v4586_v40 = vld [vmem:[#allocation3 + $0x40] sm:$0xff]  ;;  %6315 = vmatpush3.msra.mxu0 %v4885_v18  ;;  %v4871_v59 = vmax.f32 %v4863_v61, 0.0 }
 0x4d6   : > { %v4594_v17 = vmax.f32 %v4586_v40, 0.0  ;;  %6257 = vmatprep.mubr.f32.mxu0 %v4629_v19  ;;  %6316 = vmatprep.subr.mxu0 %v4884_v60  ;;  %v4862_v21 = vld [vmem:[#allocation3 + $0x42] sm:$0xff] }
 0x4d7   : > { %6258 = vmatmul.mubr.f32.gmra.mxu0 %v4630_v44  ;;  %v4589_v29 = vld [vmem:[#allocation3 + $0x70] sm:$0xff]  ;;  %v4870_v11 = vmax.f32 %v4862_v21, 0.0 }
 0x4d8   : > { %6298 = vmatprep.mubr.f32.mxu1 %v4594_v17  ;;  %6317 = vmatpush3.msra.mxu0 %v4884_v60  ;;  %v4597_v15 = vmax.f32 %v4589_v29, 0.0  ;;  %v4865_v34 = vld [vmem:[#allocation3 + $0x72] sm:$0xff] }
 0x4d9   : > { %6299 = vmatmul.mubr.f32.gmra.mxu1 %v4595_v5  ;;  %v4588_v23 = vld [vmem:[#allocation3 + $0x60] sm:$0xff]  ;;  %6318 = vmatprep.subr.mxu0 %v4883_v12  ;;  %v4873_v57 = vmax.f32 %v4865_v34, 0.0  ;;  %v4575_v60 = vld [vmem:[#allocation2 + $0x11] sm:$0xff] }
 0x4da   : > { %v4596_v20 = vmax.f32 %v4588_v23, 0.0  ;;  %6336 = vmatprep.mubr.f32.mxu0 %v4866_v26  ;;  %6319 = vmatpush3.msra.mxu0 %v4883_v12  ;;  %v4864_v35 = vld [vmem:[#allocation3 + $0x62] sm:$0xff] }
 0x4db   : > { %6320 = vmatprep.subr.mxu0 %v4882_v4  ;;  %v4872_v62 = vmax.f32 %v4864_v35, 0.0  ;;  %v4574_v5 = vld [vmem:[#allocation2 + $0x1] sm:$0xff] }
 0x4dc   : > { %6301 = vmatprep.mubr.f32.mxu1 %v4596_v20  ;;  %6321 = vmatpush3.msra.mxu0 %v4882_v4 }
 0x4dd   : > { %6302 = vmatmul.mubr.f32.gmra.mxu1 %v4597_v15  ;;  %6322 = vmatprep.subr.mxu0 %v4881_v33 }
 0x4de   : > { %6323 = vmatpush3.msra.mxu0 %v4881_v33 }
 0x4df   : > { %6324 = vmatprep.subr.mxu0 %v4880_v6 }
 0x4e0   : > { %6325 = vmatpush3.msra.mxu0 %v4880_v6 }
 0x4e1   : > { %6326 = vmatprep.subr.mxu0 %v4879_v2 }
 0x4e2   : > { %6327 = vmatpush3.msra.mxu0 %v4879_v2 }
 0x4e3   : > { %6328 = vmatprep.subr.mxu0 %v4878_v10 }
 0x4e4   : > { %6329 = vmatpush3.msra.mxu0 %v4878_v10 }
 0x4e5   : > { %6330 = vmatprep.subr.mxu0 %v4877_v45 }
 0x4e6   : > { %6331 = vmatpush3.msra.mxu0 %v4877_v45 }
 0x4e7   : > { %6332 = vmatprep.subr.mxu0 %v4876_v54 }
 0x4e8   : > { %6333 = vmatpush3.msra.mxu0 %v4876_v54 }
 0x4e9   : > { %6334 = vmatprep.subr.mxu0 %v4875_v53 }
 0x4ea   : > { %6335 = vmatpush3.msra.mxu0 %v4875_v53 }
 0x4eb   : > { %6337 = vmatmul.mubr.f32.vlgmr.msra.gmra.mxu0 %v4867_v50 }
 0x4ec   : > { %6339 = vmatprep.mubr.f32.mxu0 %v4868_v46 }
 0x4ef   : > { %6340 = vmatmul.mubr.f32.gmra.mxu0 %v4869_v47 }
 0x4f0   : > { %6342 = vmatprep.mubr.f32.mxu0 %v4870_v11 }
 0x4f3   : > { %6343 = vmatmul.mubr.f32.gmra.mxu0 %v4871_v59 }
 0x4f4   : > { %6345 = vmatprep.mubr.f32.mxu0 %v4872_v62 }
 0x4f7   : > { %6346 = vmatmul.mubr.f32.gmra.mxu0 %v4873_v57 }
 0x589   : > { %v6250_v9 = vpop.f32.mrf.mxu0 }
 0x58b   : > { %v4714_v13 = vpop.f32.mrf.mxu0 }
 0x58d   : > { %v6253_v39 = vpop.f32.mrf.mxu0 }
 0x58f   : > { %v4724_v49 = vpop.f32.mrf.mxu0 }
 0x591   : > { %v6294_v8 = vpop.f32.mrf.mxu1 }
 0x592   : > { %v6256_v55 = vpop.f32.mrf.mxu0  ;;  %v4825_v16 = vadd.f32 %v6294_v8, %v6250_v9 }
 0x593   : > { %v4819_v32 = vpop.f32.mrf.mxu1 }
 0x594   : > { %v4734_v31 = vpop.f32.mrf.mxu0  ;;  %v4820_v30 = vadd.f32 %v4819_v32, %v4714_v13 }
 0x595   : > { %v6297_v51 = vpop.f32.mrf.mxu1 }
 0x596   : > { %v4835_v27 = vadd.f32 %v6297_v51, %v6253_v39 }
 0x597   : > { %v4829_v28 = vpop.f32.mrf.mxu1  ;;  %v6259_v63 = vpop.f32.mrf.mxu0 }
 0x598   : > { %v4830_v40 = vadd.f32 %v4829_v28, %v4724_v49 }
 0x599   : > { %v6300_v14 = vpop.f32.mrf.mxu1  ;;  %v4744_v1 = vpop.f32.mrf.mxu0 }
 0x59a   : > { %v4845_v26 = vadd.f32 %v6300_v14, %v6256_v55 }
 0x59b   : > { %v4839_v37 = vpop.f32.mrf.mxu1 }
 0x59c   : > { %v4840_v15 = vadd.f32 %v4839_v37, %v4734_v31 }
 0x59d   : > { %v6303_v12 = vpop.f32.mrf.mxu1 }
 0x59e   : > { %v4855_v53 = vadd.f32 %v6303_v12, %v6259_v63 }
 0x59f   : > { %v4849_v45 = vpop.f32.mrf.mxu1 }
 0x5a0   : > { %v4850_v25 = vadd.f32 %v4849_v45, %v4744_v1 }
 0x5ab   : > { %v6338_v7 = vpop.f32.mrf.mxu0 }
 0x5ac   : > { %v4997_v56 = vadd.f32 %v6338_v7, %v4825_v16 }
 0x5ad   : > { %v4957_v18 = vpop.f32.mrf.mxu0 }
 0x5ae   : > { %v5013_v19 = vadd.f32 %v5351_v41, %v4997_v56  ;;  %v4996_v3 = vadd.f32 %v4957_v18, %v4820_v30 }
 0x5af   : > { %v6341_v24 = vpop.f32.mrf.mxu0 }
 0x5b0   : > { %v5021_v44 = vadd.f32 %v5013_v19, %v4575_v60  ;;  %v5012_v42 = vadd.f32 %v5351_v41, %v4996_v3  ;;  %v4999_v17 = vadd.f32 %v6341_v24, %v4835_v27 }
 0x5b1   : > { %v4967_v29 = vpop.f32.mrf.mxu0 }
 0x5b2   : > { %5029 = vst [vmem:[#allocation2 + $0x11] sm:$0xff] %v5021_v44  ;;  %v5020_v4 = vadd.f32 %v5012_v42, %v4574_v5  ;;  %v5015_v23 = vadd.f32 %v5351_v41, %v4999_v17  ;;  %v4998_v20 = vadd.f32 %v4967_v29, %v4830_v40  ;;  %5045 = vst [vmem:[%s8355_s16 + $0x8] sm:$0xff] %v5021_v44 }
 0x5b3   : > { %v6344_v33 = vpop.f32.mrf.mxu0 }
 0x5b4   : > { %5028 = vst [vmem:[#allocation2 + $0x1] sm:$0xff] %v5020_v4  ;;  %v5023_v6 = vadd.f32 %v5015_v23, %v8306_v52  ;;  %v5014_v2 = vadd.f32 %v5351_v41, %v4998_v20  ;;  %v5001_v10 = vadd.f32 %v6344_v33, %v4845_v26  ;;  %5044 = vst [vmem:[%s8355_s16] sm:$0xff] %v5020_v4 }
 0x5b5   : > { %v4977_v54 = vpop.f32.mrf.mxu0 }
 0x5b6   : > { %5031 = vst [vmem:[#allocation2 + $0x31] sm:$0xff] %v5023_v6  ;;  %v5022_v48 = vadd.f32 %v5014_v2, %v8310_v58  ;;  %v5017_v43 = vadd.f32 %v5351_v41, %v5001_v10  ;;  %v5000_v50 = vadd.f32 %v4977_v54, %v4840_v15  ;;  %5047 = vst [vmem:[%s8355_s16 + $0x18] sm:$0xff] %v5023_v6 }
 0x5b7   : > { %v6347_v46 = vpop.f32.mrf.mxu0 }
 0x5b8   : > { %5030 = vst [vmem:[#allocation2 + $0x21] sm:$0xff] %v5022_v48  ;;  %v5025_v52 = vadd.f32 %v5017_v43, %v8314_v38  ;;  %v5016_v21 = vadd.f32 %v5351_v41, %v5000_v50  ;;  %v5003_v47 = vadd.f32 %v6347_v46, %v4855_v53  ;;  %5046 = vst [vmem:[%s8355_s16 + $0x10] sm:$0xff] %v5022_v48 }
 0x5b9   : > { %v4987_v11 = vpop.f32.mrf.mxu0 }
 0x5ba   : > { %5033 = vst [vmem:[#allocation2 + $0x51] sm:$0xff] %v5025_v52  ;;  %v5024_v58 = vadd.f32 %v5016_v21, %v8321_v36  ;;  %v5019_v61 = vadd.f32 %v5351_v41, %v5003_v47  ;;  %v5002_v35 = vadd.f32 %v4987_v11, %v4850_v25  ;;  %5049 = vst [vmem:[%s8355_s16 + $0x28] sm:$0xff] %v5025_v52 }
 0x5bc   : > { %5032 = vst [vmem:[#allocation2 + $0x41] sm:$0xff] %v5024_v58  ;;  %v5027_v59 = vadd.f32 %v5019_v61, %v8325_v22  ;;  %v5018_v38 = vadd.f32 %v5351_v41, %v5002_v35  ;;  %5048 = vst [vmem:[%s8355_s16 + $0x20] sm:$0xff] %v5024_v58 }
 0x5be   : > { %5035 = vst [vmem:[#allocation2 + $0x71] sm:$0xff] %v5027_v59  ;;  %v5026_v36 = vadd.f32 %v5018_v38, %v8330_v0  ;;  %5051 = vst [vmem:[%s8355_s16 + $0x38] sm:$0xff] %v5027_v59 }
 0x5c0   : > { %5034 = vst [vmem:[#allocation2 + $0x61] sm:$0xff] %v5026_v36  ;;  %5050 = vst [vmem:[%s8355_s16 + $0x30] sm:$0xff] %v5026_v36 }
 0x5c1   : > { %6468 = shalt.err (!%p6465_p0)
}
 0x5c2   : > { %s6469_s9 = scalar_lea.hbm %s8373_s25, 1024  ;;  %s6473_s12 = scalar_lea.hbm %s8427_s5, 2048 }
 0x5c3   : > { %p6470_p1 = scmp.ne.s32.totalorder %s8373_s25, %s6469_s9  ;;  %p6474_p4 = scmp.lt.s32.totalorder %s8373_s25, %s8427_s5 }
 0x5c4   : > { %p6475_p7 = scmp.lt.s32.totalorder %s6473_s12, %s6469_s9 }
 0x5c5   : > { %p6471_p2 = pnand %p6470_p1, %p6598_p5 }
 0x5c6   : > { %p6476_p6 = por %p6475_p7, %p6474_p4 }
 0x5c7   : > { %p6472_p3 = pneg %p6471_p2 }
 0x5c9   : > { %p6477_p8 = pnand %p6476_p6, %p6472_p3 }
 0x5cb   : > { %6480 = shalt.err (!%p6477_p8)
}
 0x5cc   : > { %s6528_s16 = smov 128   ;;  %s6529_s17 = smov 8  }
 0x5cd   : > { %6365 = dma.vmem_to_hbm [thread:$0]  (%p6598_p5), %s8375_s13, 1024, %s8373_s25, %s8382_s22, %s6528_s16, %s6528_s16, %s6529_s17  }
 0x5ce PF: > { %p6377_p9 = scmp.ge.s32.totalorder %s6519_s21, 2  ;;  %s5081_s23 = sand.u32 1, %s6507_s18  }
 0x5cf   : > { %p8507_p10 = scmp.ne.s32.totalorder %s8436_s29, 0  ;;  %s5082_s30 = scalar_lea.sflag [#allocation7], %s5081_s23 }
 0x5d1   : > { %p6372_p11 = pnand %p6377_p9, %p8507_p10 }
 0x5d3   : > { %p6373_p12 = pneg %p6372_p11 }
 0x5d5   : > { %6502 = dma.done.wait (%p6373_p12), %s5082_s30, 1024  }
 0x5d6   : > { %6504 = vsyncadd (%p6373_p12), %s5082_s30, 4294966272  ;;  %p16_p13 = scmp.ge.s32.totalorder %s6585_s24, 4   ;;  %s8508_s18 = smov %s6511_s19 }
 0x5d7   : > { %s8509_s19 = smov %s6515_s20  ;;  %s8510_s20 = smov %s6596_s27 }
 0x5d8   : > { %s8511_s21 = smov %s6585_s24  ;;  %18 = sbr.rel (!%p16_p13) target bundleno = 4 (0x4), region = 96 }
 0x5dd   :  { %5087 = vsyncpa [#allocation6], 1 }
 0x5de   :  { %5089 = vsyncpa [#allocation6 + $0x1], 1 }
 0x5df   :  { %5090 = vsyncpa [#allocation7], 1 }
 0x5e0   :  { %5092 = vsyncpa [#allocation7 + $0x1], 1 }

</bundles_post_ra>
